<compile_context>
chip_gen: v6e
topology: v6e:2x2x1
jax: 0.10.0
libtpu: 0.0.40
codegen_flags: <defaults>
</compile_context>

<pallas_src>
import functools

import jax
import jax.numpy as jnp
import numpy as np
from jax.experimental import pallas as pl
from jax.experimental.pallas import tpu as pltpu

KH = KW = 5
PAD = 2
COMPUTE_DTYPE = jnp.bfloat16


# ----------------------------------------------------------------------------
# Kernel 1: fused conv(5x5, pad=2) + bias + ReLU + 2x2 max-pool (one image / block)
# ----------------------------------------------------------------------------
def _conv_relu_pool_kernel(x_ref, w_ref, b_ref, o_ref, *, H, W, Cout):
    # x_ref: (1, H+4, (W+4)*Cin)       bf16, zero-padded NHWC slab (lanes = w*Cin+c)
    # w_ref: (KH, (W+4)*Cin, W*Cout)   bf16, block-banded conv weights
    # b_ref: (1, W*Cout)               f32, bias tiled across W
    # o_ref: (1, H//2, (W//2)*Cout)    pooled output (lanes = w*Cout+c)
    xp = x_ref[0]                                            # (H+4, (W+4)*Cin)
    acc = jnp.dot(xp[0:H, :], w_ref[0], preferred_element_type=jnp.float32)
    for kh in range(1, KH):                                  # 5 MXU matmuls, f32 accum
        acc = acc + jnp.dot(xp[kh:kh + H, :], w_ref[kh],
                            preferred_element_type=jnp.float32)
    acc = jnp.maximum(acc + b_ref[...], 0.0)                 # bias + ReLU  (f32)

    Ho, Wo = H // 2, W // 2
    # 2x2 max pool.  Rows: max over adjacent sublane pairs.
    even = jnp.concatenate([acc[2 * i:2 * i + 1, :] for i in range(Ho)], axis=0)
    odd = jnp.concatenate([acc[2 * i + 1:2 * i + 2, :] for i in range(Ho)], axis=0)
    rows = jnp.maximum(even, odd)                            # (Ho, W*Cout)
    # Columns: max over adjacent Cout-wide lane blocks.
    pooled = jnp.concatenate(
        [jnp.maximum(rows[:, (2 * j) * Cout:(2 * j + 1) * Cout],
                     rows[:, (2 * j + 1) * Cout:(2 * j + 2) * Cout])
         for j in range(Wo)], axis=1)                        # (Ho, Wo*Cout)
    o_ref[0] = pooled.astype(o_ref.dtype)


def conv_relu_pool(x, band_w, bias, *, H, W, Cout, out_dtype):
    """x: (N, H+4, (W+4)*Cin) padded bf16 slab -> (N, H//2, (W//2)*Cout)."""
    N, Hp, WpCin = x.shape
    Ho, Wo = H // 2, W // 2
    kernel = functools.partial(_conv_relu_pool_kernel, H=H, W=W, Cout=Cout)
    return pl.pallas_call(
        kernel,
        out_shape=jax.ShapeDtypeStruct((N, Ho, Wo * Cout), out_dtype),
        grid=(N,),
        in_specs=[
            pl.BlockSpec((1, Hp, WpCin), lambda n: (n, 0, 0)),
            pl.BlockSpec((KH, WpCin, W * Cout), lambda n: (0, 0, 0)),  # VMEM-resident
            pl.BlockSpec((1, W * Cout), lambda n: (0, 0)),
        ],
        out_specs=pl.BlockSpec((1, Ho, Wo * Cout), lambda n: (n, 0, 0)),
        compiler_params=pltpu.CompilerParams(dimension_semantics=("parallel",)),
    )(x, band_w, bias)


# ----------------------------------------------------------------------------
# Kernel 2: fused fc1+ReLU -> fc2+ReLU -> fc3 (intermediates stay in VMEM)
# ----------------------------------------------------------------------------
def _fc_fused_kernel(x_ref, w1_ref, b1_ref, w2_ref, b2_ref, w3_ref, b3_ref, o_ref):
    h = jnp.dot(x_ref[...], w1_ref[...], preferred_element_type=jnp.float32)
    h = jnp.maximum(h + b1_ref[...], 0.0)            # fc1 + (Dropout: identity) + ReLU
    h = jnp.dot(h.astype(COMPUTE_DTYPE), w2_ref[...],
                preferred_element_type=jnp.float32)
    h = jnp.maximum(h + b2_ref[...], 0.0)            # fc2 + ReLU
    h = jnp.dot(h.astype(COMPUTE_DTYPE), w3_ref[...],
                preferred_element_type=jnp.float32)
    o_ref[...] = (h + b3_ref[...]).astype(o_ref.dtype)


def fc_fused(x, w1, b1, w2, b2, w3, b3, *, tile_m=256):
    M, K1 = x.shape
    N1, N2, N3 = w1.shape[1], w2.shape[1], w3.shape[1]
    tm = M if M <= tile_m else tile_m
    const = lambda i: (0, 0)
    return pl.pallas_call(
        _fc_fused_kernel,
        out_shape=jax.ShapeDtypeStruct((M, N3), jnp.float32),
        grid=(pl.cdiv(M, tm),),
        in_specs=[
            pl.BlockSpec((tm, K1), lambda i: (i, 0)),
            pl.BlockSpec((K1, N1), const), pl.BlockSpec((1, N1), const),
            pl.BlockSpec((N1, N2), const), pl.BlockSpec((1, N2), const),
            pl.BlockSpec((N2, N3), const), pl.BlockSpec((1, N3), const),
        ],
        out_specs=pl.BlockSpec((tm, N3), lambda i: (i, 0)),
        compiler_params=pltpu.CompilerParams(dimension_semantics=("parallel",)),
    )(x, w1, b1, w2, b2, w3, b3)


# ----------------------------------------------------------------------------
# One-time parameter preparation (outside jit): banded conv weights, permuted /
# transposed FC weights, tiled biases, bf16 casts.
# ----------------------------------------------------------------------------
def _banded_conv_weight(w_oihw, W_out, dtype):
    """PyTorch (Cout, Cin, KH, KW) -> block-banded (KH, (W_out+KW-1)*Cin, W_out*Cout)."""
    w = np.asarray(w_oihw, np.float32)               # (Cout, Cin, KH, KW)
    Cout, Cin, kh_, kw_ = w.shape
    w = w.transpose(2, 3, 1, 0)                      # (KH, KW, Cin, Cout)
    Wp = W_out + KW - 1
    band = np.zeros((KH, Wp * Cin, W_out * Cout), np.float32)
    for wo in range(W_out):
        for kw in range(KW):
            band[:, (wo + kw) * Cin:(wo + kw + 1) * Cin,
                    wo * Cout:(wo + 1) * Cout] = w[:, kw]
    return jnp.asarray(band, dtype)


def prepare_params(params, dtype=COMPUTE_DTYPE):
    prep = {}
    prep["conv1_band"] = _banded_conv_weight(params["conv1_w"], 28, dtype)
    prep["conv1_bias"] = jnp.tile(params["conv1_b"], 28)[None, :].astype(jnp.float32)
    prep["conv2_band"] = _banded_conv_weight(params["conv2_w"], 14, dtype)
    prep["conv2_bias"] = jnp.tile(params["conv2_b"], 14)[None, :].astype(jnp.float32)
    # fc1 columns: PyTorch flatten order is (c, h, w); our conv output flattens as
    # (h, w, c).  Permute the weight columns once so no transpose happens per forward.
    fc1 = np.asarray(params["fc1_w"], np.float32)           # (400, 1568)
    fc1 = fc1.reshape(400, 32, 7, 7).transpose(2, 3, 1, 0).reshape(32 * 7 * 7, 400)
    prep["fc1_w"] = jnp.asarray(fc1, dtype)
    prep["fc1_b"] = params["fc1_b"][None, :].astype(jnp.float32)
    prep["fc2_w"] = jnp.asarray(params["fc2_w"]).T.astype(dtype)   # (400, 80)
    prep["fc2_b"] = params["fc2_b"][None, :].astype(jnp.float32)
    prep["fc3_w"] = jnp.asarray(params["fc3_w"]).T.astype(dtype)   # (80, 47)
    prep["fc3_b"] = params["fc3_b"][None, :].astype(jnp.float32)
    return prep


# ----------------------------------------------------------------------------
# Forward pass (matches CNN.forward semantics, eval mode)
# ----------------------------------------------------------------------------
def cnn_forward(x_nchw, prep):
    N = x_nchw.shape[0]

    # Conv2d(1,16,5,1,2) + ReLU + MaxPool(2)   -- one fused kernel
    x = jnp.transpose(x_nchw, (0, 2, 3, 1))                       # (N,28,28,1)
    x = jnp.pad(x, ((0, 0), (PAD, PAD), (PAD, PAD), (0, 0)))      # (N,32,32,1)
    x = x.reshape(N, 32, 32 * 1).astype(COMPUTE_DTYPE)
    y = conv_relu_pool(x, prep["conv1_band"], prep["conv1_bias"],
                       H=28, W=28, Cout=16, out_dtype=COMPUTE_DTYPE)   # (N,14,224)

    # Conv2d(16,32,5,1,2) + Dropout(eval: identity) + ReLU + MaxPool(2)
    y = y.reshape(N, 14, 14, 16)
    y = jnp.pad(y, ((0, 0), (PAD, PAD), (PAD, PAD), (0, 0)))      # (N,18,18,16)
    y = y.reshape(N, 18, 18 * 16)
    y = conv_relu_pool(y, prep["conv2_band"], prep["conv2_bias"],
                       H=14, W=14, Cout=32, out_dtype=COMPUTE_DTYPE)   # (N,7,224)

    # Flatten in (h, w, c) order; fc1 weight columns were pre-permuted to match.
    y = y.reshape(N, 7 * 7 * 32)

    # Linear(1568,400)+Dropout+ReLU -> Linear(400,80)+ReLU -> Linear(80,47), fused.
    return fc_fused(y, prep["fc1_w"], prep["fc1_b"], prep["fc2_w"], prep["fc2_b"],
                    prep["fc3_w"], prep["fc3_b"])


# ----------------------------------------------------------------------------
# Pure-jnp reference (independent im2col path, same bf16 operand quantization)
# ----------------------------------------------------------------------------
def im2col(x, k, pad):
    N, H, W, C = x.shape
    xp = jnp.pad(x, ((0, 0), (pad, pad), (pad, pad), (0, 0)))
    cols = []
    for kh in range(k):
        for kw in range(k):
            cols.append(xp[:, kh:kh + H, kw:kw + W, :])
    patches = jnp.stack(cols, axis=-2)                 # (N,H,W,k*k,C)
    return patches.reshape(N * H * W, k * k * C)


def conv_w_to_mat(w_oihw):
    Cout, Cin, kh_, kw_ = w_oihw.shape
    return jnp.transpose(w_oihw, (2, 3, 1, 0)).reshape(kh_ * kw_ * Cin, Cout)


def cnn_forward_ref(x_nchw, params, dtype=COMPUTE_DTYPE):
    N = x_nchw.shape[0]
    x = jnp.transpose(x_nchw, (0, 2, 3, 1))

    def conv(z, w, b):
        cols = im2col(z, 5, 2).astype(dtype)
        wm = conv_w_to_mat(w).astype(dtype)
        return jnp.dot(cols, wm, preferred_element_type=jnp.float32) + b[None, :]

    def pool(z):
        return jnp.maximum(
            jnp.maximum(z[:, 0::2, 0::2, :], z[:, 0::2, 1::2, :]),
            jnp.maximum(z[:, 1::2, 0::2, :], z[:, 1::2, 1::2, :]))

    def lin(z, w, b, relu):
        out = jnp.dot(z.astype(dtype), w.T.astype(dtype),
                      preferred_element_type=jnp.float32) + b[None, :]
        return jnp.maximum(out, 0.0) if relu else out

    y = jnp.maximum(conv(x, params["conv1_w"], params["conv1_b"]), 0.0)
    y = pool(y.reshape(N, 28, 28, 16)).astype(dtype)
    y = jnp.maximum(conv(y, params["conv2_w"], params["conv2_b"]), 0.0)
    y = pool(y.reshape(N, 14, 14, 32)).astype(dtype)
    y = jnp.transpose(y, (0, 3, 1, 2)).reshape(N, 32 * 7 * 7)
    y = lin(y, params["fc1_w"], params["fc1_b"], True)
    y = lin(y, params["fc2_w"], params["fc2_b"], True)
    y = lin(y, params["fc3_w"], params["fc3_b"], False)
    return y


# ----------------------------------------------------------------------------
# Deterministic parameter init (PyTorch nn.Conv2d / nn.Linear shapes)
# ----------------------------------------------------------------------------
def init_params(key):
    ks = jax.random.split(key, 10)

    def rnd(k, shape, scale):
        return scale * jax.random.normal(k, shape, jnp.float32)

    return {
        "conv1_w": rnd(ks[0], (16, 1, 5, 5), 0.10),
        "conv1_b": rnd(ks[1], (16,), 0.10),
        "conv2_w": rnd(ks[2], (32, 16, 5, 5), 0.05),
        "conv2_b": rnd(ks[3], (32,), 0.05),
        "fc1_w": rnd(ks[4], (400, 32 * 7 * 7), 0.02),
        "fc1_b": rnd(ks[5], (400,), 0.02),
        "fc2_w": rnd(ks[6], (80, 400), 0.05),
        "fc2_b": rnd(ks[7], (80,), 0.05),
        "fc3_w": rnd(ks[8], (47, 80), 0.05),
        "fc3_b": rnd(ks[9], (47,), 0.05),
    }


if __name__ == "__main__":
    key = jax.random.PRNGKey(0)
    pkey, xkey = jax.random.split(key)
    params = init_params(pkey)
    prep = prepare_params(params)          # one-time weight prep (no per-forward transposes)

    # 28x28 is required by the 32*7*7 flatten in the module.
    x = jax.random.normal(xkey, (2, 1, 28, 28), jnp.float32)

    out = jax.jit(cnn_forward)(x, prep)
    out = jax.block_until_ready(out)
    assert out.shape == (2, 47), out.shape

    ref = jax.block_until_ready(cnn_forward_ref(x, params))
    np.testing.assert_allclose(np.asarray(out), np.asarray(ref), rtol=5e-3, atol=5e-3)

    print("KERNEL_OK")
</pallas_src>

<mosaic_0001>
module attributes {stable_mosaic.version = 11 : i64} {
  func.func @_conv_relu_pool_kernel(%arg0: i32, %arg1: memref<1x32x32xbf16, #tpu.memory_space<vmem>>, %arg2: memref<5x32x448xbf16, #tpu.memory_space<vmem>>, %arg3: memref<1x448xf32, #tpu.memory_space<vmem>>, %arg4: memref<1x14x224xbf16, #tpu.memory_space<vmem>>) attributes {dimension_semantics = [#tpu.dimension_semantics<parallel>], iteration_bounds = array<i64: 2>, scalar_prefetch = 0 : i64, scratch_operands = 0 : i64, tpu.core_type = #tpu.core_type<tc>, window_params = [{transform_indices = @transform_0, window_bounds = array<i64: 1, 32, 32>}, {pipeline_mode = #tpu.pipeline_mode<synchronous>, transform_indices = @transform_1, window_bounds = array<i64: 5, 32, 448>}, {pipeline_mode = #tpu.pipeline_mode<synchronous>, transform_indices = @transform_2, window_bounds = array<i64: 1, 448>}, {transform_indices = @transform_3, window_bounds = array<i64: 1, 14, 224>}]} {
    %c0 = arith.constant 0 : index
    %c0_0 = arith.constant 0 : index
    %c0_1 = arith.constant 0 : index
    %0 = vector.load %arg1[%c0, %c0_0, %c0_1] : memref<1x32x32xbf16, #tpu.memory_space<vmem>>, vector<1x32x32xbf16>
    %1 = vector.shape_cast %0 : vector<1x32x32xbf16> to vector<32x32xbf16>
    %2 = vector.extract_strided_slice %1 {offsets = [0, 0], sizes = [28, 32], strides = [1, 1]} : vector<32x32xbf16> to vector<28x32xbf16>
    %c0_2 = arith.constant 0 : index
    %c0_3 = arith.constant 0 : index
    %c0_4 = arith.constant 0 : index
    %3 = vector.load %arg2[%c0_2, %c0_3, %c0_4] : memref<5x32x448xbf16, #tpu.memory_space<vmem>>, vector<1x32x448xbf16>
    %4 = vector.shape_cast %3 : vector<1x32x448xbf16> to vector<32x448xbf16>
    %cst = arith.constant dense<0.000000e+00> : vector<28x448xf32>
    %5 = tpu.matmul %2, %4, %cst {dimension_numbers = #tpu.dot_dimension_numbers<[1], [0], [0], [1], [0, 0, 1, 1], [], []>} : vector<28x32xbf16>, vector<32x448xbf16>, vector<28x448xf32> -> vector<28x448xf32>
    %6 = vector.extract_strided_slice %1 {offsets = [1, 0], sizes = [28, 32], strides = [1, 1]} : vector<32x32xbf16> to vector<28x32xbf16>
    %c1 = arith.constant 1 : index
    %c0_5 = arith.constant 0 : index
    %c0_6 = arith.constant 0 : index
    %7 = vector.load %arg2[%c1, %c0_5, %c0_6] : memref<5x32x448xbf16, #tpu.memory_space<vmem>>, vector<1x32x448xbf16>
    %8 = vector.shape_cast %7 : vector<1x32x448xbf16> to vector<32x448xbf16>
    %cst_7 = arith.constant dense<0.000000e+00> : vector<28x448xf32>
    %9 = tpu.matmul %6, %8, %cst_7 {dimension_numbers = #tpu.dot_dimension_numbers<[1], [0], [0], [1], [0, 0, 1, 1], [], []>} : vector<28x32xbf16>, vector<32x448xbf16>, vector<28x448xf32> -> vector<28x448xf32>
    %10 = arith.addf %5, %9 : vector<28x448xf32>
    %11 = vector.extract_strided_slice %1 {offsets = [2, 0], sizes = [28, 32], strides = [1, 1]} : vector<32x32xbf16> to vector<28x32xbf16>
    %c2 = arith.constant 2 : index
    %c0_8 = arith.constant 0 : index
    %c0_9 = arith.constant 0 : index
    %12 = vector.load %arg2[%c2, %c0_8, %c0_9] : memref<5x32x448xbf16, #tpu.memory_space<vmem>>, vector<1x32x448xbf16>
    %13 = vector.shape_cast %12 : vector<1x32x448xbf16> to vector<32x448xbf16>
    %cst_10 = arith.constant dense<0.000000e+00> : vector<28x448xf32>
    %14 = tpu.matmul %11, %13, %cst_10 {dimension_numbers = #tpu.dot_dimension_numbers<[1], [0], [0], [1], [0, 0, 1, 1], [], []>} : vector<28x32xbf16>, vector<32x448xbf16>, vector<28x448xf32> -> vector<28x448xf32>
    %15 = arith.addf %10, %14 : vector<28x448xf32>
    %16 = vector.extract_strided_slice %1 {offsets = [3, 0], sizes = [28, 32], strides = [1, 1]} : vector<32x32xbf16> to vector<28x32xbf16>
    %c3 = arith.constant 3 : index
    %c0_11 = arith.constant 0 : index
    %c0_12 = arith.constant 0 : index
    %17 = vector.load %arg2[%c3, %c0_11, %c0_12] : memref<5x32x448xbf16, #tpu.memory_space<vmem>>, vector<1x32x448xbf16>
    %18 = vector.shape_cast %17 : vector<1x32x448xbf16> to vector<32x448xbf16>
    %cst_13 = arith.constant dense<0.000000e+00> : vector<28x448xf32>
    %19 = tpu.matmul %16, %18, %cst_13 {dimension_numbers = #tpu.dot_dimension_numbers<[1], [0], [0], [1], [0, 0, 1, 1], [], []>} : vector<28x32xbf16>, vector<32x448xbf16>, vector<28x448xf32> -> vector<28x448xf32>
    %20 = arith.addf %15, %19 : vector<28x448xf32>
    %21 = vector.extract_strided_slice %1 {offsets = [4, 0], sizes = [28, 32], strides = [1, 1]} : vector<32x32xbf16> to vector<28x32xbf16>
    %c4 = arith.constant 4 : index
    %c0_14 = arith.constant 0 : index
    %c0_15 = arith.constant 0 : index
    %22 = vector.load %arg2[%c4, %c0_14, %c0_15] : memref<5x32x448xbf16, #tpu.memory_space<vmem>>, vector<1x32x448xbf16>
    %23 = vector.shape_cast %22 : vector<1x32x448xbf16> to vector<32x448xbf16>
    %cst_16 = arith.constant dense<0.000000e+00> : vector<28x448xf32>
    %24 = tpu.matmul %21, %23, %cst_16 {dimension_numbers = #tpu.dot_dimension_numbers<[1], [0], [0], [1], [0, 0, 1, 1], [], []>} : vector<28x32xbf16>, vector<32x448xbf16>, vector<28x448xf32> -> vector<28x448xf32>
    %25 = arith.addf %20, %24 : vector<28x448xf32>
    %c0_17 = arith.constant 0 : index
    %c0_18 = arith.constant 0 : index
    %26 = vector.load %arg3[%c0_17, %c0_18] : memref<1x448xf32, #tpu.memory_space<vmem>>, vector<1x448xf32>
    %27 = vector.broadcast %26 : vector<1x448xf32> to vector<28x448xf32>
    %28 = arith.addf %25, %27 : vector<28x448xf32>
    %cst_19 = arith.constant 0.000000e+00 : f32
    %29 = vector.broadcast %cst_19 : f32 to vector<28x448xf32>
    %30 = arith.maximumf %28, %29 : vector<28x448xf32>
    %31 = vector.extract_strided_slice %30 {offsets = [0, 0], sizes = [1, 448], strides = [1, 1]} : vector<28x448xf32> to vector<1x448xf32>
    %32 = vector.extract_strided_slice %30 {offsets = [2, 0], sizes = [1, 448], strides = [1, 1]} : vector<28x448xf32> to vector<1x448xf32>
    %33 = vector.extract_strided_slice %30 {offsets = [4, 0], sizes = [1, 448], strides = [1, 1]} : vector<28x448xf32> to vector<1x448xf32>
    %34 = vector.extract_strided_slice %30 {offsets = [6, 0], sizes = [1, 448], strides = [1, 1]} : vector<28x448xf32> to vector<1x448xf32>
    %35 = vector.extract_strided_slice %30 {offsets = [8, 0], sizes = [1, 448], strides = [1, 1]} : vector<28x448xf32> to vector<1x448xf32>
    %36 = vector.extract_strided_slice %30 {offsets = [10, 0], sizes = [1, 448], strides = [1, 1]} : vector<28x448xf32> to vector<1x448xf32>
    %37 = vector.extract_strided_slice %30 {offsets = [12, 0], sizes = [1, 448], strides = [1, 1]} : vector<28x448xf32> to vector<1x448xf32>
    %38 = vector.extract_strided_slice %30 {offsets = [14, 0], sizes = [1, 448], strides = [1, 1]} : vector<28x448xf32> to vector<1x448xf32>
    %39 = vector.extract_strided_slice %30 {offsets = [16, 0], sizes = [1, 448], strides = [1, 1]} : vector<28x448xf32> to vector<1x448xf32>
    %40 = vector.extract_strided_slice %30 {offsets = [18, 0], sizes = [1, 448], strides = [1, 1]} : vector<28x448xf32> to vector<1x448xf32>
    %41 = vector.extract_strided_slice %30 {offsets = [20, 0], sizes = [1, 448], strides = [1, 1]} : vector<28x448xf32> to vector<1x448xf32>
    %42 = vector.extract_strided_slice %30 {offsets = [22, 0], sizes = [1, 448], strides = [1, 1]} : vector<28x448xf32> to vector<1x448xf32>
    %43 = vector.extract_strided_slice %30 {offsets = [24, 0], sizes = [1, 448], strides = [1, 1]} : vector<28x448xf32> to vector<1x448xf32>
    %44 = vector.extract_strided_slice %30 {offsets = [26, 0], sizes = [1, 448], strides = [1, 1]} : vector<28x448xf32> to vector<1x448xf32>
    %45 = tpu.concatenate %31, %32, %33, %34, %35, %36, %37, %38, %39, %40, %41, %42, %43, %44 in 0 : vector<1x448xf32>, vector<1x448xf32>, vector<1x448xf32>, vector<1x448xf32>, vector<1x448xf32>, vector<1x448xf32>, vector<1x448xf32>, vector<1x448xf32>, vector<1x448xf32>, vector<1x448xf32>, vector<1x448xf32>, vector<1x448xf32>, vector<1x448xf32>, vector<1x448xf32> -> vector<14x448xf32>
    %46 = vector.extract_strided_slice %30 {offsets = [1, 0], sizes = [1, 448], strides = [1, 1]} : vector<28x448xf32> to vector<1x448xf32>
    %47 = vector.extract_strided_slice %30 {offsets = [3, 0], sizes = [1, 448], strides = [1, 1]} : vector<28x448xf32> to vector<1x448xf32>
    %48 = vector.extract_strided_slice %30 {offsets = [5, 0], sizes = [1, 448], strides = [1, 1]} : vector<28x448xf32> to vector<1x448xf32>
    %49 = vector.extract_strided_slice %30 {offsets = [7, 0], sizes = [1, 448], strides = [1, 1]} : vector<28x448xf32> to vector<1x448xf32>
    %50 = vector.extract_strided_slice %30 {offsets = [9, 0], sizes = [1, 448], strides = [1, 1]} : vector<28x448xf32> to vector<1x448xf32>
    %51 = vector.extract_strided_slice %30 {offsets = [11, 0], sizes = [1, 448], strides = [1, 1]} : vector<28x448xf32> to vector<1x448xf32>
    %52 = vector.extract_strided_slice %30 {offsets = [13, 0], sizes = [1, 448], strides = [1, 1]} : vector<28x448xf32> to vector<1x448xf32>
    %53 = vector.extract_strided_slice %30 {offsets = [15, 0], sizes = [1, 448], strides = [1, 1]} : vector<28x448xf32> to vector<1x448xf32>
    %54 = vector.extract_strided_slice %30 {offsets = [17, 0], sizes = [1, 448], strides = [1, 1]} : vector<28x448xf32> to vector<1x448xf32>
    %55 = vector.extract_strided_slice %30 {offsets = [19, 0], sizes = [1, 448], strides = [1, 1]} : vector<28x448xf32> to vector<1x448xf32>
    %56 = vector.extract_strided_slice %30 {offsets = [21, 0], sizes = [1, 448], strides = [1, 1]} : vector<28x448xf32> to vector<1x448xf32>
    %57 = vector.extract_strided_slice %30 {offsets = [23, 0], sizes = [1, 448], strides = [1, 1]} : vector<28x448xf32> to vector<1x448xf32>
    %58 = vector.extract_strided_slice %30 {offsets = [25, 0], sizes = [1, 448], strides = [1, 1]} : vector<28x448xf32> to vector<1x448xf32>
    %59 = vector.extract_strided_slice %30 {offsets = [27, 0], sizes = [1, 448], strides = [1, 1]} : vector<28x448xf32> to vector<1x448xf32>
    %60 = tpu.concatenate %46, %47, %48, %49, %50, %51, %52, %53, %54, %55, %56, %57, %58, %59 in 0 : vector<1x448xf32>, vector<1x448xf32>, vector<1x448xf32>, vector<1x448xf32>, vector<1x448xf32>, vector<1x448xf32>, vector<1x448xf32>, vector<1x448xf32>, vector<1x448xf32>, vector<1x448xf32>, vector<1x448xf32>, vector<1x448xf32>, vector<1x448xf32>, vector<1x448xf32> -> vector<14x448xf32>
    %61 = arith.maximumf %45, %60 : vector<14x448xf32>
    %62 = vector.extract_strided_slice %61 {offsets = [0, 0], sizes = [14, 16], strides = [1, 1]} : vector<14x448xf32> to vector<14x16xf32>
    %63 = vector.extract_strided_slice %61 {offsets = [0, 16], sizes = [14, 16], strides = [1, 1]} : vector<14x448xf32> to vector<14x16xf32>
    %64 = arith.maximumf %62, %63 : vector<14x16xf32>
    %65 = vector.extract_strided_slice %61 {offsets = [0, 32], sizes = [14, 16], strides = [1, 1]} : vector<14x448xf32> to vector<14x16xf32>
    %66 = vector.extract_strided_slice %61 {offsets = [0, 48], sizes = [14, 16], strides = [1, 1]} : vector<14x448xf32> to vector<14x16xf32>
    %67 = arith.maximumf %65, %66 : vector<14x16xf32>
    %68 = vector.extract_strided_slice %61 {offsets = [0, 64], sizes = [14, 16], strides = [1, 1]} : vector<14x448xf32> to vector<14x16xf32>
    %69 = vector.extract_strided_slice %61 {offsets = [0, 80], sizes = [14, 16], strides = [1, 1]} : vector<14x448xf32> to vector<14x16xf32>
    %70 = arith.maximumf %68, %69 : vector<14x16xf32>
    %71 = vector.extract_strided_slice %61 {offsets = [0, 96], sizes = [14, 16], strides = [1, 1]} : vector<14x448xf32> to vector<14x16xf32>
    %72 = vector.extract_strided_slice %61 {offsets = [0, 112], sizes = [14, 16], strides = [1, 1]} : vector<14x448xf32> to vector<14x16xf32>
    %73 = arith.maximumf %71, %72 : vector<14x16xf32>
    %74 = vector.extract_strided_slice %61 {offsets = [0, 128], sizes = [14, 16], strides = [1, 1]} : vector<14x448xf32> to vector<14x16xf32>
    %75 = vector.extract_strided_slice %61 {offsets = [0, 144], sizes = [14, 16], strides = [1, 1]} : vector<14x448xf32> to vector<14x16xf32>
    %76 = arith.maximumf %74, %75 : vector<14x16xf32>
    %77 = vector.extract_strided_slice %61 {offsets = [0, 160], sizes = [14, 16], strides = [1, 1]} : vector<14x448xf32> to vector<14x16xf32>
    %78 = vector.extract_strided_slice %61 {offsets = [0, 176], sizes = [14, 16], strides = [1, 1]} : vector<14x448xf32> to vector<14x16xf32>
    %79 = arith.maximumf %77, %78 : vector<14x16xf32>
    %80 = vector.extract_strided_slice %61 {offsets = [0, 192], sizes = [14, 16], strides = [1, 1]} : vector<14x448xf32> to vector<14x16xf32>
    %81 = vector.extract_strided_slice %61 {offsets = [0, 208], sizes = [14, 16], strides = [1, 1]} : vector<14x448xf32> to vector<14x16xf32>
    %82 = arith.maximumf %80, %81 : vector<14x16xf32>
    %83 = vector.extract_strided_slice %61 {offsets = [0, 224], sizes = [14, 16], strides = [1, 1]} : vector<14x448xf32> to vector<14x16xf32>
    %84 = vector.extract_strided_slice %61 {offsets = [0, 240], sizes = [14, 16], strides = [1, 1]} : vector<14x448xf32> to vector<14x16xf32>
    %85 = arith.maximumf %83, %84 : vector<14x16xf32>
    %86 = vector.extract_strided_slice %61 {offsets = [0, 256], sizes = [14, 16], strides = [1, 1]} : vector<14x448xf32> to vector<14x16xf32>
    %87 = vector.extract_strided_slice %61 {offsets = [0, 272], sizes = [14, 16], strides = [1, 1]} : vector<14x448xf32> to vector<14x16xf32>
    %88 = arith.maximumf %86, %87 : vector<14x16xf32>
    %89 = vector.extract_strided_slice %61 {offsets = [0, 288], sizes = [14, 16], strides = [1, 1]} : vector<14x448xf32> to vector<14x16xf32>
    %90 = vector.extract_strided_slice %61 {offsets = [0, 304], sizes = [14, 16], strides = [1, 1]} : vector<14x448xf32> to vector<14x16xf32>
    %91 = arith.maximumf %89, %90 : vector<14x16xf32>
    %92 = vector.extract_strided_slice %61 {offsets = [0, 320], sizes = [14, 16], strides = [1, 1]} : vector<14x448xf32> to vector<14x16xf32>
    %93 = vector.extract_strided_slice %61 {offsets = [0, 336], sizes = [14, 16], strides = [1, 1]} : vector<14x448xf32> to vector<14x16xf32>
    %94 = arith.maximumf %92, %93 : vector<14x16xf32>
    %95 = vector.extract_strided_slice %61 {offsets = [0, 352], sizes = [14, 16], strides = [1, 1]} : vector<14x448xf32> to vector<14x16xf32>
    %96 = vector.extract_strided_slice %61 {offsets = [0, 368], sizes = [14, 16], strides = [1, 1]} : vector<14x448xf32> to vector<14x16xf32>
    %97 = arith.maximumf %95, %96 : vector<14x16xf32>
    %98 = vector.extract_strided_slice %61 {offsets = [0, 384], sizes = [14, 16], strides = [1, 1]} : vector<14x448xf32> to vector<14x16xf32>
    %99 = vector.extract_strided_slice %61 {offsets = [0, 400], sizes = [14, 16], strides = [1, 1]} : vector<14x448xf32> to vector<14x16xf32>
    %100 = arith.maximumf %98, %99 : vector<14x16xf32>
    %101 = vector.extract_strided_slice %61 {offsets = [0, 416], sizes = [14, 16], strides = [1, 1]} : vector<14x448xf32> to vector<14x16xf32>
    %102 = vector.extract_strided_slice %61 {offsets = [0, 432], sizes = [14, 16], strides = [1, 1]} : vector<14x448xf32> to vector<14x16xf32>
    %103 = arith.maximumf %101, %102 : vector<14x16xf32>
    %104 = tpu.concatenate %64, %67, %70, %73, %76, %79, %82, %85, %88, %91, %94, %97, %100, %103 in 1 : vector<14x16xf32>, vector<14x16xf32>, vector<14x16xf32>, vector<14x16xf32>, vector<14x16xf32>, vector<14x16xf32>, vector<14x16xf32>, vector<14x16xf32>, vector<14x16xf32>, vector<14x16xf32>, vector<14x16xf32>, vector<14x16xf32>, vector<14x16xf32>, vector<14x16xf32> -> vector<14x224xf32>
    %105 = arith.truncf %104 : vector<14x224xf32> to vector<14x224xbf16>
    %c0_20 = arith.constant 0 : index
    %c0_21 = arith.constant 0 : index
    %c0_22 = arith.constant 0 : index
    %106 = vector.load %arg4[%c0_20, %c0_21, %c0_22] : memref<1x14x224xbf16, #tpu.memory_space<vmem>>, vector<1x14x224xbf16>
    %107 = vector.shape_cast %106 : vector<1x14x224xbf16> to vector<14x224xbf16>
    %108 = vector.shape_cast %105 : vector<14x224xbf16> to vector<1x14x224xbf16>
    tpu.vector_store %arg4[%c0_20, %c0_21, %c0_22], %108 {strides = array<i32>} : memref<1x14x224xbf16, #tpu.memory_space<vmem>>, vector<1x14x224xbf16>,
    return
  }
  func.func @transform_0(%arg0: i32) -> (i32, i32, i32) {
    %c0_i32 = arith.constant 0 : i32
    %c0_i32_0 = arith.constant 0 : i32
    %c0_i32_1 = arith.constant 0 : i32
    return %arg0, %c0_i32, %c0_i32_0 : i32, i32, i32
  }
  func.func @transform_1(%arg0: i32) -> (i32, i32, i32) {
    %c0_i32 = arith.constant 0 : i32
    %c0_i32_0 = arith.constant 0 : i32
    %c0_i32_1 = arith.constant 0 : i32
    %c0_i32_2 = arith.constant 0 : i32
    return %c0_i32, %c0_i32_0, %c0_i32_1 : i32, i32, i32
  }
  func.func @transform_2(%arg0: i32) -> (i32, i32) {
    %c0_i32 = arith.constant 0 : i32
    %c0_i32_0 = arith.constant 0 : i32
    %c0_i32_1 = arith.constant 0 : i32
    return %c0_i32, %c0_i32_0 : i32, i32
  }
  func.func @transform_3(%arg0: i32) -> (i32, i32, i32) {
    %c0_i32 = arith.constant 0 : i32
    %c0_i32_0 = arith.constant 0 : i32
    %c0_i32_1 = arith.constant 0 : i32
    return %arg0, %c0_i32, %c0_i32_0 : i32, i32, i32
  }
}

module attributes {stable_mosaic.version = 11 : i64} {
  func.func @_conv_relu_pool_kernel(%arg0: i32, %arg1: memref<1x18x288xbf16, #tpu.memory_space<vmem>>, %arg2: memref<5x288x448xbf16, #tpu.memory_space<vmem>>, %arg3: memref<1x448xf32, #tpu.memory_space<vmem>>, %arg4: memref<1x7x224xbf16, #tpu.memory_space<vmem>>) attributes {dimension_semantics = [#tpu.dimension_semantics<parallel>], iteration_bounds = array<i64: 2>, scalar_prefetch = 0 : i64, scratch_operands = 0 : i64, tpu.core_type = #tpu.core_type<tc>, window_params = [{transform_indices = @transform_0, window_bounds = array<i64: 1, 18, 288>}, {pipeline_mode = #tpu.pipeline_mode<synchronous>, transform_indices = @transform_1, window_bounds = array<i64: 5, 288, 448>}, {pipeline_mode = #tpu.pipeline_mode<synchronous>, transform_indices = @transform_2, window_bounds = array<i64: 1, 448>}, {transform_indices = @transform_3, window_bounds = array<i64: 1, 7, 224>}]} {
    %c0 = arith.constant 0 : index
    %c0_0 = arith.constant 0 : index
    %c0_1 = arith.constant 0 : index
    %0 = vector.load %arg1[%c0, %c0_0, %c0_1] : memref<1x18x288xbf16, #tpu.memory_space<vmem>>, vector<1x18x288xbf16>
    %1 = vector.shape_cast %0 : vector<1x18x288xbf16> to vector<18x288xbf16>
    %2 = vector.extract_strided_slice %1 {offsets = [0, 0], sizes = [14, 288], strides = [1, 1]} : vector<18x288xbf16> to vector<14x288xbf16>
    %c0_2 = arith.constant 0 : index
    %c0_3 = arith.constant 0 : index
    %c0_4 = arith.constant 0 : index
    %3 = vector.load %arg2[%c0_2, %c0_3, %c0_4] : memref<5x288x448xbf16, #tpu.memory_space<vmem>>, vector<1x288x448xbf16>
    %4 = vector.shape_cast %3 : vector<1x288x448xbf16> to vector<288x448xbf16>
    %cst = arith.constant dense<0.000000e+00> : vector<14x448xf32>
    %5 = tpu.matmul %2, %4, %cst {dimension_numbers = #tpu.dot_dimension_numbers<[1], [0], [0], [1], [0, 0, 1, 1], [], []>} : vector<14x288xbf16>, vector<288x448xbf16>, vector<14x448xf32> -> vector<14x448xf32>
    %6 = vector.extract_strided_slice %1 {offsets = [1, 0], sizes = [14, 288], strides = [1, 1]} : vector<18x288xbf16> to vector<14x288xbf16>
    %c1 = arith.constant 1 : index
    %c0_5 = arith.constant 0 : index
    %c0_6 = arith.constant 0 : index
    %7 = vector.load %arg2[%c1, %c0_5, %c0_6] : memref<5x288x448xbf16, #tpu.memory_space<vmem>>, vector<1x288x448xbf16>
    %8 = vector.shape_cast %7 : vector<1x288x448xbf16> to vector<288x448xbf16>
    %cst_7 = arith.constant dense<0.000000e+00> : vector<14x448xf32>
    %9 = tpu.matmul %6, %8, %cst_7 {dimension_numbers = #tpu.dot_dimension_numbers<[1], [0], [0], [1], [0, 0, 1, 1], [], []>} : vector<14x288xbf16>, vector<288x448xbf16>, vector<14x448xf32> -> vector<14x448xf32>
    %10 = arith.addf %5, %9 : vector<14x448xf32>
    %11 = vector.extract_strided_slice %1 {offsets = [2, 0], sizes = [14, 288], strides = [1, 1]} : vector<18x288xbf16> to vector<14x288xbf16>
    %c2 = arith.constant 2 : index
    %c0_8 = arith.constant 0 : index
    %c0_9 = arith.constant 0 : index
    %12 = vector.load %arg2[%c2, %c0_8, %c0_9] : memref<5x288x448xbf16, #tpu.memory_space<vmem>>, vector<1x288x448xbf16>
    %13 = vector.shape_cast %12 : vector<1x288x448xbf16> to vector<288x448xbf16>
    %cst_10 = arith.constant dense<0.000000e+00> : vector<14x448xf32>
    %14 = tpu.matmul %11, %13, %cst_10 {dimension_numbers = #tpu.dot_dimension_numbers<[1], [0], [0], [1], [0, 0, 1, 1], [], []>} : vector<14x288xbf16>, vector<288x448xbf16>, vector<14x448xf32> -> vector<14x448xf32>
    %15 = arith.addf %10, %14 : vector<14x448xf32>
    %16 = vector.extract_strided_slice %1 {offsets = [3, 0], sizes = [14, 288], strides = [1, 1]} : vector<18x288xbf16> to vector<14x288xbf16>
    %c3 = arith.constant 3 : index
    %c0_11 = arith.constant 0 : index
    %c0_12 = arith.constant 0 : index
    %17 = vector.load %arg2[%c3, %c0_11, %c0_12] : memref<5x288x448xbf16, #tpu.memory_space<vmem>>, vector<1x288x448xbf16>
    %18 = vector.shape_cast %17 : vector<1x288x448xbf16> to vector<288x448xbf16>
    %cst_13 = arith.constant dense<0.000000e+00> : vector<14x448xf32>
    %19 = tpu.matmul %16, %18, %cst_13 {dimension_numbers = #tpu.dot_dimension_numbers<[1], [0], [0], [1], [0, 0, 1, 1], [], []>} : vector<14x288xbf16>, vector<288x448xbf16>, vector<14x448xf32> -> vector<14x448xf32>
    %20 = arith.addf %15, %19 : vector<14x448xf32>
    %21 = vector.extract_strided_slice %1 {offsets = [4, 0], sizes = [14, 288], strides = [1, 1]} : vector<18x288xbf16> to vector<14x288xbf16>
    %c4 = arith.constant 4 : index
    %c0_14 = arith.constant 0 : index
    %c0_15 = arith.constant 0 : index
    %22 = vector.load %arg2[%c4, %c0_14, %c0_15] : memref<5x288x448xbf16, #tpu.memory_space<vmem>>, vector<1x288x448xbf16>
    %23 = vector.shape_cast %22 : vector<1x288x448xbf16> to vector<288x448xbf16>
    %cst_16 = arith.constant dense<0.000000e+00> : vector<14x448xf32>
    %24 = tpu.matmul %21, %23, %cst_16 {dimension_numbers = #tpu.dot_dimension_numbers<[1], [0], [0], [1], [0, 0, 1, 1], [], []>} : vector<14x288xbf16>, vector<288x448xbf16>, vector<14x448xf32> -> vector<14x448xf32>
    %25 = arith.addf %20, %24 : vector<14x448xf32>
    %c0_17 = arith.constant 0 : index
    %c0_18 = arith.constant 0 : index
    %26 = vector.load %arg3[%c0_17, %c0_18] : memref<1x448xf32, #tpu.memory_space<vmem>>, vector<1x448xf32>
    %27 = vector.broadcast %26 : vector<1x448xf32> to vector<14x448xf32>
    %28 = arith.addf %25, %27 : vector<14x448xf32>
    %cst_19 = arith.constant 0.000000e+00 : f32
    %29 = vector.broadcast %cst_19 : f32 to vector<14x448xf32>
    %30 = arith.maximumf %28, %29 : vector<14x448xf32>
    %31 = vector.extract_strided_slice %30 {offsets = [0, 0], sizes = [1, 448], strides = [1, 1]} : vector<14x448xf32> to vector<1x448xf32>
    %32 = vector.extract_strided_slice %30 {offsets = [2, 0], sizes = [1, 448], strides = [1, 1]} : vector<14x448xf32> to vector<1x448xf32>
    %33 = vector.extract_strided_slice %30 {offsets = [4, 0], sizes = [1, 448], strides = [1, 1]} : vector<14x448xf32> to vector<1x448xf32>
    %34 = vector.extract_strided_slice %30 {offsets = [6, 0], sizes = [1, 448], strides = [1, 1]} : vector<14x448xf32> to vector<1x448xf32>
    %35 = vector.extract_strided_slice %30 {offsets = [8, 0], sizes = [1, 448], strides = [1, 1]} : vector<14x448xf32> to vector<1x448xf32>
    %36 = vector.extract_strided_slice %30 {offsets = [10, 0], sizes = [1, 448], strides = [1, 1]} : vector<14x448xf32> to vector<1x448xf32>
    %37 = vector.extract_strided_slice %30 {offsets = [12, 0], sizes = [1, 448], strides = [1, 1]} : vector<14x448xf32> to vector<1x448xf32>
    %38 = tpu.concatenate %31, %32, %33, %34, %35, %36, %37 in 0 : vector<1x448xf32>, vector<1x448xf32>, vector<1x448xf32>, vector<1x448xf32>, vector<1x448xf32>, vector<1x448xf32>, vector<1x448xf32> -> vector<7x448xf32>
    %39 = vector.extract_strided_slice %30 {offsets = [1, 0], sizes = [1, 448], strides = [1, 1]} : vector<14x448xf32> to vector<1x448xf32>
    %40 = vector.extract_strided_slice %30 {offsets = [3, 0], sizes = [1, 448], strides = [1, 1]} : vector<14x448xf32> to vector<1x448xf32>
    %41 = vector.extract_strided_slice %30 {offsets = [5, 0], sizes = [1, 448], strides = [1, 1]} : vector<14x448xf32> to vector<1x448xf32>
    %42 = vector.extract_strided_slice %30 {offsets = [7, 0], sizes = [1, 448], strides = [1, 1]} : vector<14x448xf32> to vector<1x448xf32>
    %43 = vector.extract_strided_slice %30 {offsets = [9, 0], sizes = [1, 448], strides = [1, 1]} : vector<14x448xf32> to vector<1x448xf32>
    %44 = vector.extract_strided_slice %30 {offsets = [11, 0], sizes = [1, 448], strides = [1, 1]} : vector<14x448xf32> to vector<1x448xf32>
    %45 = vector.extract_strided_slice %30 {offsets = [13, 0], sizes = [1, 448], strides = [1, 1]} : vector<14x448xf32> to vector<1x448xf32>
    %46 = tpu.concatenate %39, %40, %41, %42, %43, %44, %45 in 0 : vector<1x448xf32>, vector<1x448xf32>, vector<1x448xf32>, vector<1x448xf32>, vector<1x448xf32>, vector<1x448xf32>, vector<1x448xf32> -> vector<7x448xf32>
    %47 = arith.maximumf %38, %46 : vector<7x448xf32>
    %48 = vector.extract_strided_slice %47 {offsets = [0, 0], sizes = [7, 32], strides = [1, 1]} : vector<7x448xf32> to vector<7x32xf32>
    %49 = vector.extract_strided_slice %47 {offsets = [0, 32], sizes = [7, 32], strides = [1, 1]} : vector<7x448xf32> to vector<7x32xf32>
    %50 = arith.maximumf %48, %49 : vector<7x32xf32>
    %51 = vector.extract_strided_slice %47 {offsets = [0, 64], sizes = [7, 32], strides = [1, 1]} : vector<7x448xf32> to vector<7x32xf32>
    %52 = vector.extract_strided_slice %47 {offsets = [0, 96], sizes = [7, 32], strides = [1, 1]} : vector<7x448xf32> to vector<7x32xf32>
    %53 = arith.maximumf %51, %52 : vector<7x32xf32>
    %54 = vector.extract_strided_slice %47 {offsets = [0, 128], sizes = [7, 32], strides = [1, 1]} : vector<7x448xf32> to vector<7x32xf32>
    %55 = vector.extract_strided_slice %47 {offsets = [0, 160], sizes = [7, 32], strides = [1, 1]} : vector<7x448xf32> to vector<7x32xf32>
    %56 = arith.maximumf %54, %55 : vector<7x32xf32>
    %57 = vector.extract_strided_slice %47 {offsets = [0, 192], sizes = [7, 32], strides = [1, 1]} : vector<7x448xf32> to vector<7x32xf32>
    %58 = vector.extract_strided_slice %47 {offsets = [0, 224], sizes = [7, 32], strides = [1, 1]} : vector<7x448xf32> to vector<7x32xf32>
    %59 = arith.maximumf %57, %58 : vector<7x32xf32>
    %60 = vector.extract_strided_slice %47 {offsets = [0, 256], sizes = [7, 32], strides = [1, 1]} : vector<7x448xf32> to vector<7x32xf32>
    %61 = vector.extract_strided_slice %47 {offsets = [0, 288], sizes = [7, 32], strides = [1, 1]} : vector<7x448xf32> to vector<7x32xf32>
    %62 = arith.maximumf %60, %61 : vector<7x32xf32>
    %63 = vector.extract_strided_slice %47 {offsets = [0, 320], sizes = [7, 32], strides = [1, 1]} : vector<7x448xf32> to vector<7x32xf32>
    %64 = vector.extract_strided_slice %47 {offsets = [0, 352], sizes = [7, 32], strides = [1, 1]} : vector<7x448xf32> to vector<7x32xf32>
    %65 = arith.maximumf %63, %64 : vector<7x32xf32>
    %66 = vector.extract_strided_slice %47 {offsets = [0, 384], sizes = [7, 32], strides = [1, 1]} : vector<7x448xf32> to vector<7x32xf32>
    %67 = vector.extract_strided_slice %47 {offsets = [0, 416], sizes = [7, 32], strides = [1, 1]} : vector<7x448xf32> to vector<7x32xf32>
    %68 = arith.maximumf %66, %67 : vector<7x32xf32>
    %69 = tpu.concatenate %50, %53, %56, %59, %62, %65, %68 in 1 : vector<7x32xf32>, vector<7x32xf32>, vector<7x32xf32>, vector<7x32xf32>, vector<7x32xf32>, vector<7x32xf32>, vector<7x32xf32> -> vector<7x224xf32>
    %70 = arith.truncf %69 : vector<7x224xf32> to vector<7x224xbf16>
    %c0_20 = arith.constant 0 : index
    %c0_21 = arith.constant 0 : index
    %c0_22 = arith.constant 0 : index
    %71 = vector.load %arg4[%c0_20, %c0_21, %c0_22] : memref<1x7x224xbf16, #tpu.memory_space<vmem>>, vector<1x7x224xbf16>
    %72 = vector.shape_cast %71 : vector<1x7x224xbf16> to vector<7x224xbf16>
    %73 = vector.shape_cast %70 : vector<7x224xbf16> to vector<1x7x224xbf16>
    tpu.vector_store %arg4[%c0_20, %c0_21, %c0_22], %73 {strides = array<i32>} : memref<1x7x224xbf16, #tpu.memory_space<vmem>>, vector<1x7x224xbf16>,
    return
  }
  func.func @transform_0(%arg0: i32) -> (i32, i32, i32) {
    %c0_i32 = arith.constant 0 : i32
    %c0_i32_0 = arith.constant 0 : i32
    %c0_i32_1 = arith.constant 0 : i32
    return %arg0, %c0_i32, %c0_i32_0 : i32, i32, i32
  }
  func.func @transform_1(%arg0: i32) -> (i32, i32, i32) {
    %c0_i32 = arith.constant 0 : i32
    %c0_i32_0 = arith.constant 0 : i32
    %c0_i32_1 = arith.constant 0 : i32
    %c0_i32_2 = arith.constant 0 : i32
    return %c0_i32, %c0_i32_0, %c0_i32_1 : i32, i32, i32
  }
  func.func @transform_2(%arg0: i32) -> (i32, i32) {
    %c0_i32 = arith.constant 0 : i32
    %c0_i32_0 = arith.constant 0 : i32
    %c0_i32_1 = arith.constant 0 : i32
    return %c0_i32, %c0_i32_0 : i32, i32
  }
  func.func @transform_3(%arg0: i32) -> (i32, i32, i32) {
    %c0_i32 = arith.constant 0 : i32
    %c0_i32_0 = arith.constant 0 : i32
    %c0_i32_1 = arith.constant 0 : i32
    return %arg0, %c0_i32, %c0_i32_0 : i32, i32, i32
  }
}

module attributes {stable_mosaic.version = 11 : i64} {
  func.func @_fc_fused_kernel(%arg0: i32, %arg1: memref<2x1568xbf16, #tpu.memory_space<vmem>>, %arg2: memref<1568x400xbf16, #tpu.memory_space<vmem>>, %arg3: memref<1x400xf32, #tpu.memory_space<vmem>>, %arg4: memref<400x80xbf16, #tpu.memory_space<vmem>>, %arg5: memref<1x80xf32, #tpu.memory_space<vmem>>, %arg6: memref<80x47xbf16, #tpu.memory_space<vmem>>, %arg7: memref<1x47xf32, #tpu.memory_space<vmem>>, %arg8: memref<2x47xf32, #tpu.memory_space<vmem>>) attributes {dimension_semantics = [#tpu.dimension_semantics<parallel>], iteration_bounds = array<i64: 1>, scalar_prefetch = 0 : i64, scratch_operands = 0 : i64, tpu.core_type = #tpu.core_type<tc>, window_params = [{transform_indices = @transform_0, window_bounds = array<i64: 2, 1568>}, {pipeline_mode = #tpu.pipeline_mode<synchronous>, transform_indices = @transform_1, window_bounds = array<i64: 1568, 400>}, {pipeline_mode = #tpu.pipeline_mode<synchronous>, transform_indices = @transform_2, window_bounds = array<i64: 1, 400>}, {pipeline_mode = #tpu.pipeline_mode<synchronous>, transform_indices = @transform_3, window_bounds = array<i64: 400, 80>}, {pipeline_mode = #tpu.pipeline_mode<synchronous>, transform_indices = @transform_4, window_bounds = array<i64: 1, 80>}, {pipeline_mode = #tpu.pipeline_mode<synchronous>, transform_indices = @transform_5, window_bounds = array<i64: 80, 47>}, {pipeline_mode = #tpu.pipeline_mode<synchronous>, transform_indices = @transform_6, window_bounds = array<i64: 1, 47>}, {transform_indices = @transform_7, window_bounds = array<i64: 2, 47>}]} {
    %c0 = arith.constant 0 : index
    %c0_0 = arith.constant 0 : index
    %0 = vector.load %arg1[%c0, %c0_0] : memref<2x1568xbf16, #tpu.memory_space<vmem>>, vector<2x1568xbf16>
    %c0_1 = arith.constant 0 : index
    %c0_2 = arith.constant 0 : index
    %1 = vector.load %arg2[%c0_1, %c0_2] : memref<1568x400xbf16, #tpu.memory_space<vmem>>, vector<1568x400xbf16>
    %cst = arith.constant dense<0.000000e+00> : vector<2x400xf32>
    %2 = tpu.matmul %0, %1, %cst {dimension_numbers = #tpu.dot_dimension_numbers<[1], [0], [0], [1], [0, 0, 1, 1], [], []>} : vector<2x1568xbf16>, vector<1568x400xbf16>, vector<2x400xf32> -> vector<2x400xf32>
    %c0_3 = arith.constant 0 : index
    %c0_4 = arith.constant 0 : index
    %3 = vector.load %arg3[%c0_3, %c0_4] : memref<1x400xf32, #tpu.memory_space<vmem>>, vector<1x400xf32>
    %4 = vector.broadcast %3 : vector<1x400xf32> to vector<2x400xf32>
    %5 = arith.addf %2, %4 : vector<2x400xf32>
    %cst_5 = arith.constant 0.000000e+00 : f32
    %6 = vector.broadcast %cst_5 : f32 to vector<2x400xf32>
    %7 = arith.maximumf %5, %6 : vector<2x400xf32>
    %8 = arith.truncf %7 : vector<2x400xf32> to vector<2x400xbf16>
    %c0_6 = arith.constant 0 : index
    %c0_7 = arith.constant 0 : index
    %9 = vector.load %arg4[%c0_6, %c0_7] : memref<400x80xbf16, #tpu.memory_space<vmem>>, vector<400x80xbf16>
    %cst_8 = arith.constant dense<0.000000e+00> : vector<2x80xf32>
    %10 = tpu.matmul %8, %9, %cst_8 {dimension_numbers = #tpu.dot_dimension_numbers<[1], [0], [0], [1], [0, 0, 1, 1], [], []>} : vector<2x400xbf16>, vector<400x80xbf16>, vector<2x80xf32> -> vector<2x80xf32>
    %c0_9 = arith.constant 0 : index
    %c0_10 = arith.constant 0 : index
    %11 = vector.load %arg5[%c0_9, %c0_10] : memref<1x80xf32, #tpu.memory_space<vmem>>, vector<1x80xf32>
    %12 = vector.broadcast %11 : vector<1x80xf32> to vector<2x80xf32>
    %13 = arith.addf %10, %12 : vector<2x80xf32>
    %cst_11 = arith.constant 0.000000e+00 : f32
    %14 = vector.broadcast %cst_11 : f32 to vector<2x80xf32>
    %15 = arith.maximumf %13, %14 : vector<2x80xf32>
    %16 = arith.truncf %15 : vector<2x80xf32> to vector<2x80xbf16>
    %c0_12 = arith.constant 0 : index
    %c0_13 = arith.constant 0 : index
    %17 = vector.load %arg6[%c0_12, %c0_13] : memref<80x47xbf16, #tpu.memory_space<vmem>>, vector<80x47xbf16>
    %cst_14 = arith.constant dense<0.000000e+00> : vector<2x47xf32>
    %18 = tpu.matmul %16, %17, %cst_14 {dimension_numbers = #tpu.dot_dimension_numbers<[1], [0], [0], [1], [0, 0, 1, 1], [], []>} : vector<2x80xbf16>, vector<80x47xbf16>, vector<2x47xf32> -> vector<2x47xf32>
    %c0_15 = arith.constant 0 : index
    %c0_16 = arith.constant 0 : index
    %19 = vector.load %arg7[%c0_15, %c0_16] : memref<1x47xf32, #tpu.memory_space<vmem>>, vector<1x47xf32>
    %20 = vector.broadcast %19 : vector<1x47xf32> to vector<2x47xf32>
    %21 = arith.addf %18, %20 : vector<2x47xf32>
    %c0_17 = arith.constant 0 : index
    %c0_18 = arith.constant 0 : index
    %22 = vector.load %arg8[%c0_17, %c0_18] : memref<2x47xf32, #tpu.memory_space<vmem>>, vector<2x47xf32>
    tpu.vector_store %arg8[%c0_17, %c0_18], %21 {strides = array<i32>} : memref<2x47xf32, #tpu.memory_space<vmem>>, vector<2x47xf32>,
    return
  }
  func.func @transform_0(%arg0: i32) -> (i32, i32) {
    %c0_i32 = arith.constant 0 : i32
    %c0_i32_0 = arith.constant 0 : i32
    return %arg0, %c0_i32 : i32, i32
  }
  func.func @transform_1(%arg0: i32) -> (i32, i32) {
    %c0_i32 = arith.constant 0 : i32
    %c0_i32_0 = arith.constant 0 : i32
    %c0_i32_1 = arith.constant 0 : i32
    return %c0_i32, %c0_i32_0 : i32, i32
  }
  func.func @transform_2(%arg0: i32) -> (i32, i32) {
    %c0_i32 = arith.constant 0 : i32
    %c0_i32_0 = arith.constant 0 : i32
    %c0_i32_1 = arith.constant 0 : i32
    return %c0_i32, %c0_i32_0 : i32, i32
  }
  func.func @transform_3(%arg0: i32) -> (i32, i32) {
    %c0_i32 = arith.constant 0 : i32
    %c0_i32_0 = arith.constant 0 : i32
    %c0_i32_1 = arith.constant 0 : i32
    return %c0_i32, %c0_i32_0 : i32, i32
  }
  func.func @transform_4(%arg0: i32) -> (i32, i32) {
    %c0_i32 = arith.constant 0 : i32
    %c0_i32_0 = arith.constant 0 : i32
    %c0_i32_1 = arith.constant 0 : i32
    return %c0_i32, %c0_i32_0 : i32, i32
  }
  func.func @transform_5(%arg0: i32) -> (i32, i32) {
    %c0_i32 = arith.constant 0 : i32
    %c0_i32_0 = arith.constant 0 : i32
    %c0_i32_1 = arith.constant 0 : i32
    return %c0_i32, %c0_i32_0 : i32, i32
  }
  func.func @transform_6(%arg0: i32) -> (i32, i32) {
    %c0_i32 = arith.constant 0 : i32
    %c0_i32_0 = arith.constant 0 : i32
    %c0_i32_1 = arith.constant 0 : i32
    return %c0_i32, %c0_i32_0 : i32, i32
  }
  func.func @transform_7(%arg0: i32) -> (i32, i32) {
    %c0_i32 = arith.constant 0 : i32
    %c0_i32_0 = arith.constant 0 : i32
    return %arg0, %c0_i32 : i32, i32
  }
}

</mosaic_0001>

<bundles_post_ra>
// kernel: cnn_forward.3
= control target key start
LH: loop header
LB: loop body
LE: loop exit
PB: predicated region body
PF: predicated region fallthrough
CT: control target
= control target key end

     0   :  { %8 = vsyncpa [#allocation3], 0  ;;  %s2613_s0 = inlined_call_operand.vmem [shape: bf16[2,32,32], index: 0, kind: input, shape index: {}]   ;;  %s2614_s1 = inlined_call_operand.hbm [shape: bf16[5,32,448], index: 1, kind: input, shape index: {}]   ;;  %s2615_s2 = inlined_call_operand.hbm [shape: f32[1,448], index: 2, kind: input, shape index: {}]   ;;  %s2616_s3 = inlined_call_operand.vmem [shape: bf16[2,14,224], index: 3, kind: output, shape index: {}]  }
   0x1   :  { %9 = vsyncpa [#allocation5], 0  ;;  %s2007_s12 = smov 0  }
   0x2 LB: > { %s2013_s13 = sadd.s32 4294967295, %s1973_s12   ;;  %p1645_p0 = scmp.ge.s32.totalorder %s1973_s12, 1  ;;  %s1973_s12 = sphi %s2007_s12, %s15_s12  }
   0x3   : > { %p114_p1 = scmp.lt.s32.totalorder %s1973_s12, 3  ;;  %s1975_s14 = smov [#allocation2]  }
   0x4   : > { %s126_s15 = sshll.u32 %s1975_s14, 4  ;;  %p1741_p3 = scmp.eq.s32.totalorder %s2013_s13, 0  ;;  %s127_s15 = int_to_ptr.vmem [resolvable:$true] %s126_s15 }
   0x5   : > { %p2017_p2 = pnand %p1645_p0, %p114_p1  ;;  %s1976_s17 = smov [#allocation4]  }
   0x6   : > { %s140_s18 = sshll.u32 %s1976_s17, 4  ;;  %s1918_s20 = scalar_lea.vmem %s127_s15, 5120  ;;  %s141_s18 = int_to_ptr.vmem [resolvable:$true] %s140_s18 }
   0x7   : > { %p1734_p4 = pneg %p2017_p2  ;;  %p1919_p7 = scmp.ne.s32.totalorder %s127_s15, %s1918_s20 }
   0x8   : > { %p1926_p10 = scmp.lt.s32.totalorder %s127_s15, %s127_s15  ;;  %p1927_p11 = scmp.lt.s32.totalorder %s1918_s20, %s1918_s20 }
   0x9   : > { %p2026_p5 = pnand %p1741_p3, %p1734_p4 }
   0xa   : > { %p1928_p12 = por %p1927_p11, %p1926_p10 }
   0xb   : > { %p1909_p6 = pneg %p2026_p5 }
   0xd   : > { %p1921_p8 = pnand %p1919_p7, %p1909_p6 }
   0xf   : > { %p1922_p9 = pneg %p1921_p8 }
  0x11   : > { %p1929_p13 = pnand %p1928_p12, %p1922_p9 }
  0x13   : > { %1932 = shalt.err (!%p1929_p13)
}
  0x14   : > { %s1977_s21 = smov 256   ;;  %s1978_s22 = smov 16  }
  0x15   : > { %1737 = dma.hbm_to_vmem [thread:$0]  (!%p2026_p5), %s2614_s1, 5120, %s127_s15, [#allocation3], %s1977_s21, %s1977_s21, %s1978_s22  }
  0x16   : > { %s1944_s25 = scalar_lea.vmem %s141_s18, 64  ;;  %p1952_p7 = scmp.lt.s32.totalorder %s141_s18, %s141_s18 }
  0x17   : > { %p1945_p0 = scmp.ne.s32.totalorder %s141_s18, %s1944_s25  ;;  %p1953_p8 = scmp.lt.s32.totalorder %s1944_s25, %s1944_s25 }
  0x19   : > { %p1947_p1 = pnand %p1945_p0, %p1909_p6  ;;  %p1954_p10 = por %p1953_p8, %p1952_p7 }
  0x1b   : > { %p1948_p4 = pneg %p1947_p1 }
  0x1d   : > { %p1955_p9 = pnand %p1954_p10, %p1948_p4 }
  0x1f   : > { %1958 = shalt.err (!%p1955_p9)
}
  0x20   : > { %1740 = dma.hbm_to_vmem [thread:$0]  (!%p2026_p5), %s2615_s2, 64, %s141_s18, [#allocation5]  }
  0x21   : > { %161 = sbr.rel (%p2017_p2) target bundleno = 626 (0x272), region = 32 }
  0x26   : > { %1964 = dma.done.wait (%p1741_p3), [#allocation3], 5120  }
  0x27   : > { %1966 = vsyncadd (%p1741_p3), [#allocation3], 4294962176 }
  0x28   : > { %1968 = dma.done.wait (%p1741_p3), [#allocation5], 64  }
  0x29   : > { %1970 = vsyncadd (%p1741_p3), [#allocation5], 4294967232  ;;  %p189_p6 = scmp.lt.s32.totalorder %s2013_s13, 1  ;;  %v1979_v0 = vmov 0   ;;  %v1845_v1 = vld [vmem:[#allocation2 + $0x64] ss:$16 sps:$4 sm:$0xff]  }
  0x2a   : > { %326 = vmatprep.mubr.bf16.mxu0 %v1979_v0  ;;  %379 = vmatprep.mubr.bf16.mxu1 %v1979_v0  ;;  %v1847_v2 = vld [vmem:[#allocation2 + $0x6c] ss:$16 sps:$4 sm:$0xff]   ;;  %v1849_v3 = vld [vmem:[#allocation2 + $0x60] ss:$16 sps:$4 sm:$0xff]   ;;  %v1850_v4 = vld [vmem:[#allocation2 + $0x68] ss:$16 sps:$4 sm:$0xff]  }
  0x2b   : > { %s2659_s13 = smov (!%p189_p6, %s2013_s13), 1  ;;  %306 = vmatprep.subr.bf16.mxu0 %v1845_v1  ;;  %359 = vmatprep.subr.bf16.mxu1 %v1847_v2  ;;  %v1851_v5 = vld [vmem:[#allocation2 + $0x44] ss:$16 sps:$4 sm:$0xff]   ;;  %v1853_v6 = vld [vmem:[#allocation2 + $0x4c] ss:$16 sps:$4 sm:$0xff]   ;;  %vm287_vm1 = vcmask 261120  }
  0x2c   : > { %s1722_s28 = sshll.u32 %s2659_s13, 4  ;;  %307 = vmatpush1.bf16.msra.mxu0 %v1849_v3  ;;  %360 = vmatpush1.bf16.msra.mxu1 %v1850_v4  ;;  %v1855_v7 = vld [vmem:[#allocation2 + $0x40] ss:$16 sps:$4 sm:$0xff]   ;;  %v1856_v8 = vld [vmem:[#allocation2 + $0x48] ss:$16 sps:$4 sm:$0xff]   ;;  %vm925_vm2 = vcmask 1045504  }
  0x2d   : > { %s193_s4 = scalar_lea.vmem %s2613_s0, %s1722_s28  ;;  %308 = vmatprep.subr.bf16.mxu0 %v1851_v5  ;;  %361 = vmatprep.subr.bf16.mxu1 %v1853_v6  ;;  %v1861_v13 = vld [vmem:[#allocation2 + $0x24] ss:$16 sps:$4 sm:$0xff]   ;;  %v1864_v16 = vld [vmem:[#allocation2 + $0x2c] ss:$16 sps:$4 sm:$0xff]   ;;  %vm231_vm0 = vsmask.f32 7424  ;;  %s198_s16 = scalar_lea.vmem %s2616_s3, %s1722_s28 }
  0x2e   : > { %v2070_v9 = vld [vmem:[%s193_s4] sm:$0xff]   ;;  %v2072_v10 = vld [vmem:[%s193_s4 + $0x8] sm:$0xff]   ;;  %vm559_vm3 = vcmask 1046528   ;;  %vm740_vm4 = vsmask.f32 6400  ;;  %vm1263_vm5 = vcmask 1040384  }
  0x2f   : > { %v233_v11 = vshrl.u32 %v2070_v9, 16  ;;  %v235_v12 = vshll.u32 %v2070_v9, 16  ;;  %v240_v14 = vshll.u32 %v2072_v10, 16  ;;  %v1859_v18 = vld [vmem:[#allocation2 + $0x20] ss:$16 sps:$4 sm:$0xff]   ;;  %v926_v21 = vrot.slane %v2070_v9, 2 }
  0x30   : > { %309 = vmatpush1.bf16.msra.mxu0 %v1855_v7  ;;  %362 = vmatpush1.bf16.msra.mxu1 %v1856_v8  ;;  %v1862_v20 = vld [vmem:[#allocation2 + $0x28] ss:$16 sps:$4 sm:$0xff]   ;;  %v1867_v23 = vld [vmem:[#allocation2 + $0x4] ss:$16 sps:$4 sm:$0xff]   ;;  %v1870_v24 = vld [vmem:[#allocation2 + $0xc] ss:$16 sps:$4 sm:$0xff]  }
  0x31   : > { %v237_v15 = vrot.slane %v235_v12, 1  ;;  %456 = vmatprep.subr.bf16.mxu0 %v1861_v13  ;;  %v242_v17 = vrot.slane %v240_v14, 1  ;;  %509 = vmatprep.subr.bf16.mxu1 %v1864_v16  ;;  %v2085_v25 = vrot.slane %v2072_v10, 2  ;;  %v244_v26 = vshrl.u32 %v2072_v10, 16  ;;  %v1865_v27 = vld [vmem:[#allocation2] ss:$16 sps:$4 sm:$0xff]  }
  0x32   : > { %v1868_v28 = vld [vmem:[#allocation2 + $0x8] ss:$16 sps:$4 sm:$0xff]   ;;  %v1873_v30 = vld [vmem:[#allocation2 + $0xa4] ss:$16 sps:$4 sm:$0xff]   ;;  %v1876_v31 = vld [vmem:[#allocation2 + $0xac] ss:$16 sps:$4 sm:$0xff]  }
  0x33   : > { %v238_v19 = vor.u32 %v237_v15, %v233_v11  ;;  %v2092_v29 = vsel %vm925_vm2, %v926_v21, %v2085_v25  ;;  %v246_v32 = vor.u32 %v244_v26, %v242_v17  ;;  %v1871_v33 = vld [vmem:[#allocation2 + $0xa0] ss:$16 sps:$4 sm:$0xff]   ;;  %v1874_v34 = vld [vmem:[#allocation2 + $0xa8] ss:$16 sps:$4 sm:$0xff]   ;;  %v1879_v35 = vld [vmem:[#allocation2 + $0x84] ss:$16 sps:$4 sm:$0xff]  }
  0x34   : > { %v1882_v36 = vld [vmem:[#allocation2 + $0x8c] ss:$16 sps:$4 sm:$0xff]   ;;  %v1877_v37 = vld [vmem:[#allocation2 + $0x80] ss:$16 sps:$4 sm:$0xff]   ;;  %v1880_v38 = vld [vmem:[#allocation2 + $0x88] ss:$16 sps:$4 sm:$0xff]  }
  0x35   : > { %v243_v22 = vsel %vm231_vm0, %v238_v19, %v242_v17  ;;  %v1885_v39 = vld [vmem:[#allocation2 + $0xe4] ss:$16 sps:$4 sm:$0xff]   ;;  %v1888_v40 = vld [vmem:[#allocation2 + $0xec] ss:$16 sps:$4 sm:$0xff]   ;;  %v560_v41 = vrot.slane %v2070_v9, 1  ;;  %v561_v42 = vrot.slane %v2072_v10, 1 }
  0x36   : > { %1666 = vmatmul.mubr.msk.bf16.vlgmr.msra.gmra.mxu0 %vm287_vm1, %v243_v22  ;;  %1668 = vmatmul.mubr.msk.bf16.vlgmr.msra.gmra.mxu1 %vm287_vm1, %v243_v22  ;;  %v1883_v44 = vld [vmem:[#allocation2 + $0xe0] ss:$16 sps:$4 sm:$0xff]   ;;  %v1886_v45 = vld [vmem:[#allocation2 + $0xe8] ss:$16 sps:$4 sm:$0xff]   ;;  %v1891_v46 = vld [vmem:[#allocation2 + $0xc4] ss:$16 sps:$4 sm:$0xff]  }
  0x37   : > { %457 = vmatpush1.bf16.msra.mxu0 %v1859_v18  ;;  %510 = vmatpush1.bf16.msra.mxu1 %v1862_v20  ;;  %v562_v43 = vsel %vm559_vm3, %v560_v41, %v561_v42  ;;  %v1894_v47 = vld [vmem:[#allocation2 + $0xcc] ss:$16 sps:$4 sm:$0xff]   ;;  %v1889_v48 = vld [vmem:[#allocation2 + $0xc0] ss:$16 sps:$4 sm:$0xff]   ;;  %v1892_v49 = vld [vmem:[#allocation2 + $0xc8] ss:$16 sps:$4 sm:$0xff]  }
  0x38   : > { %336 = vmatprep.mubr.bf16.mxu0 %v1979_v0  ;;  %389 = vmatprep.mubr.bf16.mxu1 %v1979_v0  ;;  %v1897_v50 = vld [vmem:[#allocation2 + $0x124] ss:$16 sps:$4 sm:$0xff]   ;;  %v1900_v51 = vld [vmem:[#allocation2 + $0x12c] ss:$16 sps:$4 sm:$0xff]   ;;  %v741_v52 = vrot.slane %v233_v11, 1  ;;  %v742_v53 = vrot.slane %v235_v12, 2 }
  0x39   : > { %458 = vmatprep.subr.bf16.mxu0 %v1867_v23  ;;  %511 = vmatprep.subr.bf16.mxu1 %v1870_v24  ;;  %v745_v54 = vrot.slane %v240_v14, 2  ;;  %v744_v55 = vrot.slane %v244_v26, 1  ;;  %v1895_v59 = vld [vmem:[#allocation2 + $0x120] ss:$16 sps:$4 sm:$0xff]   ;;  %v1898_v60 = vld [vmem:[#allocation2 + $0x128] ss:$16 sps:$4 sm:$0xff]  }
  0x3a   : > { %v743_v56 = vor.u32 %v742_v53, %v741_v52  ;;  %v1903_v61 = vld [vmem:[#allocation2 + $0x104] ss:$16 sps:$4 sm:$0xff]   ;;  %v1906_v62 = vld [vmem:[#allocation2 + $0x10c] ss:$16 sps:$4 sm:$0xff]   ;;  %v1901_v63 = vld [vmem:[#allocation2 + $0x100] ss:$16 sps:$4 sm:$0xff]  }
  0x3b   : > { %459 = vmatpush1.bf16.msra.mxu0 %v1865_v27  ;;  %512 = vmatpush1.bf16.msra.mxu1 %v1868_v28  ;;  %v746_v57 = vor.u32 %v745_v54, %v744_v55  ;;  %v1904_v1 = vld [vmem:[#allocation2 + $0x108] ss:$16 sps:$4 sm:$0xff]   ;;  %vm1268_vm6 = vcmask 1041408   ;;  %vm1273_vm7 = vcmask 1042432   ;;  %vm1278_vm8 = vcmask 1043456   ;;  %s1980_s5 = smov 112  }
  0x3c   : > { %621 = vmatprep.subr.bf16.mxu0 %v1873_v30  ;;  %674 = vmatprep.subr.bf16.mxu1 %v1876_v31  ;;  %vm1283_vm9 = vcmask 1044480   ;;  %s1981_s6 = smov 96   ;;  %s1982_s7 = smov 80   ;;  %vm1518_vm10 = vcmask 130048   ;;  %vm1523_vm11 = vcmask 392192   ;;  %vm1526_vm12 = vcmask 523264  }
  0x3d   : > { %v747_v58 = vsel %vm740_vm4, %v743_v56, %v746_v57  ;;  %s1983_s8 = smov 64   ;;  %s1984_s9 = smov 48   ;;  %vm1529_vm13 = vcmask 654336   ;;  %vm1532_vm14 = vcmask 785408   ;;  %vm1535_vm15 = vcmask 916480  }
  0x3e   : > { %1667 = vmatmul.mubr.msk.bf16.gmra.mxu0 %vm287_vm1, %v246_v32  ;;  %1669 = vmatmul.mubr.msk.bf16.gmra.mxu1 %vm287_vm1, %v246_v32  ;;  %s1985_s10 = smov 32   ;;  %s1986_s11 = smov 16   ;;  %vm1560_vm0 = vcmask 785412  }
  0x3f   : > { %476 = vmatprep.mubr.bf16.mxu0 %v1979_v0  ;;  %529 = vmatprep.mubr.bf16.mxu1 %v1979_v0 }
  0x46   : > { %1678 = vmatmul.mubr.msk.bf16.vlgmr.msra.gmra.mxu0 %vm287_vm1, %v2070_v9  ;;  %1680 = vmatmul.mubr.msk.bf16.vlgmr.msra.gmra.mxu1 %vm287_vm1, %v2070_v9 }
  0x47   : > { %622 = vmatpush1.bf16.msra.mxu0 %v1871_v33  ;;  %675 = vmatpush1.bf16.msra.mxu1 %v1874_v34 }
  0x48   : > { %486 = vmatprep.mubr.bf16.mxu0 %v1979_v0  ;;  %539 = vmatprep.mubr.bf16.mxu1 %v1979_v0 }
  0x49   : > { %623 = vmatprep.subr.bf16.mxu0 %v1879_v35  ;;  %676 = vmatprep.subr.bf16.mxu1 %v1882_v36 }
  0x4b   : > { %624 = vmatpush1.bf16.msra.mxu0 %v1877_v37  ;;  %677 = vmatpush1.bf16.msra.mxu1 %v1880_v38 }
  0x4c   : > { %806 = vmatprep.subr.bf16.mxu0 %v1885_v39  ;;  %859 = vmatprep.subr.bf16.mxu1 %v1888_v40 }
  0x4e   : > { %1679 = vmatmul.mubr.msk.bf16.gmra.mxu0 %vm287_vm1, %v2072_v10  ;;  %1681 = vmatmul.mubr.msk.bf16.gmra.mxu1 %vm287_vm1, %v2072_v10 }
  0x4f   : > { %641 = vmatprep.mubr.bf16.mxu0 %v1979_v0  ;;  %694 = vmatprep.mubr.bf16.mxu1 %v1979_v0 }
  0x56   : > { %1690 = vmatmul.mubr.msk.bf16.vlgmr.msra.gmra.mxu0 %vm287_vm1, %v562_v43  ;;  %1692 = vmatmul.mubr.msk.bf16.vlgmr.msra.gmra.mxu1 %vm287_vm1, %v562_v43 }
  0x57   : > { %807 = vmatpush1.bf16.msra.mxu0 %v1883_v44  ;;  %860 = vmatpush1.bf16.msra.mxu1 %v1886_v45  ;;  %v1099_v45 = vlaneseq }
  0x58   : > { %651 = vmatprep.mubr.bf16.mxu0 %v1979_v0  ;;  %704 = vmatprep.mubr.bf16.mxu1 %v1979_v0 }
  0x59   : > { %808 = vmatprep.subr.bf16.mxu0 %v1891_v46  ;;  %861 = vmatprep.subr.bf16.mxu1 %v1894_v47 }
  0x5b   : > { %809 = vmatpush1.bf16.msra.mxu0 %v1889_v48  ;;  %862 = vmatpush1.bf16.msra.mxu1 %v1892_v49 }
  0x5c   : > { %987 = vmatprep.subr.bf16.mxu0 %v1897_v50  ;;  %1040 = vmatprep.subr.bf16.mxu1 %v1900_v51  ;;  %v1100_v50 = vshrl.u32 %v1099_v45, 7 }
  0x5e   : > { %1691 = vmatmul.mubr.msk.bf16.gmra.mxu0 %vm287_vm1, %v561_v42  ;;  %1693 = vmatmul.mubr.msk.bf16.gmra.mxu1 %vm287_vm1, %v561_v42  ;;  %v1101_v55 = vsub.s32 0, %v1100_v50  ;;  %v1109_v56 = vsub.s32 2, %v1100_v50 }
  0x5f   : > { %826 = vmatprep.mubr.bf16.mxu0 %v1979_v0  ;;  %879 = vmatprep.mubr.bf16.mxu1 %v1979_v0 }
  0x66   : > { %1702 = vmatmul.mubr.msk.bf16.vlgmr.msra.gmra.mxu0 %vm287_vm1, %v747_v58  ;;  %1704 = vmatmul.mubr.msk.bf16.vlgmr.msra.gmra.mxu1 %vm287_vm1, %v747_v58 }
  0x67   : > { %988 = vmatpush1.bf16.msra.mxu0 %v1895_v59  ;;  %1041 = vmatpush1.bf16.msra.mxu1 %v1898_v60  ;;  %v1097_v59 = vld [vmem:[#allocation4] sm:$0xf]  ;;  %v1105_v60 = vsub.s32 1, %v1100_v50 }
  0x68   : > { %836 = vmatprep.mubr.bf16.mxu0 %v1979_v0  ;;  %889 = vmatprep.mubr.bf16.mxu1 %v1979_v0 }
  0x69   : > { %989 = vmatprep.subr.bf16.mxu0 %v1903_v61  ;;  %1042 = vmatprep.subr.bf16.mxu1 %v1906_v62  ;;  %v1113_v61 = vsub.s32 3, %v1100_v50 }
  0x6b   : > { %990 = vmatpush1.bf16.msra.mxu0 %v1901_v63  ;;  %1043 = vmatpush1.bf16.msra.mxu1 %v1904_v1  ;;  %v2183_v1 = vrot.slane %v1097_v59, %v1101_v55 }
  0x6d   : > { %2632 = vst [vmem:[#allocation16_spill] sm:$0xff] %v2183_v1 }
  0x6e   : > { %1703 = vmatmul.mubr.msk.bf16.gmra.mxu0 %vm287_vm1, %v746_v57  ;;  %1705 = vmatmul.mubr.msk.bf16.gmra.mxu1 %vm287_vm1, %v746_v57 }
  0x6f   : > { %1007 = vmatprep.mubr.bf16.mxu0 %v1979_v0  ;;  %1060 = vmatprep.mubr.bf16.mxu1 %v1979_v0 }
  0x76   : > { %1714 = vmatmul.mubr.msk.bf16.vlgmr.msra.gmra.mxu0 %vm287_vm1, %v2092_v29  ;;  %1716 = vmatmul.mubr.msk.bf16.vlgmr.msra.gmra.mxu1 %vm287_vm1, %v2092_v29 }
  0x77   : > { %1017 = vmatprep.mubr.bf16.mxu0 %v1979_v0  ;;  %1070 = vmatprep.mubr.bf16.mxu1 %v1979_v0 }
  0x7e   : > { %1715 = vmatmul.mubr.msk.bf16.gmra.mxu0 %vm287_vm1, %v2085_v25  ;;  %1717 = vmatmul.mubr.msk.bf16.gmra.mxu1 %vm287_vm1, %v2085_v25 }
  0xf6   : > { %v2151_v2 = vpop.f32.mrf.mxu0  ;;  %v2153_v3 = vpop.f32.mrf.mxu1 }
  0xf8   : > { %v2155_v4 = vpop.f32.mrf.mxu0  ;;  %v2157_v5 = vpop.f32.mrf.mxu1 }
  0xfa   : > { %v2159_v6 = vpop.f32.mrf.mxu0  ;;  %v2161_v7 = vpop.f32.mrf.mxu1 }
  0xfc   : > { %v2163_v8 = vpop.f32.mrf.mxu0  ;;  %v2165_v0 = vpop.f32.mrf.mxu1 }
  0xfe   : > { %v2167_v9 = vpop.f32.mrf.mxu0  ;;  %v2169_v10 = vpop.f32.mrf.mxu1 }
  0xff   : > { %2624 = vst [vmem:[#allocation8_spill] sm:$0xff] %v2167_v9  ;;  %2625 = vst [vmem:[#allocation9_spill] sm:$0xff] %v2169_v10 }
 0x100   : > { %v2171_v11 = vpop.f32.mrf.mxu0  ;;  %v2173_v12 = vpop.f32.mrf.mxu1 }
 0x101   : > { %2626 = vst [vmem:[#allocation10_spill] sm:$0xff] %v2171_v11  ;;  %2627 = vst [vmem:[#allocation11_spill] sm:$0xff] %v2173_v12  ;;  %v2189_v12 = vrot.slane %v1097_v59, %v1105_v60  ;;  %v2191_v11 = vrot.slane %v1097_v59, %v1113_v61 }
 0x102   : > { %v2175_v13 = vpop.f32.mrf.mxu0  ;;  %v2177_v14 = vpop.f32.mrf.mxu1 }
 0x103   : > { %2628 = vst [vmem:[#allocation12_spill] sm:$0xff] %v2175_v13  ;;  %2629 = vst [vmem:[#allocation13_spill] sm:$0xff] %v2177_v14 }
 0x104   : > { %v2179_v15 = vpop.f32.mrf.mxu0  ;;  %v2181_v16 = vpop.f32.mrf.mxu1  ;;  %2634 = vst [vmem:[#allocation18_spill] sm:$0xff] %v2189_v12  ;;  %2635 = vst [vmem:[#allocation19_spill] sm:$0xff] %v2191_v11 }
 0x105   : > { %2630 = vst [vmem:[#allocation14_spill] sm:$0xff] %v2179_v15  ;;  %2631 = vst [vmem:[#allocation15_spill] sm:$0xff] %v2181_v16  ;;  %v2185_v16 = vrot.slane %v1097_v59, %v1109_v56 }
 0x106   : > { %v478_v17 = vpop.f32.mrf.mxu0  ;;  %v531_v18 = vpop.f32.mrf.mxu1 }
 0x107   : > { %2633 = vst [vmem:[#allocation17_spill] sm:$0xff] %v2185_v16  ;;  %v479_v15 = vadd.f32 %v478_v17, %v2151_v2  ;;  %v532_v45 = vadd.f32 %v531_v18, %v2153_v3  ;;  %v2636_v17 = vld [vmem:[#allocation8_spill] sm:$0xff]  ;;  %v2637_v18 = vld [vmem:[#allocation9_spill] sm:$0xff] }
 0x108   : > { %v480_v19 = vpop.f32.mrf.mxu0  ;;  %v533_v20 = vpop.f32.mrf.mxu1  ;;  %v2638_v59 = vld [vmem:[#allocation10_spill] sm:$0xff]  ;;  %v2639_v11 = vld [vmem:[#allocation11_spill] sm:$0xff] }
 0x109   : > { %v481_v10 = vadd.f32 %v480_v19, %v2155_v4  ;;  %v534_v50 = vadd.f32 %v533_v20, %v2157_v5 }
 0x10a   : > { %v482_v21 = vpop.f32.mrf.mxu0  ;;  %v535_v22 = vpop.f32.mrf.mxu1  ;;  %v2640_v19 = vld [vmem:[#allocation12_spill] sm:$0xff]  ;;  %v2641_v20 = vld [vmem:[#allocation13_spill] sm:$0xff] }
 0x10b   : > { %v483_v9 = vadd.f32 %v482_v21, %v2159_v6  ;;  %v536_v55 = vadd.f32 %v535_v22, %v2161_v7 }
 0x10c   : > { %v484_v23 = vpop.f32.mrf.mxu0  ;;  %v537_v24 = vpop.f32.mrf.mxu1  ;;  %v2642_v21 = vld [vmem:[#allocation14_spill] sm:$0xff]  ;;  %v2643_v22 = vld [vmem:[#allocation15_spill] sm:$0xff] }
 0x10d   : > { %v485_v56 = vadd.f32 %v484_v23, %v2163_v8  ;;  %v538_v2 = vadd.f32 %v537_v24, %v2165_v0 }
 0x10e   : > { %v488_v25 = vpop.f32.mrf.mxu0  ;;  %v541_v26 = vpop.f32.mrf.mxu1 }
 0x10f   : > { %v489_v3 = vadd.f32 %v488_v25, %v2636_v17  ;;  %v542_v16 = vadd.f32 %v541_v26, %v2637_v18 }
 0x110   : > { %v490_v27 = vpop.f32.mrf.mxu0  ;;  %v543_v28 = vpop.f32.mrf.mxu1 }
 0x111   : > { %v491_v61 = vadd.f32 %v490_v27, %v2638_v59  ;;  %v544_v4 = vadd.f32 %v543_v28, %v2639_v11 }
 0x112   : > { %v492_v29 = vpop.f32.mrf.mxu0  ;;  %v545_v30 = vpop.f32.mrf.mxu1 }
 0x113   : > { %v493_v5 = vadd.f32 %v492_v29, %v2640_v19  ;;  %v546_v6 = vadd.f32 %v545_v30, %v2641_v20 }
 0x114   : > { %v494_v31 = vpop.f32.mrf.mxu0  ;;  %v547_v32 = vpop.f32.mrf.mxu1 }
 0x115   : > { %v495_v7 = vadd.f32 %v494_v31, %v2642_v21  ;;  %v548_v8 = vadd.f32 %v547_v32, %v2643_v22 }
 0x116   : > { %v643_v33 = vpop.f32.mrf.mxu0  ;;  %v696_v34 = vpop.f32.mrf.mxu1 }
 0x117   : > { %v715_v23 = vadd.f32 %v643_v33, %v479_v15  ;;  %v717_v0 = vadd.f32 %v696_v34, %v532_v45 }
 0x118   : > { %v645_v35 = vpop.f32.mrf.mxu0  ;;  %v698_v36 = vpop.f32.mrf.mxu1 }
 0x119   : > { %v716_v17 = vadd.f32 %v645_v35, %v481_v10  ;;  %v718_v26 = vadd.f32 %v698_v36, %v534_v50 }
 0x11a   : > { %v647_v37 = vpop.f32.mrf.mxu0  ;;  %v700_v38 = vpop.f32.mrf.mxu1 }
 0x11b   : > { %v719_v18 = vadd.f32 %v647_v37, %v483_v9  ;;  %v721_v1 = vadd.f32 %v700_v38, %v536_v55 }
 0x11c   : > { %v649_v39 = vpop.f32.mrf.mxu0  ;;  %v702_v40 = vpop.f32.mrf.mxu1 }
 0x11d   : > { %v720_v27 = vadd.f32 %v649_v39, %v485_v56  ;;  %v722_v59 = vadd.f32 %v702_v40, %v538_v2 }
 0x11e   : > { %v653_v41 = vpop.f32.mrf.mxu0  ;;  %v706_v42 = vpop.f32.mrf.mxu1 }
 0x11f   : > { %v723_v11 = vadd.f32 %v653_v41, %v489_v3  ;;  %v725_v28 = vadd.f32 %v706_v42, %v542_v16 }
 0x120   : > { %v655_v43 = vpop.f32.mrf.mxu0  ;;  %v708_v44 = vpop.f32.mrf.mxu1 }
 0x121   : > { %v724_v20 = vadd.f32 %v655_v43, %v491_v61  ;;  %v726_v30 = vadd.f32 %v708_v44, %v544_v4  ;;  %v2644_v43 = vld [vmem:[#allocation16_spill] sm:$0xff] }
 0x122   : > { %v657_v46 = vpop.f32.mrf.mxu0  ;;  %v710_v47 = vpop.f32.mrf.mxu1 }
 0x123   : > { %v727_v32 = vadd.f32 %v657_v46, %v493_v5  ;;  %v729_v15 = vadd.f32 %v710_v47, %v546_v6 }
 0x124   : > { %v659_v48 = vpop.f32.mrf.mxu0  ;;  %v712_v49 = vpop.f32.mrf.mxu1 }
 0x125   : > { %v728_v33 = vadd.f32 %v659_v48, %v495_v7  ;;  %v730_v34 = vadd.f32 %v712_v49, %v548_v8 }
 0x126   : > { %v828_v51 = vpop.f32.mrf.mxu0  ;;  %v881_v52 = vpop.f32.mrf.mxu1 }
 0x127   : > { %v900_v21 = vadd.f32 %v828_v51, %v715_v23  ;;  %v902_v31 = vadd.f32 %v881_v52, %v717_v0  ;;  %v2645_v51 = vld [vmem:[#allocation17_spill] sm:$0xff] }
 0x128   : > { %v830_v53 = vpop.f32.mrf.mxu0  ;;  %v883_v54 = vpop.f32.mrf.mxu1 }
 0x129   : > { %v901_v9 = vadd.f32 %v830_v53, %v716_v17  ;;  %v903_v35 = vadd.f32 %v883_v54, %v718_v26 }
 0x12a   : > { %v832_v57 = vpop.f32.mrf.mxu0  ;;  %v885_v58 = vpop.f32.mrf.mxu1 }
 0x12b   : > { %v904_v38 = vadd.f32 %v832_v57, %v719_v18  ;;  %v906_v16 = vadd.f32 %v885_v58, %v721_v1  ;;  %v2646_v58 = vld [vmem:[#allocation18_spill] sm:$0xff] }
 0x12c   : > { %v834_v62 = vpop.f32.mrf.mxu0  ;;  %v887_v63 = vpop.f32.mrf.mxu1 }
 0x12d   : > { %v905_v39 = vadd.f32 %v834_v62, %v720_v27  ;;  %v907_v40 = vadd.f32 %v887_v63, %v722_v59  ;;  %v2647_v63 = vld [vmem:[#allocation19_spill] sm:$0xff] }
 0x12e   : > { %v838_v14 = vpop.f32.mrf.mxu0  ;;  %v891_v13 = vpop.f32.mrf.mxu1 }
 0x12f   : > { %v908_v49 = vadd.f32 %v838_v14, %v723_v11  ;;  %v910_v52 = vadd.f32 %v891_v13, %v725_v28 }
 0x130   : > { %v840_v60 = vpop.f32.mrf.mxu0  ;;  %v893_v12 = vpop.f32.mrf.mxu1 }
 0x131   : > { %v909_v50 = vadd.f32 %v840_v60, %v724_v20  ;;  %v911_v55 = vadd.f32 %v893_v12, %v726_v30 }
 0x132   : > { %v842_v24 = vpop.f32.mrf.mxu0  ;;  %v895_v25 = vpop.f32.mrf.mxu1 }
 0x133   : > { %v912_v2 = vadd.f32 %v842_v24, %v727_v32  ;;  %v914_v3 = vadd.f32 %v895_v25, %v729_v15 }
 0x134   : > { %v844_v19 = vpop.f32.mrf.mxu0  ;;  %v897_v29 = vpop.f32.mrf.mxu1 }
 0x135   : > { %v2215_v14 = vadd.f32 %v844_v19, %v728_v33  ;;  %v2217_v13 = vadd.f32 %v897_v29, %v730_v34 }
 0x136   : > { %v1009_v45 = vpop.f32.mrf.mxu0  ;;  %v1062_v10 = vpop.f32.mrf.mxu1 }
 0x137   : > { %v1081_v36 = vadd.f32 %v1009_v45, %v900_v21  ;;  %v1083_v37 = vadd.f32 %v1062_v10, %v902_v31 }
 0x138   : > { %v1011_v41 = vpop.f32.mrf.mxu0  ;;  %v1064_v42 = vpop.f32.mrf.mxu1 }
 0x139   : > { %v1119_v44 = vadd.f32 %v2644_v43, %v1081_v36  ;;  %v1121_v46 = vadd.f32 %v2645_v51, %v1083_v37  ;;  %v1082_v47 = vadd.f32 %v1011_v41, %v901_v9  ;;  %v1084_v48 = vadd.f32 %v1064_v42, %v903_v35 }
 0x13a   : > { %v1013_v53 = vpop.f32.mrf.mxu0  ;;  %v1066_v54 = vpop.f32.mrf.mxu1 }
 0x13b   : > { %v2209_v56 = vmax.f32 %v1119_v44, 0.0  ;;  %v2211_v57 = vmax.f32 %v1121_v46, 0.0  ;;  %v1120_v62 = vadd.f32 %v2646_v58, %v1082_v47  ;;  %v1122_v1 = vadd.f32 %v2647_v63, %v1084_v48 }
 0x13c   : > { %v1085_v61 = vadd.f32 %v1013_v53, %v904_v38  ;;  %v1087_v4 = vadd.f32 %v1066_v54, %v906_v16  ;;  %v1015_v5 = vpop.f32.mrf.mxu0  ;;  %v1068_v6 = vpop.f32.mrf.mxu1 }
 0x13d   : > { %v1155_v12 = vrot.slane %v2209_v56, 1  ;;  %v1163_v60 = vrot.slane %v2209_v56, 2  ;;  %v1171_v7 = vrot.slane %v2209_v56, 3  ;;  %v1318_v22 = vrot.slane %v2209_v56, 4 }
 0x13e   : > { %v1157_v8 = vrot.slane %v2211_v57, 1  ;;  %v1165_v23 = vrot.slane %v2211_v57, 2  ;;  %v1019_v0 = vpop.f32.mrf.mxu0  ;;  %v1072_v24 = vpop.f32.mrf.mxu1  ;;  %v1173_v25 = vrot.slane %v2211_v57, 3  ;;  %v2226_v17 = vmax.f32 %v1120_v62, 0.0 }
 0x13f   : > { %v2228_v26 = vmax.f32 %v1122_v1, 0.0  ;;  %v1123_v18 = vadd.f32 %v2644_v43, %v1085_v61  ;;  %v1320_v59 = vrot.slane %v2211_v57, 4  ;;  %v1125_v11 = vadd.f32 %v2645_v51, %v1087_v4 }
 0x140   : > { %v1266_v27 = vsel %vm1263_vm5, %v2211_v57, %v1157_v8  ;;  %v1086_v28 = vadd.f32 %v1015_v5, %v905_v39  ;;  %v1021_v19 = vpop.f32.mrf.mxu0  ;;  %v1074_v29 = vpop.f32.mrf.mxu1  ;;  %v2239_v20 = vsel %vm1263_vm5, %v2209_v56, %v1155_v12  ;;  %v2245_v21 = vsel %vm1263_vm5, %v1157_v8, %v1165_v23 }
 0x141   : > { %v2242_v30 = vsel %vm1268_vm6, %v1266_v27, %v1165_v23  ;;  %v1156_v31 = vrot.slane %v2226_v17, 1  ;;  %v1164_v32 = vrot.slane %v2226_v17, 2  ;;  %v1172_v15 = vrot.slane %v2226_v17, 3 }
 0x142   : > { %v1158_v33 = vrot.slane %v2228_v26, 1  ;;  %v1166_v34 = vrot.slane %v2228_v26, 2  ;;  %v1319_v10 = vrot.slane %v2226_v17, 4  ;;  %v1174_v9 = vrot.slane %v2228_v26, 3  ;;  %v1023_v39 = vpop.f32.mrf.mxu0  ;;  %v1076_v41 = vpop.f32.mrf.mxu1 }
 0x143   : > { %v2256_v45 = vsel %vm1263_vm5, %v2226_v17, %v1156_v31  ;;  %v2260_v35 = vmax.f32 %v1123_v18, 0.0  ;;  %v2264_v37 = vmax.f32 %v1125_v11, 0.0  ;;  %v1124_v38 = vadd.f32 %v2646_v58, %v1086_v28 }
 0x144   : > { %v1267_v36 = vsel %vm1263_vm5, %v2228_v26, %v1158_v33  ;;  %v1088_v16 = vadd.f32 %v1068_v6, %v907_v40  ;;  %v2272_v46 = vsel %vm1263_vm5, %v1158_v33, %v1166_v34  ;;  %v1089_v54 = vadd.f32 %v1019_v0, %v908_v49 }
 0x145   : > { %v2268_v42 = vsel %vm1268_vm6, %v1267_v36, %v1166_v34  ;;  %v1183_v47 = vrot.slane %v2260_v35, 4  ;;  %v2275_v48 = vmax.f32 %v1124_v38, 0.0  ;;  %v1091_v62 = vadd.f32 %v1072_v24, %v910_v52 }
 0x146   : > { %v1126_v53 = vadd.f32 %v2647_v63, %v1088_v16  ;;  %v1090_v1 = vadd.f32 %v1021_v19, %v909_v50  ;;  %v1092_v40 = vadd.f32 %v1074_v29, %v911_v55  ;;  %v1093_v61 = vadd.f32 %v1023_v39, %v912_v2 }
 0x147   : > { %v1095_v4 = vadd.f32 %v1076_v41, %v914_v3  ;;  %v1185_v5 = vrot.slane %v2264_v37, 4  ;;  %v1127_v8 = vadd.f32 %v2644_v43, %v1089_v54  ;;  %v1129_v23 = vadd.f32 %v2645_v51, %v1091_v62  ;;  %v1025_v54 = vpop.f32.mrf.mxu0  ;;  %v1078_v62 = vpop.f32.mrf.mxu1 }
 0x148   : > { %v2279_v6 = vmax.f32 %v1126_v53, 0.0  ;;  %v1128_v18 = vadd.f32 %v2646_v58, %v1090_v1  ;;  %v1130_v27 = vadd.f32 %v2647_v63, %v1092_v40  ;;  %v1131_v49 = vadd.f32 %v2644_v43, %v1093_v61 }
 0x149   : > { %v1133_v52 = vadd.f32 %v2645_v51, %v1095_v4  ;;  %v1193_v50 = vrot.slane %v2264_v37, 5  ;;  %v1184_v55 = vrot.slane %v2275_v48, 4  ;;  %v2289_v2 = vmax.f32 %v1127_v8, 0.0 }
 0x14a   : > { %v2291_v3 = vmax.f32 %v1129_v23, 0.0  ;;  %v1186_v0 = vrot.slane %v2279_v6, 4  ;;  %v2294_v24 = vmax.f32 %v1128_v18, 0.0  ;;  %v2296_v11 = vmax.f32 %v1130_v27, 0.0 }
 0x14b   : > { %v2298_v28 = vmax.f32 %v1131_v49, 0.0  ;;  %v1219_v51 = vrot.slane %v2289_v2, 1  ;;  %v2303_v29 = vmax.f32 %v1133_v52, 0.0  ;;  %v1227_v33 = vrot.slane %v2289_v2, 2 }
 0x14c   : > { %v1221_v19 = vrot.slane %v2291_v3, 1  ;;  %v1229_v34 = vrot.slane %v2291_v3, 2  ;;  %v1237_v36 = vrot.slane %v2291_v3, 3  ;;  %v1328_v38 = vrot.slane %v2291_v3, 4 }
 0x14d   : > { %v1220_v39 = vrot.slane %v2294_v24, 1  ;;  %v1228_v41 = vrot.slane %v2294_v24, 2  ;;  %v2621_v53 = vrot.slane %v2296_v11, 1  ;;  %v1247_v4 = vrot.slane %v2298_v28, 4 }
 0x14e   : > { %v2313_v16 = vsel %vm1263_vm5, %v2291_v3, %v1221_v19  ;;  %v1255_v23 = vrot.slane %v2298_v28, 5  ;;  %v1334_v18 = vrot.slane %v2298_v28, 6  ;;  %v1249_v27 = vrot.slane %v2303_v29, 4 }
 0x14f   : > { %v2326_v8 = vsel %vm1263_vm5, %v2296_v11, %v2621_v53  ;;  %v1257_v49 = vrot.slane %v2303_v29, 5  ;;  %v1094_v52 = vadd.f32 %v1025_v54, %v2215_v14  ;;  %v1096_v61 = vadd.f32 %v1078_v62, %v2217_v13 }
 0x150   : > { %v1191_v44 = vrot.slane %v2260_v35, 5  ;;  %v1235_v43 = vrot.slane %v2289_v2, 3  ;;  %v1269_v53 = vsel %vm1268_vm6, %v2239_v20, %v1163_v60  ;;  %v1298_v28 = vsel %vm1263_vm5, %v2289_v2, %v1219_v51 }
 0x151   : > { %v1132_v1 = vadd.f32 %v2646_v58, %v1094_v52  ;;  %v1134_v14 = vadd.f32 %v2647_v63, %v1096_v61  ;;  %v1274_v13 = vsel %vm1273_vm7, %v1269_v53, %v1171_v7  ;;  %v1302_v54 = vsel %vm1268_vm6, %v1298_v28, %v1227_v33 }
 0x152   : > { %v1199_v62 = vrot.slane %v2260_v35, 6  ;;  %v1279_v40 = vsel %vm1278_vm8, %v1274_v13, %v1183_v47  ;;  %v1306_v20 = vsel %vm1273_vm7, %v1302_v54, %v1235_v43  ;;  %v1342_v58 = vsel %vm1263_vm5, %v1155_v12, %v1163_v60 }
 0x153   : > { %v2359_v63 = vmax.f32 %v1132_v1, 0.0  ;;  %v2361_v61 = vmax.f32 %v1134_v14, 0.0  ;;  %v1284_v53 = vsel %vm1283_vm9, %v1279_v40, %v1191_v44  ;;  %v1310_v52 = vsel %vm1278_vm8, %v1306_v20, %v1247_v4 }
 0x154   : > { %v1207_v28 = vrot.slane %v2260_v35, 7  ;;  %v1289_v47 = vsel %vm925_vm2, %v1284_v53, %v1199_v62  ;;  %v1346_v13 = vsel %vm1268_vm6, %v1342_v58, %v1171_v7  ;;  %v1370_v54 = vsel %vm1263_vm5, %v1219_v51, %v1227_v33 }
 0x155   : > { %v1248_v12 = vrot.slane %v2359_v63, 4  ;;  %v1256_v60 = vrot.slane %v2359_v63, 5  ;;  %v1314_v1 = vsel %vm1283_vm9, %v1310_v52, %v1255_v23  ;;  %v1326_v40 = vrot.slane %v2289_v2, 4 }
 0x156   : > { %v1335_v4 = vrot.slane %v2359_v63, 6  ;;  %v1250_v14 = vrot.slane %v2361_v61, 4  ;;  %v1294_v20 = vsel %vm559_vm3, %v1289_v47, %v1207_v28  ;;  %v1350_v7 = vsel %vm1273_vm7, %v1346_v13, %v1318_v22 }
 0x157   : > { %v1354_v51 = vsel %vm1278_vm8, %v1350_v7, %v1191_v44  ;;  %v1374_v33 = vsel %vm1268_vm6, %v1370_v54, %v1235_v43  ;;  %v1192_v58 = vrot.slane %v2275_v48, 5  ;;  %v1200_v53 = vrot.slane %v2275_v48, 6 }
 0x158   : > { %v1358_v2 = vsel %vm1283_vm9, %v1354_v51, %v1199_v62  ;;  %v1378_v63 = vsel %vm1273_vm7, %v1374_v33, %v1326_v40  ;;  %v1208_v52 = vrot.slane %v2275_v48, 7  ;;  %v1236_v47 = vrot.slane %v2294_v24, 3 }
 0x159   : > { %v1362_v56 = vsel %vm925_vm2, %v1358_v2, %v1207_v28  ;;  %v1382_v22 = vsel %vm1278_vm8, %v1378_v63, %v1255_v23  ;;  %v1270_v44 = vsel %vm1268_vm6, %v2256_v45, %v1164_v32  ;;  %v1299_v43 = vsel %vm1263_vm5, %v2294_v24, %v1220_v39 }
 0x15a   : > { %v1366_v62 = vsel %vm559_vm3, %v1362_v56, %v2260_v35  ;;  %v1386_v13 = vsel %vm1283_vm9, %v1382_v22, %v1334_v18  ;;  %v1275_v28 = vsel %vm1273_vm7, %v1270_v44, %v1172_v15  ;;  %v1303_v23 = vsel %vm1268_vm6, %v1299_v43, %v1228_v41 }
 0x15b   : > { %v2408_v54 = vmax.f32 %v1294_v20, %v1366_v62  ;;  %v2410_v45 = vmax.f32 %v1314_v1, %v1386_v13  ;;  %v1280_v40 = vsel %vm1278_vm8, %v1275_v28, %v1184_v55  ;;  %v1307_v35 = vsel %vm1273_vm7, %v1303_v23, %v1236_v47 }
 0x15c   : > { %v1285_v18 = vsel %vm1283_vm9, %v1280_v40, %v1192_v58  ;;  %v1311_v7 = vsel %vm1278_vm8, %v1307_v35, %v1248_v12  ;;  %v1327_v51 = vrot.slane %v2294_v24, 4  ;;  %v1343_v20 = vsel %vm1263_vm5, %v1156_v31, %v1164_v32 }
 0x15d   : > { %v1765_v1 = vpack.i.bf16 %v2410_v45, %v2408_v54  ;;  %v1290_v33 = vsel %vm925_vm2, %v1285_v18, %v1200_v53  ;;  %v1315_v55 = vsel %vm1283_vm9, %v1311_v7, %v1256_v60  ;;  %v1347_v2 = vsel %vm1268_vm6, %v1343_v20, %v1172_v15 }
 0x15e   : > { %v1295_v12 = vsel %vm559_vm3, %v1290_v33, %v1208_v52  ;;  %v1351_v63 = vsel %vm1273_vm7, %v1347_v2, %v1319_v10  ;;  %v1371_v31 = vsel %vm1263_vm5, %v1220_v39, %v1228_v41  ;;  %v1201_v32 = vrot.slane %v2264_v37, 6 }
 0x15f   : > { %1766 = vrot.lane.b32.xlu0 %v1765_v1, %s1980_s5  ;;  %v1355_v56 = vsel %vm1278_vm8, %v1351_v63, %v1192_v58  ;;  %v1375_v15 = vsel %vm1268_vm6, %v1371_v31, %v1236_v47  ;;  %v1209_v22 = vrot.slane %v2264_v37, 7  ;;  %v1276_v17 = vsel %vm1273_vm7, %v2242_v30, %v1173_v25 }
 0x160   : > { %v1359_v10 = vsel %vm1283_vm9, %v1355_v56, %v1200_v53  ;;  %v1379_v24 = vsel %vm1273_vm7, %v1375_v15, %v1327_v51  ;;  %v1281_v39 = vsel %vm1278_vm8, %v1276_v17, %v1185_v5  ;;  %v1304_v41 = vsel %vm1268_vm6, %v2313_v16, %v1229_v34 }
 0x161   : > { %v1363_v58 = vsel %vm925_vm2, %v1359_v10, %v1208_v52  ;;  %v1383_v47 = vsel %vm1278_vm8, %v1379_v24, %v1256_v60  ;;  %v1286_v30 = vsel %vm1283_vm9, %v1281_v39, %v1193_v50  ;;  %v1308_v53 = vsel %vm1273_vm7, %v1304_v41, %v1237_v36 }
 0x162   : > { %v1367_v5 = vsel %vm559_vm3, %v1363_v58, %v2275_v48  ;;  %v1387_v44 = vsel %vm1283_vm9, %v1383_v47, %v1335_v4  ;;  %v1291_v43 = vsel %vm925_vm2, %v1286_v30, %v1201_v32  ;;  %v1312_v16 = vsel %vm1278_vm8, %v1308_v53, %v1249_v27 }
 0x163   : > { %v1391_v60 = vmax.f32 %v1295_v12, %v1367_v5  ;;  %v1395_v52 = vmax.f32 %v1315_v55, %v1387_v44  ;;  %v1296_v62 = vsel %vm559_vm3, %v1291_v43, %v1209_v22  ;;  %v1316_v13 = vsel %vm1283_vm9, %v1312_v16, %v1257_v49 }
 0x164   : > { %v1348_v48 = vsel %vm1268_vm6, %v2245_v21, %v1173_v25  ;;  %v1372_v4 = vsel %vm1263_vm5, %v1221_v19, %v1229_v34  ;;  %v1202_v27 = vrot.slane %v2279_v6, 6  ;;  %v1210_v28 = vrot.slane %v2279_v6, 7 }
 0x165   : > { %v1775_v23 = vpack.i.bf16 %v1395_v52, %v1391_v60  ;;  %v1352_v40 = vsel %vm1273_vm7, %v1348_v48, %v1320_v59  ;;  %v1376_v35 = vsel %vm1268_vm6, %v1372_v4, %v1237_v36  ;;  %v1277_v25 = vsel %vm1273_vm7, %v2268_v42, %v1174_v9 }
 0x166   : > { %v1356_v21 = vsel %vm1278_vm8, %v1352_v40, %v1193_v50  ;;  %v1380_v19 = vsel %vm1273_vm7, %v1376_v35, %v1328_v38  ;;  %v1282_v57 = vsel %vm1278_vm8, %v1277_v25, %v1186_v0  ;;  %v2648_v59 = vrot.slane %v2296_v11, 2 }
 0x167   : > { %1776 = vrot.lane.b32.xlu1 %v1775_v23, %s1980_s5  ;;  %v1360_v42 = vsel %vm1283_vm9, %v1356_v21, %v1201_v32  ;;  %v1384_v50 = vsel %vm1278_vm8, %v1380_v19, %v1257_v49  ;;  %v2649_v3 = vrot.slane %v2279_v6, 5  ;;  %v2650_v38 = vrot.slane %v2296_v11, 3 }
 0x168   : > { %v1305_v34 = vsel %vm1268_vm6, %v2326_v8, %v2648_v59  ;;  %v1258_v18 = vrot.slane %v2361_v61, 5  ;;  %v1364_v8 = vsel %vm925_vm2, %v1360_v42, %v1209_v22  ;;  %v2651_v7 = vrot.slane %v2303_v29, 6 }
 0x169   : > { %v1287_v36 = vsel %vm1283_vm9, %v1282_v57, %v2649_v3  ;;  %v1309_v0 = vsel %vm1273_vm7, %v1305_v34, %v2650_v38  ;;  %v1368_v49 = vsel %vm559_vm3, %v1364_v8, %v2264_v37  ;;  %v1337_v2 = vrot.slane %v2361_v61, 6 }
 0x16a   : > { %v1388_v51 = vsel %vm1283_vm9, %v1384_v50, %v2651_v7  ;;  %v1292_v20 = vsel %vm925_vm2, %v1287_v36, %v1202_v27  ;;  %v1313_v55 = vsel %vm1278_vm8, %v1309_v0, %v1250_v14  ;;  %v1392_v12 = vmax.f32 %v1296_v62, %v1368_v49 }
 0x16b   : > { %v1396_v1 = vmax.f32 %v1316_v13, %v1388_v51  ;;  %v1297_v33 = vsel %vm559_vm3, %v1292_v20, %v1210_v28  ;;  %v1349_v29 = vsel %vm1268_vm6, %v2272_v46, %v1174_v9  ;;  %v2652_v63 = vmov %v2648_v59 }
 0x16c   : > { %v2653_v31 = vrot.slane %v2296_v11, 1  ;;  %v2654_v32 = vrot.slane %v2228_v26, 4  ;;  %v2655_v14 = vmov %v2650_v38  ;;  %v1317_v22 = vsel %vm1283_vm9, %v1313_v55, %v1258_v18 }
 0x16d   : > { %v1770_v15 = vpack.i.bf16 %v1396_v1, %v1392_v12  ;;  %v2656_v17 = vmov %v2649_v3  ;;  %v2657_v46 = vrot.slane %v2296_v11, 4 }
 0x16e   : > { %v1373_v37 = vsel %vm1263_vm5, %v2653_v31, %v2652_v63  ;;  %v1353_v56 = vsel %vm1273_vm7, %v1349_v29, %v2654_v32 }
 0x16f   : > { %v1377_v61 = vsel %vm1268_vm6, %v1373_v37, %v2655_v14  ;;  %v1357_v9 = vsel %vm1278_vm8, %v1353_v56, %v2656_v17  ;;  %1771 = vrot.lane.b32.xlu0 %v1770_v15, %s1980_s5 }
 0x170   : > { %v1381_v10 = vsel %vm1273_vm7, %v1377_v61, %v2657_v46  ;;  %v1361_v24 = vsel %vm1283_vm9, %v1357_v9, %v1202_v27 }
 0x171   : > { %v1385_v26 = vsel %vm1278_vm8, %v1381_v10, %v1258_v18  ;;  %v1365_v39 = vsel %vm925_vm2, %v1361_v24, %v1210_v28  ;;  %vm1563_vm2 = vcmask 784388  }
 0x172   : > { %v1389_v41 = vsel %vm1283_vm9, %v1385_v26, %v1337_v2  ;;  %v1369_v58 = vsel %vm559_vm3, %v1365_v39, %v2279_v6  ;;  %vm1561_vm3 = vmor %vm1560_vm0, %vm1278_vm8 }
 0x173   : > { %v1397_v47 = vmax.f32 %v1317_v22, %v1389_v41  ;;  %v1393_v30 = vmax.f32 %v1297_v33, %v1369_v58 }
 0x175   : > { %v1780_v53 = vpack.i.bf16 %v1397_v47, %v1393_v30 }
 0x177   : > { %1781 = vrot.lane.b32.xlu1 %v1780_v53, %s1980_s5 }
 0x1d1   : > { %v1767_v11 = vpop.permute.xlu0 %1766 }
 0x1d2   : > { %v1769_v5 = vunpack.i.h.bf16 %v1767_v11  ;;  %v1768_v44 = vunpack.i.l.bf16 %v1767_v11 }
 0x1d4   : > { %v1407_v43 = vmax.f32 %v2410_v45, %v1769_v5  ;;  %v1406_v16 = vmax.f32 %v2408_v54, %v1768_v44 }
 0x1d6   : > { %v1790_v62 = vpack.i.bf16 %v1407_v43, %v1406_v16 }
 0x1d8   : > { %1791 = vrot.lane.b32.xlu1 %v1790_v62, %s1981_s6  ;;  %1786 = vrot.lane.b32.xlu0 %v1790_v62, %s1980_s5 }
 0x1d9   : > { %v1777_v13 = vpop.permute.xlu1 %1776 }
 0x1da   : > { %v1779_v48 = vunpack.i.h.bf16 %v1777_v13  ;;  %v1778_v6 = vunpack.i.l.bf16 %v1777_v13 }
 0x1dc   : > { %v1417_v4 = vmax.f32 %v1395_v52, %v1779_v48  ;;  %v1416_v27 = vmax.f32 %v1391_v60, %v1778_v6  ;;  %1796 = vrot.lane.b32.xlu0 %v1790_v62, %s1982_s7 }
 0x1de   : > { %v1815_v28 = vpack.i.bf16 %v1417_v4, %v1416_v27 }
 0x1e0   : > { %1816 = vrot.lane.b32.xlu0 %v1815_v28, %s1983_s8 }
 0x1e1   : > { %v1772_v23 = vpop.permute.xlu0 %1771 }
 0x1e2   : > { %v1774_v40 = vunpack.i.h.bf16 %v1772_v23  ;;  %v1773_v45 = vunpack.i.l.bf16 %v1772_v23 }
 0x1e4   : > { %v2568_v35 = vmax.f32 %v1396_v1, %v1774_v40  ;;  %v2570_v54 = vmax.f32 %v1392_v12, %v1773_v45  ;;  %1821 = vrot.lane.b32.xlu0 %v1815_v28, %s1984_s9 }
 0x1e6   : > { %v1800_v25 = vpack.i.bf16 %v2568_v35, %v2570_v54 }
 0x1e8   : > { %1801 = vrot.lane.b32.xlu1 %v1800_v25, %s1980_s5  ;;  %1826 = vrot.lane.b32.xlu0 %v1815_v28, %s1985_s10 }
 0x1e9   : > { %v1782_v21 = vpop.permute.xlu1 %1781 }
 0x1ea   : > { %v1784_v60 = vunpack.i.h.bf16 %v1782_v21  ;;  %v1783_v52 = vunpack.i.l.bf16 %v1782_v21 }
 0x1ec   : > { %1806 = vrot.lane.b32.xlu1 %v1800_v25, %s1981_s6  ;;  %1836 = vrot.lane.b32.xlu0 %v1815_v28, %s1986_s11  ;;  %v1437_v19 = vmax.f32 %v1397_v47, %v1784_v60  ;;  %v1436_v57 = vmax.f32 %v1393_v30, %v1783_v52 }
 0x1ee   : > { %v1830_v59 = vpack.i.bf16 %v1437_v19, %v1436_v57 }
 0x1f0   : > { %1811 = vrot.lane.b32.xlu1 %v1800_v25, %s1982_s7 }
 0x1f4   : > { %1831 = vrot.lane.b32.xlu1 %v1830_v59, %s1983_s8 }
 0x1f8   : > { %1841 = vrot.lane.b32.xlu1 %v1830_v59, %s1984_s9 }
 0x24a   : > { %v1787_v34 = vpop.permute.xlu0 %1786  ;;  %v1792_v3 = vpop.permute.xlu1 %1791 }
 0x24b   : > { %v1789_v0 = vunpack.i.h.bf16 %v1787_v34  ;;  %v1788_v18 = vunpack.i.l.bf16 %v1787_v34  ;;  %v1794_v51 = vunpack.i.h.bf16 %v1792_v3  ;;  %v1793_v20 = vunpack.i.l.bf16 %v1792_v3 }
 0x24d   : > { %v1520_v49 = vsel %vm1518_vm10, %v1407_v43, %v1789_v0  ;;  %v1519_v1 = vsel %vm1518_vm10, %v1406_v16, %v1788_v18 }
 0x24e   : > { %v1797_v42 = vpop.permute.xlu0 %1796  ;;  %v1521_v12 = vsel %vm287_vm1, %v1519_v1, %v1793_v20  ;;  %v1522_v29 = vsel %vm287_vm1, %v1520_v49, %v1794_v51 }
 0x24f   : > { %v1799_v33 = vunpack.i.h.bf16 %v1797_v42  ;;  %v1798_v55 = vunpack.i.l.bf16 %v1797_v42 }
 0x251   : > { %v1524_v32 = vsel %vm1523_vm11, %v1521_v12, %v1798_v55  ;;  %v1525_v56 = vsel %vm1523_vm11, %v1522_v29, %v1799_v33 }
 0x252   : > { %v1817_v50 = vpop.permute.xlu0 %1816 }
 0x253   : > { %v1819_v63 = vunpack.i.h.bf16 %v1817_v50  ;;  %v1818_v31 = vunpack.i.l.bf16 %v1817_v50 }
 0x255   : > { %v1527_v41 = vsel %vm1526_vm12, %v1524_v32, %v1818_v31  ;;  %v1528_v58 = vsel %vm1526_vm12, %v1525_v56, %v1819_v63 }
 0x256   : > { %v1822_v36 = vpop.permute.xlu0 %1821 }
 0x257   : > { %v1824_v14 = vunpack.i.h.bf16 %v1822_v36  ;;  %v1823_v61 = vunpack.i.l.bf16 %v1822_v36 }
 0x259   : > { %v1530_v53 = vsel %vm1529_vm13, %v1527_v41, %v1823_v61  ;;  %v1531_v11 = vsel %vm1529_vm13, %v1528_v58, %v1824_v14 }
 0x25a   : > { %v1802_v38 = vpop.permute.xlu1 %1801  ;;  %v1827_v8 = vpop.permute.xlu0 %1826 }
 0x25b   : > { %v1804_v15 = vunpack.i.h.bf16 %v1802_v38  ;;  %v1803_v22 = vunpack.i.l.bf16 %v1802_v38  ;;  %v1829_v17 = vunpack.i.h.bf16 %v1827_v8  ;;  %v1828_v9 = vunpack.i.l.bf16 %v1827_v8 }
 0x25d   : > { %v1539_v43 = vsel %vm1518_vm10, %v2568_v35, %v1804_v15  ;;  %v1538_v16 = vsel %vm1518_vm10, %v2570_v54, %v1803_v22  ;;  %v1533_v62 = vsel %vm1532_vm14, %v1530_v53, %v1828_v9  ;;  %v1534_v13 = vsel %vm1532_vm14, %v1531_v11, %v1829_v17 }
 0x25e   : > { %v1807_v7 = vpop.permute.xlu1 %1806  ;;  %v1837_v37 = vpop.permute.xlu0 %1836 }
 0x25f   : > { %v1809_v46 = vunpack.i.h.bf16 %v1807_v7  ;;  %v1808_v10 = vunpack.i.l.bf16 %v1807_v7  ;;  %v1839_v26 = vunpack.i.h.bf16 %v1837_v37  ;;  %v1838_v39 = vunpack.i.l.bf16 %v1837_v37 }
 0x261   : > { %v1540_v48 = vsel %vm287_vm1, %v1538_v16, %v1808_v10  ;;  %v1541_v6 = vsel %vm287_vm1, %v1539_v43, %v1809_v46  ;;  %v1536_v27 = vsel %vm1535_vm15, %v1533_v62, %v1838_v39  ;;  %v1537_v28 = vsel %vm1535_vm15, %v1534_v13, %v1839_v26  ;;  %vm1564_vm1 = vmor %vm1563_vm2, %vm1273_vm7 }
 0x262   : > { %v1812_v2 = vpop.permute.xlu1 %1811 }
 0x263   : > { %v1814_v47 = vunpack.i.h.bf16 %v1812_v2  ;;  %v1813_v30 = vunpack.i.l.bf16 %v1812_v2 }
 0x265   : > { %v1542_v23 = vsel %vm1523_vm11, %v1540_v48, %v1813_v30  ;;  %v1543_v40 = vsel %vm1523_vm11, %v1541_v6, %v1814_v47 }
 0x266   : > { %v1832_v24 = vpop.permute.xlu1 %1831 }
 0x267   : > { %v1834_v5 = vunpack.i.h.bf16 %v1832_v24  ;;  %v1833_v44 = vunpack.i.l.bf16 %v1832_v24 }
 0x269   : > { %v1544_v54 = vsel %vm1526_vm12, %v1542_v23, %v1833_v44  ;;  %v1545_v25 = vsel %vm1526_vm12, %v1543_v40, %v1834_v5 }
 0x26a   : > { %v1842_v4 = vpop.permute.xlu1 %1841 }
 0x26b   : > { %v1844_v45 = vunpack.i.h.bf16 %v1842_v4  ;;  %v1843_v35 = vunpack.i.l.bf16 %v1842_v4 }
 0x26d   : > { %v1546_v21 = vsel %vm1529_vm13, %v1544_v54, %v1843_v35  ;;  %v1547_v60 = vsel %vm1529_vm13, %v1545_v25, %v1844_v45 }
 0x26e   : > { %v1724_v52 = vpack.c.bf16 %v1546_v21, %v1536_v27  ;;  %v1725_v19 = vpack.c.bf16 %v1547_v60, %v1537_v28 }
 0x270   : > { %1562 = vst.msk [vmem:[%s198_s16] sm:$0xff] %vm1561_vm3, %v1724_v52 }
 0x271   : > { %1565 = vst.msk [vmem:[%s198_s16 + $0x8] sm:$0x77] %vm1564_vm1, %v1725_v19 }
 0x272 PF: > { %s15_s12 = sadd.s32 1, %s1973_s12  }
 0x273   : > { %p12_p2 = scmp.ge.s32.totalorder %s15_s12, 4  }
 0x275   :  { %14 = sbr.rel (!%p12_p2) target bundleno = 2 (0x2), region = 75 }
 0x27a   :  { %1587 = vsyncpa [#allocation3], 1 }
 0x27b   :  { %1589 = vsyncpa [#allocation3 + $0x1], 1 }
 0x27c   :  { %1590 = vsyncpa [#allocation5], 1 }

// kernel: cnn_forward.4
= control target key start
LH: loop header
LB: loop body
LE: loop exit
PB: predicated region body
PF: predicated region fallthrough
CT: control target
= control target key end

     0   :  { %8 = vsyncpa [#allocation3], 0  ;;  %s5098_s0 = inlined_call_operand.vmem [shape: bf16[2,18,288], index: 0, kind: input, shape index: {}]   ;;  %s5099_s1 = inlined_call_operand.hbm [shape: bf16[5,288,448], index: 1, kind: input, shape index: {}]   ;;  %s5100_s2 = inlined_call_operand.hbm [shape: f32[1,448], index: 2, kind: input, shape index: {}]   ;;  %s5101_s3 = inlined_call_operand.vmem [shape: bf16[2,7,224], index: 3, kind: output, shape index: {}]  }
   0x1   :  { %9 = vsyncpa [#allocation5], 0  ;;  %s4763_s12 = smov 0  }
   0x2 LB: > { %s4769_s13 = sadd.s32 4294967295, %s4733_s12   ;;  %p3670_p0 = scmp.ge.s32.totalorder %s4733_s12, 1  ;;  %s4733_s12 = sphi %s4763_s12, %s15_s12  }
   0x3   : > { %p114_p1 = scmp.lt.s32.totalorder %s4733_s12, 3  ;;  %s4735_s14 = smov [#allocation2]  }
   0x4   : > { %s126_s15 = sshll.u32 %s4735_s14, 4  ;;  %p4077_p3 = scmp.eq.s32.totalorder %s4769_s13, 0  ;;  %s127_s15 = int_to_ptr.vmem [resolvable:$true] %s126_s15 }
   0x5   : > { %p4773_p2 = pnand %p3670_p0, %p114_p1  ;;  %s4736_s17 = smov [#allocation4]  }
   0x6   : > { %s140_s18 = sshll.u32 %s4736_s17, 4  ;;  %s4678_s20 = scalar_lea.vmem %s127_s15, 46080  ;;  %s141_s18 = int_to_ptr.vmem [resolvable:$true] %s140_s18 }
   0x7   : > { %p4070_p4 = pneg %p4773_p2  ;;  %p4679_p7 = scmp.ne.s32.totalorder %s127_s15, %s4678_s20 }
   0x8   : > { %p4686_p10 = scmp.lt.s32.totalorder %s127_s15, %s127_s15  ;;  %p4687_p11 = scmp.lt.s32.totalorder %s4678_s20, %s4678_s20 }
   0x9   : > { %p4782_p5 = pnand %p4077_p3, %p4070_p4 }
   0xa   : > { %p4688_p12 = por %p4687_p11, %p4686_p10 }
   0xb   : > { %p4669_p6 = pneg %p4782_p5 }
   0xd   : > { %p4681_p8 = pnand %p4679_p7, %p4669_p6 }
   0xf   : > { %p4682_p9 = pneg %p4681_p8 }
  0x11   : > { %p4689_p13 = pnand %p4688_p12, %p4682_p9 }
  0x13   : > { %4692 = shalt.err (!%p4689_p13)
}
  0x14   : > { %s4737_s21 = smov 256   ;;  %s4738_s22 = smov 16  }
  0x15   : > { %4073 = dma.hbm_to_vmem [thread:$0]  (!%p4782_p5), %s5099_s1, 46080, %s127_s15, [#allocation3], %s4737_s21, %s4737_s21, %s4738_s22  }
  0x16   : > { %s4704_s25 = scalar_lea.vmem %s141_s18, 64  ;;  %p4712_p7 = scmp.lt.s32.totalorder %s141_s18, %s141_s18 }
  0x17   : > { %p4705_p0 = scmp.ne.s32.totalorder %s141_s18, %s4704_s25  ;;  %p4713_p8 = scmp.lt.s32.totalorder %s4704_s25, %s4704_s25 }
  0x19   : > { %p4707_p1 = pnand %p4705_p0, %p4669_p6  ;;  %p4714_p10 = por %p4713_p8, %p4712_p7 }
  0x1b   : > { %p4708_p4 = pneg %p4707_p1 }
  0x1d   : > { %p4715_p9 = pnand %p4714_p10, %p4708_p4 }
  0x1f   : > { %4718 = shalt.err (!%p4715_p9)
}
  0x20   : > { %4076 = dma.hbm_to_vmem [thread:$0]  (!%p4782_p5), %s5100_s2, 64, %s141_s18, [#allocation5]  }
  0x21   : > { %161 = sbr.rel (%p4773_p2) target bundleno = 875 (0x36b), region = 32 }
  0x26   : > { %4724 = dma.done.wait (%p4077_p3), [#allocation3], 46080  }
  0x27   : > { %4726 = vsyncadd (%p4077_p3), [#allocation3], 4294921216 }
  0x28   : > { %4728 = dma.done.wait (%p4077_p3), [#allocation5], 64  }
  0x29   : > { %4730 = vsyncadd (%p4077_p3), [#allocation5], 4294967232  ;;  %p189_p6 = scmp.lt.s32.totalorder %s4769_s13, 1  ;;  %v4739_v0 = vmov 0   ;;  %v4117_v1 = vld [vmem:[#allocation2 + $0x324] ss:$16 sps:$4 sm:$0xff]  }
  0x2a   : > { %826 = vmatprep.mubr.bf16.mxu1 %v4739_v0  ;;  %v4119_v2 = vld [vmem:[#allocation2 + $0x464] ss:$16 sps:$4 sm:$0xff]   ;;  %751 = vmatprep.subr.bf16.mxu0 %v4117_v1  ;;  %v4121_v3 = vld [vmem:[#allocation2 + $0x320] ss:$16 sps:$4 sm:$0xff]   ;;  %v4134_v11 = vld [vmem:[#allocation2 + $0x32c] ss:$16 sps:$4 sm:$0xff]  }
  0x2b   : > { %s5133_s13 = smov (!%p189_p6, %s4769_s13), 1  ;;  %v4122_v4 = vld [vmem:[#allocation2 + $0x460] ss:$16 sps:$4 sm:$0xff]   ;;  %806 = vmatprep.subr.bf16.mxu1 %v4119_v2  ;;  %v4123_v5 = vld [vmem:[#allocation2 + $0x304] ss:$16 sps:$4 sm:$0xff]   ;;  %752 = vmatpush1.bf16.msra.mxu0 %v4121_v3  ;;  %vm747_vm0 = vcmask 261120  }
  0x2c   : > { %s4061_s28 = smul.u32 36, %s5133_s13  ;;  %807 = vmatpush1.bf16.msra.mxu1 %v4122_v4  ;;  %v4125_v6 = vld [vmem:[#allocation2 + $0x444] ss:$16 sps:$4 sm:$0xff]   ;;  %v4127_v7 = vld [vmem:[#allocation2 + $0x300] ss:$16 sps:$4 sm:$0xff]   ;;  %753 = vmatprep.subr.bf16.mxu0 %v4123_v5  ;;  %vm2804_vm2 = vcmask 1045504  }
  0x2d   : > { %v4128_v8 = vld [vmem:[#allocation2 + $0x440] ss:$16 sps:$4 sm:$0xff]   ;;  %808 = vmatprep.subr.bf16.mxu1 %v4125_v6  ;;  %v4129_v9 = vld [vmem:[#allocation2 + $0x2e4] ss:$16 sps:$4 sm:$0xff]   ;;  %v4132_v17 = vld [vmem:[#allocation2 + $0x328] ss:$16 sps:$4 sm:$0xff]  }
  0x2e   : > { %s4823_s4 = scalar_lea.vmem %s5098_s0, %s4061_s28  ;;  %v4135_v12 = vld [vmem:[#allocation2 + $0x2e0] ss:$16 sps:$4 sm:$0xff]   ;;  %v4136_v15 = vld [vmem:[#allocation2 + $0x2c4] ss:$16 sps:$4 sm:$0xff]   ;;  %v4140_v18 = vld [vmem:[#allocation2 + $0x30c] ss:$16 sps:$4 sm:$0xff]  }
  0x2f   : > { %v4826_v10 = vld [vmem:[%s4823_s4 + $0x8] ss:$12 sps:$4 sm:$0xff]   ;;  %754 = vmatpush1.bf16.msra.mxu0 %v4127_v7  ;;  %v4141_v19 = vld [vmem:[#allocation2 + $0x2c0] ss:$16 sps:$4 sm:$0xff]   ;;  %v4146_v23 = vld [vmem:[#allocation2 + $0x2ec] ss:$16 sps:$4 sm:$0xff]  }
  0x30   : > { %809 = vmatpush1.bf16.msra.mxu1 %v4128_v8  ;;  %755 = vmatprep.subr.bf16.mxu0 %v4129_v9  ;;  %v379_v13 = vshrl.u32 %v4826_v10, 16  ;;  %v381_v14 = vshll.u32 %v4826_v10, 16  ;;  %v4142_v21 = vld [vmem:[#allocation2 + $0x2a4] ss:$16 sps:$4 sm:$0xff]   ;;  %v4138_v22 = vld [vmem:[#allocation2 + $0x308] ss:$16 sps:$4 sm:$0xff]  }
  0x31   : > { %837 = vmatprep.subr.bf16.mxu1 %v4134_v11  ;;  %v4147_v24 = vld [vmem:[#allocation2 + $0x2a0] ss:$16 sps:$4 sm:$0xff]   ;;  %v4148_v25 = vld [vmem:[#allocation2 + $0x284] ss:$16 sps:$4 sm:$0xff]   ;;  %v4144_v26 = vld [vmem:[#allocation2 + $0x2e8] ss:$16 sps:$4 sm:$0xff]  }
  0x32   : > { %v383_v16 = vrot.slane %v381_v14, 1  ;;  %v4152_v27 = vld [vmem:[#allocation2 + $0x2cc] ss:$16 sps:$4 sm:$0xff]   ;;  %v4153_v28 = vld [vmem:[#allocation2 + $0x280] ss:$16 sps:$4 sm:$0xff]   ;;  %vm3453_vm3 = vcmask 1040384  }
  0x33   : > { %756 = vmatpush1.bf16.msra.mxu0 %v4135_v12  ;;  %v4154_v29 = vld [vmem:[#allocation2 + $0x264] ss:$16 sps:$4 sm:$0xff]   ;;  %v4150_v30 = vld [vmem:[#allocation2 + $0x2c8] ss:$16 sps:$4 sm:$0xff]   ;;  %v4158_v31 = vld [vmem:[#allocation2 + $0x2ac] ss:$16 sps:$4 sm:$0xff]  }
  0x34   : > { %v4834_v20 = vor.u32 %v383_v16, %v379_v13  ;;  %757 = vmatprep.subr.bf16.mxu0 %v4136_v15  ;;  %v4159_v32 = vld [vmem:[#allocation2 + $0x260] ss:$16 sps:$4 sm:$0xff]   ;;  %v4160_v33 = vld [vmem:[#allocation2 + $0x244] ss:$16 sps:$4 sm:$0xff]   ;;  %v4156_v34 = vld [vmem:[#allocation2 + $0x2a8] ss:$16 sps:$4 sm:$0xff]  }
  0x35   : > { %v4164_v35 = vld [vmem:[#allocation2 + $0x28c] ss:$16 sps:$4 sm:$0xff]   ;;  %v4165_v36 = vld [vmem:[#allocation2 + $0x240] ss:$16 sps:$4 sm:$0xff]   ;;  %v4166_v37 = vld [vmem:[#allocation2 + $0x424] ss:$16 sps:$4 sm:$0xff]  }
  0x36   : > { %3755 = vmatmul.mubr.msk.bf16.vlgmr.msra.gmra.mxu1 %vm747_vm0, %v4834_v20  ;;  %v4162_v38 = vld [vmem:[#allocation2 + $0x288] ss:$16 sps:$4 sm:$0xff]   ;;  %v4170_v39 = vld [vmem:[#allocation2 + $0x26c] ss:$16 sps:$4 sm:$0xff]   ;;  %v4171_v40 = vld [vmem:[#allocation2 + $0x420] ss:$16 sps:$4 sm:$0xff]  }
  0x37   : > { %838 = vmatpush1.bf16.msra.mxu1 %v4132_v17  ;;  %758 = vmatpush1.bf16.msra.mxu0 %v4141_v19  ;;  %v4172_v41 = vld [vmem:[#allocation2 + $0x404] ss:$16 sps:$4 sm:$0xff]   ;;  %v4168_v42 = vld [vmem:[#allocation2 + $0x268] ss:$16 sps:$4 sm:$0xff]   ;;  %v4176_v43 = vld [vmem:[#allocation2 + $0x24c] ss:$16 sps:$4 sm:$0xff]  }
  0x38   : > { %839 = vmatprep.subr.bf16.mxu1 %v4140_v18  ;;  %759 = vmatprep.subr.bf16.mxu0 %v4142_v21  ;;  %v4177_v44 = vld [vmem:[#allocation2 + $0x400] ss:$16 sps:$4 sm:$0xff]   ;;  %v4178_v45 = vld [vmem:[#allocation2 + $0x3e4] ss:$16 sps:$4 sm:$0xff]   ;;  %v4174_v46 = vld [vmem:[#allocation2 + $0x248] ss:$16 sps:$4 sm:$0xff]  }
  0x39   : > { %v4182_v47 = vld [vmem:[#allocation2 + $0x42c] ss:$16 sps:$4 sm:$0xff]   ;;  %v4183_v48 = vld [vmem:[#allocation2 + $0x3e0] ss:$16 sps:$4 sm:$0xff]   ;;  %v4184_v49 = vld [vmem:[#allocation2 + $0x3c4] ss:$16 sps:$4 sm:$0xff]  }
  0x3a   : > { %v4180_v50 = vld [vmem:[#allocation2 + $0x428] ss:$16 sps:$4 sm:$0xff]   ;;  %v4188_v51 = vld [vmem:[#allocation2 + $0x40c] ss:$16 sps:$4 sm:$0xff]   ;;  %v4189_v52 = vld [vmem:[#allocation2 + $0x3c0] ss:$16 sps:$4 sm:$0xff]  }
  0x3b   : > { %840 = vmatpush1.bf16.msra.mxu1 %v4138_v22  ;;  %760 = vmatpush1.bf16.msra.mxu0 %v4147_v24  ;;  %v4190_v53 = vld [vmem:[#allocation2 + $0x3a4] ss:$16 sps:$4 sm:$0xff]   ;;  %v4186_v55 = vld [vmem:[#allocation2 + $0x408] ss:$16 sps:$4 sm:$0xff]   ;;  %v4195_v58 = vld [vmem:[#allocation2 + $0x3a0] ss:$16 sps:$4 sm:$0xff]  }
  0x3c   : > { %841 = vmatprep.subr.bf16.mxu1 %v4146_v23  ;;  %761 = vmatprep.subr.bf16.mxu0 %v4148_v25  ;;  %v4839_v54 = vld [vmem:[%s4823_s4 + $0x4] ss:$12 sps:$4 sm:$0xff]   ;;  %v4194_v59 = vld [vmem:[#allocation2 + $0x3ec] ss:$16 sps:$4 sm:$0xff]   ;;  %v4192_v1 = vld [vmem:[#allocation2 + $0x3e8] ss:$16 sps:$4 sm:$0xff]  }
  0x3d   : > { %v372_v56 = vshrl.u32 %v4839_v54, 16  ;;  %v374_v57 = vshll.u32 %v4839_v54, 16  ;;  %v4196_v60 = vld [vmem:[#allocation2 + $0x384] ss:$16 sps:$4 sm:$0xff]   ;;  %v4846_v62 = vld [vmem:[%s4823_s4] ss:$12 sps:$4 sm:$0xff]  }
  0x3e   : > { %v4201_v2 = vld [vmem:[#allocation2 + $0x380] ss:$16 sps:$4 sm:$0xff]   ;;  %v4200_v3 = vld [vmem:[#allocation2 + $0x3cc] ss:$16 sps:$4 sm:$0xff]   ;;  %v4202_v4 = vld [vmem:[#allocation2 + $0x364] ss:$16 sps:$4 sm:$0xff]  }
  0x3f   : > { %842 = vmatpush1.bf16.msra.mxu1 %v4144_v26  ;;  %762 = vmatpush1.bf16.msra.mxu0 %v4153_v28  ;;  %v376_v61 = vrot.slane %v374_v57, 1  ;;  %v367_v5 = vshll.u32 %v4846_v62, 16  ;;  %v4198_v6 = vld [vmem:[#allocation2 + $0x3c8] ss:$16 sps:$4 sm:$0xff]   ;;  %v4207_v7 = vld [vmem:[#allocation2 + $0x360] ss:$16 sps:$4 sm:$0xff]  }
  0x40   : > { %843 = vmatprep.subr.bf16.mxu1 %v4152_v27  ;;  %763 = vmatprep.subr.bf16.mxu0 %v4154_v29  ;;  %v4206_v8 = vld [vmem:[#allocation2 + $0x3ac] ss:$16 sps:$4 sm:$0xff]   ;;  %v4208_v9 = vld [vmem:[#allocation2 + $0x344] ss:$16 sps:$4 sm:$0xff]   ;;  %v365_v11 = vshrl.u32 %v4846_v62, 16  ;;  %vm3458_vm4 = vcmask 1041408  }
  0x41   : > { %v377_v63 = vor.u32 %v376_v61, %v372_v56  ;;  %v369_v12 = vrot.slane %v367_v5, 1  ;;  %v4204_v15 = vld [vmem:[#allocation2 + $0x3a8] ss:$16 sps:$4 sm:$0xff]   ;;  %v4213_v16 = vld [vmem:[#allocation2 + $0x340] ss:$16 sps:$4 sm:$0xff]   ;;  %vm3463_vm5 = vcmask 1042432  }
  0x42   : > { %v4212_v17 = vld [vmem:[#allocation2 + $0x38c] ss:$16 sps:$4 sm:$0xff]   ;;  %v4210_v21 = vld [vmem:[#allocation2 + $0x388] ss:$16 sps:$4 sm:$0xff]   ;;  %v4231_v28 = vld [vmem:[#allocation2 + $0xe4] ss:$16 sps:$4 sm:$0xff]  }
  0x43   : > { %844 = vmatpush1.bf16.msra.mxu1 %v4150_v30  ;;  %764 = vmatpush1.bf16.msra.mxu0 %v4159_v32  ;;  %v4222_v18 = vld [vmem:[#allocation2 + $0x46c] ss:$16 sps:$4 sm:$0xff]   ;;  %v370_v19 = vor.u32 %v369_v12, %v365_v11  ;;  %v4220_v22 = vld [vmem:[#allocation2 + $0x468] ss:$16 sps:$4 sm:$0xff]   ;;  %v4229_v30 = vld [vmem:[#allocation2 + $0xe0] ss:$16 sps:$4 sm:$0xff]  }
  0x44   : > { %845 = vmatprep.subr.bf16.mxu1 %v4158_v31  ;;  %765 = vmatprep.subr.bf16.mxu0 %v4160_v33  ;;  %v4219_v23 = vld [vmem:[#allocation2 + $0x36c] ss:$16 sps:$4 sm:$0xff]   ;;  %v4217_v25 = vld [vmem:[#allocation2 + $0x368] ss:$16 sps:$4 sm:$0xff]   ;;  %v4234_v31 = vld [vmem:[#allocation2 + $0x224] ss:$16 sps:$4 sm:$0xff]  }
  0x45   : > { %783 = vmatprep.mubr.bf16.mxu0 %v377_v63  ;;  %869 = vmatprep.mubr.bf16.mxu1 %v377_v63  ;;  %v4228_v24 = vld [vmem:[#allocation2 + $0x44c] ss:$16 sps:$4 sm:$0xff]   ;;  %v4226_v26 = vld [vmem:[#allocation2 + $0x448] ss:$16 sps:$4 sm:$0xff]   ;;  %v4237_v32 = vld [vmem:[#allocation2 + $0xc4] ss:$16 sps:$4 sm:$0xff]  }
  0x46   : > { %v4225_v27 = vld [vmem:[#allocation2 + $0x34c] ss:$16 sps:$4 sm:$0xff]   ;;  %v4223_v29 = vld [vmem:[#allocation2 + $0x348] ss:$16 sps:$4 sm:$0xff]   ;;  %v4232_v33 = vld [vmem:[#allocation2 + $0x220] ss:$16 sps:$4 sm:$0xff]  }
  0x47   : > { %846 = vmatpush1.bf16.msra.mxu1 %v4156_v34  ;;  %766 = vmatpush1.bf16.msra.mxu0 %v4165_v36  ;;  %v4235_v34 = vld [vmem:[#allocation2 + $0xc0] ss:$16 sps:$4 sm:$0xff]   ;;  %v4243_v36 = vld [vmem:[#allocation2 + $0xa4] ss:$16 sps:$4 sm:$0xff]   ;;  %v4276_v61 = vld [vmem:[#allocation2 + $0x4c] ss:$16 sps:$4 sm:$0xff]  }
  0x48   : > { %847 = vmatprep.subr.bf16.mxu1 %v4164_v35  ;;  %767 = vmatprep.subr.bf16.mxu0 %v4166_v37  ;;  %v4240_v35 = vld [vmem:[#allocation2 + $0x204] ss:$16 sps:$4 sm:$0xff]   ;;  %v4238_v37 = vld [vmem:[#allocation2 + $0x200] ss:$16 sps:$4 sm:$0xff]   ;;  %v4286_v12 = vld [vmem:[#allocation2 + $0x8] ss:$16 sps:$4 sm:$0xff]  }
  0x49   : > { %v4279_v63 = vld [vmem:[#allocation2 + $0x1e4] ss:$16 sps:$4 sm:$0xff]   ;;  %vm2161_vm1 = vsmask.f32 6400  ;;  %vm3468_vm6 = vcmask 1043456   ;;  %vm3473_vm7 = vcmask 1044480  }
  0x4a   : > { %s4740_s5 = smov 96   ;;  %s4741_s6 = smov 32   ;;  %vm3582_vm8 = vsmask.f32 3328  ;;  %vm3584_vm9 = vcmask 785412   ;;  %vm3567_vm11 = vcmask 523264  }
  0x4b   : > { %848 = vmatpush1.bf16.msra.mxu1 %v4162_v38  ;;  %768 = vmatpush2.bf16.msra.mxu0 %v4171_v40  ;;  %v4241_v38 = vld [vmem:[#allocation2 + $0xa0] ss:$16 sps:$4 sm:$0xff]   ;;  %v4244_v40 = vld [vmem:[#allocation2 + $0xe8] ss:$16 sps:$4 sm:$0xff]   ;;  %s4742_s7 = smov 64   ;;  %s4059_s8 = sshll.u32 %s5133_s13, 3  ;;  %vm5084_vm12 = vmand %vm3468_vm6, %vm3582_vm8 }
  0x4c   : > { %849 = vmatprep.subr.bf16.mxu1 %v4170_v39  ;;  %769 = vmatprep.subr.bf16.mxu0 %v4172_v41  ;;  %v4246_v39 = vld [vmem:[#allocation2 + $0xec] ss:$16 sps:$4 sm:$0xff]   ;;  %v4247_v41 = vld [vmem:[#allocation2 + $0x80] ss:$16 sps:$4 sm:$0xff]   ;;  %vm3585_vm10 = vsmask.f32 7424  ;;  %s198_s11 = scalar_lea.vmem %s5101_s3, %s4059_s8 }
  0x4d   : > { %vm3569_vm13 = vcmask 785408   ;;  %vm3586_vm14 = vmand %vm3584_vm9, %vm3585_vm10 }
  0x4e   : > { %vm3587_vm15 = vmor %vm3586_vm14, %vm5084_vm12 }
  0x4f   : > { %850 = vmatpush1.bf16.msra.mxu1 %v4168_v42  ;;  %770 = vmatpush2.bf16.msra.mxu0 %v4177_v44  ;;  %v4252_v42 = vld [vmem:[#allocation2 + $0xcc] ss:$16 sps:$4 sm:$0xff]   ;;  %v4250_v44 = vld [vmem:[#allocation2 + $0xc8] ss:$16 sps:$4 sm:$0xff]  }
  0x50   : > { %851 = vmatprep.subr.bf16.mxu1 %v4176_v43  ;;  %771 = vmatprep.subr.bf16.mxu0 %v4178_v45  ;;  %v4255_v43 = vld [vmem:[#allocation2 + $0x64] ss:$16 sps:$4 sm:$0xff]   ;;  %v4253_v45 = vld [vmem:[#allocation2 + $0x60] ss:$16 sps:$4 sm:$0xff]  }
  0x53   : > { %852 = vmatpush1.bf16.msra.mxu1 %v4174_v46  ;;  %772 = vmatpush2.bf16.msra.mxu0 %v4183_v48  ;;  %v4258_v46 = vld [vmem:[#allocation2 + $0xac] ss:$16 sps:$4 sm:$0xff]   ;;  %v4256_v48 = vld [vmem:[#allocation2 + $0xa8] ss:$16 sps:$4 sm:$0xff]  }
  0x54   : > { %853 = vmatprep.subr.bf16.mxu1 %v4182_v47  ;;  %773 = vmatprep.subr.bf16.mxu0 %v4184_v49  ;;  %v4261_v47 = vld [vmem:[#allocation2 + $0x44] ss:$16 sps:$4 sm:$0xff]   ;;  %v4259_v49 = vld [vmem:[#allocation2 + $0x40] ss:$16 sps:$4 sm:$0xff]  }
  0x57   : > { %854 = vmatpush2.bf16.msra.mxu1 %v4180_v50  ;;  %774 = vmatpush2.bf16.msra.mxu0 %v4189_v52  ;;  %v4264_v50 = vld [vmem:[#allocation2 + $0x8c] ss:$16 sps:$4 sm:$0xff]   ;;  %v4262_v52 = vld [vmem:[#allocation2 + $0x88] ss:$16 sps:$4 sm:$0xff]  }
  0x58   : > { %855 = vmatprep.subr.bf16.mxu1 %v4188_v51  ;;  %775 = vmatprep.subr.bf16.mxu0 %v4190_v53  ;;  %v4267_v51 = vld [vmem:[#allocation2 + $0x24] ss:$16 sps:$4 sm:$0xff]   ;;  %v4265_v53 = vld [vmem:[#allocation2 + $0x20] ss:$16 sps:$4 sm:$0xff]  }
  0x5b   : > { %856 = vmatpush2.bf16.msra.mxu1 %v4186_v55  ;;  %776 = vmatpush2.bf16.msra.mxu0 %v4195_v58  ;;  %v4270_v55 = vld [vmem:[#allocation2 + $0x6c] ss:$16 sps:$4 sm:$0xff]   ;;  %v4273_v58 = vld [vmem:[#allocation2 + $0x4] ss:$16 sps:$4 sm:$0xff]  }
  0x5c   : > { %857 = vmatprep.subr.bf16.mxu1 %v4194_v59  ;;  %777 = vmatprep.subr.bf16.mxu0 %v4196_v60  ;;  %v4268_v59 = vld [vmem:[#allocation2 + $0x68] ss:$16 sps:$4 sm:$0xff]   ;;  %v4271_v60 = vld [vmem:[#allocation2] ss:$16 sps:$4 sm:$0xff]  }
  0x5f   : > { %858 = vmatpush2.bf16.msra.mxu1 %v4192_v1  ;;  %778 = vmatpush2.bf16.msra.mxu0 %v4201_v2  ;;  %v4274_v1 = vld [vmem:[#allocation2 + $0x48] ss:$16 sps:$4 sm:$0xff]   ;;  %v4277_v2 = vld [vmem:[#allocation2 + $0x1e0] ss:$16 sps:$4 sm:$0xff]  }
  0x60   : > { %859 = vmatprep.subr.bf16.mxu1 %v4200_v3  ;;  %779 = vmatprep.subr.bf16.mxu0 %v4202_v4  ;;  %v4282_v3 = vld [vmem:[#allocation2 + $0x2c] ss:$16 sps:$4 sm:$0xff]   ;;  %v4285_v4 = vld [vmem:[#allocation2 + $0x1c4] ss:$16 sps:$4 sm:$0xff]  }
  0x63   : > { %860 = vmatpush2.bf16.msra.mxu1 %v4198_v6  ;;  %780 = vmatpush2.bf16.msra.mxu0 %v4207_v7  ;;  %v4280_v6 = vld [vmem:[#allocation2 + $0x28] ss:$16 sps:$4 sm:$0xff]   ;;  %v4283_v7 = vld [vmem:[#allocation2 + $0x1c0] ss:$16 sps:$4 sm:$0xff]  }
  0x64   : > { %861 = vmatprep.subr.bf16.mxu1 %v4206_v8  ;;  %781 = vmatprep.subr.bf16.mxu0 %v4208_v9  ;;  %v4288_v8 = vld [vmem:[#allocation2 + $0xc] ss:$16 sps:$4 sm:$0xff]   ;;  %v4291_v9 = vld [vmem:[#allocation2 + $0x1a4] ss:$16 sps:$4 sm:$0xff]  }
  0x67   : > { %862 = vmatpush2.bf16.msra.mxu1 %v4204_v15  ;;  %782 = vmatpush2.bf16.msra.mxu0 %v4213_v16  ;;  %v4289_v15 = vld [vmem:[#allocation2 + $0x1a0] ss:$16 sps:$4 sm:$0xff]   ;;  %v4294_v16 = vld [vmem:[#allocation2 + $0x1ec] ss:$16 sps:$4 sm:$0xff]  }
  0x68   : > { %863 = vmatprep.subr.bf16.mxu1 %v4212_v17  ;;  %892 = vmatprep.subr.bf16.mxu0 %v4222_v18  ;;  %v4297_v17 = vld [vmem:[#allocation2 + $0x184] ss:$16 sps:$4 sm:$0xff]   ;;  %v4292_v18 = vld [vmem:[#allocation2 + $0x1e8] ss:$16 sps:$4 sm:$0xff]  }
  0x6a   : > { %784 = vmatmul.mubr.bf16.vlgmr.msra.gmra.mxu0 %v370_v19 }
  0x6b   : > { %864 = vmatpush2.bf16.msra.mxu1 %v4210_v21  ;;  %893 = vmatpush1.bf16.msra.mxu0 %v4220_v22  ;;  %v4300_v21 = vld [vmem:[#allocation2 + $0x1cc] ss:$16 sps:$4 sm:$0xff]   ;;  %v4303_v22 = vld [vmem:[#allocation2 + $0x164] ss:$16 sps:$4 sm:$0xff]  }
  0x6c   : > { %865 = vmatprep.subr.bf16.mxu1 %v4219_v23  ;;  %894 = vmatprep.subr.bf16.mxu0 %v4228_v24  ;;  %v4298_v23 = vld [vmem:[#allocation2 + $0x1c8] ss:$16 sps:$4 sm:$0xff]   ;;  %v4301_v24 = vld [vmem:[#allocation2 + $0x160] ss:$16 sps:$4 sm:$0xff]  }
  0x6d   : > { %912 = vmatprep.mubr.bf16.mxu0 %v4739_v0 }
  0x6f   : > { %866 = vmatpush2.bf16.msra.mxu1 %v4217_v25  ;;  %895 = vmatpush1.bf16.msra.mxu0 %v4226_v26  ;;  %v4306_v25 = vld [vmem:[#allocation2 + $0x1ac] ss:$16 sps:$4 sm:$0xff]   ;;  %v4309_v26 = vld [vmem:[#allocation2 + $0x144] ss:$16 sps:$4 sm:$0xff]  }
  0x70   : > { %867 = vmatprep.subr.bf16.mxu1 %v4225_v27  ;;  %1287 = vmatprep.subr.bf16.mxu0 %v4231_v28  ;;  %v4304_v27 = vld [vmem:[#allocation2 + $0x1a8] ss:$16 sps:$4 sm:$0xff]   ;;  %v4307_v28 = vld [vmem:[#allocation2 + $0x140] ss:$16 sps:$4 sm:$0xff]  }
  0x72   : > { %3756 = vmatmul.mubr.msk.bf16.vlgmr.msra.gmra.mxu0 %vm747_vm0, %v4834_v20  ;;  %v4249_v20 = vld [vmem:[#allocation2 + $0x84] ss:$16 sps:$4 sm:$0xff]  }
  0x73   : > { %868 = vmatpush2.bf16.msra.mxu1 %v4223_v29  ;;  %1288 = vmatpush1.bf16.msra.mxu0 %v4229_v30  ;;  %v4312_v29 = vld [vmem:[#allocation2 + $0x18c] ss:$16 sps:$4 sm:$0xff]   ;;  %v4315_v30 = vld [vmem:[#allocation2 + $0x124] ss:$16 sps:$4 sm:$0xff]  }
  0x74   : > { %1342 = vmatprep.subr.bf16.mxu1 %v4234_v31  ;;  %1289 = vmatprep.subr.bf16.mxu0 %v4237_v32  ;;  %v4310_v31 = vld [vmem:[#allocation2 + $0x188] ss:$16 sps:$4 sm:$0xff]   ;;  %v4313_v32 = vld [vmem:[#allocation2 + $0x120] ss:$16 sps:$4 sm:$0xff]  }
  0x75   : > { %1319 = vmatprep.mubr.bf16.mxu0 %v4839_v54 }
  0x76   : > { %870 = vmatmul.mubr.bf16.vlgmr.msra.gmra.mxu1 %v370_v19  ;;  %v4295_v19 = vld [vmem:[#allocation2 + $0x180] ss:$16 sps:$4 sm:$0xff]  }
  0x77   : > { %1343 = vmatpush1.bf16.msra.mxu1 %v4232_v33  ;;  %1290 = vmatpush1.bf16.msra.mxu0 %v4235_v34  ;;  %v4318_v33 = vld [vmem:[#allocation2 + $0x16c] ss:$16 sps:$4 sm:$0xff]   ;;  %v4321_v34 = vld [vmem:[#allocation2 + $0x104] ss:$16 sps:$4 sm:$0xff]  }
  0x78   : > { %1344 = vmatprep.subr.bf16.mxu1 %v4240_v35  ;;  %1362 = vmatprep.mubr.bf16.mxu1 %v4739_v0  ;;  %v4316_v35 = vld [vmem:[#allocation2 + $0x168] ss:$16 sps:$4 sm:$0xff]  }
  0x79   : > { %1291 = vmatprep.subr.bf16.mxu0 %v4243_v36  ;;  %v4319_v36 = vld [vmem:[#allocation2 + $0x100] ss:$16 sps:$4 sm:$0xff]  }
  0x7b   : > { %1345 = vmatpush1.bf16.msra.mxu1 %v4238_v37  ;;  %1292 = vmatpush1.bf16.msra.mxu0 %v4241_v38  ;;  %v4324_v37 = vld [vmem:[#allocation2 + $0x14c] ss:$16 sps:$4 sm:$0xff]  }
  0x7c   : > { %1373 = vmatprep.subr.bf16.mxu1 %v4246_v39  ;;  %1293 = vmatprep.subr.bf16.mxu0 %v4249_v20  ;;  %v4330_v38 = vld [vmem:[#allocation2 + $0x22c] ss:$16 sps:$4 sm:$0xff]   ;;  %v4322_v39 = vld [vmem:[#allocation2 + $0x148] ss:$16 sps:$4 sm:$0xff]  }
  0x7d   : > { %v4328_v20 = vld [vmem:[#allocation2 + $0x228] ss:$16 sps:$4 sm:$0xff]  }
  0x7e   : > { %3829 = vmatmul.mubr.msk.bf16.vlgmr.msra.gmra.mxu1 %vm747_vm0, %v4826_v10  ;;  %v4454_v10 = vld [vmem:[#allocation2 + $0x8c0] ss:$16 sps:$4 sm:$0xff]  }
  0x7f   : > { %1374 = vmatpush1.bf16.msra.mxu1 %v4244_v40  ;;  %1294 = vmatpush1.bf16.msra.mxu0 %v4247_v41  ;;  %v4327_v40 = vld [vmem:[#allocation2 + $0x12c] ss:$16 sps:$4 sm:$0xff]  }
  0x80   : > { %1375 = vmatprep.subr.bf16.mxu1 %v4252_v42  ;;  %1295 = vmatprep.subr.bf16.mxu0 %v4255_v43  ;;  %v4336_v41 = vld [vmem:[#allocation2 + $0x20c] ss:$16 sps:$4 sm:$0xff]   ;;  %v4325_v42 = vld [vmem:[#allocation2 + $0x128] ss:$16 sps:$4 sm:$0xff]  }
  0x81   : > { %1405 = vmatprep.mubr.bf16.mxu1 %v4839_v54  ;;  %v4334_v43 = vld [vmem:[#allocation2 + $0x208] ss:$16 sps:$4 sm:$0xff]  }
  0x83   : > { %1376 = vmatpush1.bf16.msra.mxu1 %v4250_v44  ;;  %1296 = vmatpush1.bf16.msra.mxu0 %v4253_v45  ;;  %v4333_v44 = vld [vmem:[#allocation2 + $0x10c] ss:$16 sps:$4 sm:$0xff]   ;;  %v4339_v45 = vld [vmem:[#allocation2 + $0x564] ss:$16 sps:$4 sm:$0xff]  }
  0x84   : > { %1377 = vmatprep.subr.bf16.mxu1 %v4258_v46  ;;  %1297 = vmatprep.subr.bf16.mxu0 %v4261_v47  ;;  %v4331_v46 = vld [vmem:[#allocation2 + $0x108] ss:$16 sps:$4 sm:$0xff]   ;;  %v4337_v47 = vld [vmem:[#allocation2 + $0x560] ss:$16 sps:$4 sm:$0xff]  }
  0x87   : > { %1378 = vmatpush1.bf16.msra.mxu1 %v4256_v48  ;;  %1298 = vmatpush1.bf16.msra.mxu0 %v4259_v49  ;;  %v4342_v48 = vld [vmem:[#allocation2 + $0x6a4] ss:$16 sps:$4 sm:$0xff]  }
  0x88   : > { %1379 = vmatprep.subr.bf16.mxu1 %v4264_v50  ;;  %1299 = vmatprep.subr.bf16.mxu0 %v4267_v51  ;;  %v4345_v49 = vld [vmem:[#allocation2 + $0x544] ss:$16 sps:$4 sm:$0xff]   ;;  %v1533_v50 = vrot.slane %v4839_v54, 1 }
  0x89   : > { %v4868_v51 = vld [vmem:[%s4823_s4 + $0x8] ss:$12 sps:$4 sm:$0xff]  }
  0x8b   : > { %1380 = vmatpush1.bf16.msra.mxu1 %v4262_v52  ;;  %1300 = vmatpush1.bf16.msra.mxu0 %v4265_v53  ;;  %v4340_v52 = vld [vmem:[#allocation2 + $0x6a0] ss:$16 sps:$4 sm:$0xff]  }
  0x8c   : > { %1381 = vmatprep.subr.bf16.mxu1 %v4270_v55  ;;  %1301 = vmatprep.subr.bf16.mxu0 %v4273_v58  ;;  %v4343_v53 = vld [vmem:[#allocation2 + $0x540] ss:$16 sps:$4 sm:$0xff]   ;;  %v4348_v55 = vld [vmem:[#allocation2 + $0x684] ss:$16 sps:$4 sm:$0xff]  }
  0x8d   : > { %v4351_v58 = vld [vmem:[#allocation2 + $0x524] ss:$16 sps:$4 sm:$0xff]  }
  0x8f   : > { %1382 = vmatpush1.bf16.msra.mxu1 %v4268_v59  ;;  %1302 = vmatpush1.bf16.msra.mxu0 %v4271_v60  ;;  %v4874_v59 = vrot.slane %v372_v56, 1  ;;  %v4878_v60 = vrot.slane %v374_v57, 2  ;;  %v4352_v56 = vld [vmem:[#allocation2 + $0x568] ss:$16 sps:$4 sm:$0xff]   ;;  %v4360_v57 = vld [vmem:[#allocation2 + $0x54c] ss:$16 sps:$4 sm:$0xff]  }
  0x90   : > { %1383 = vmatprep.subr.bf16.mxu1 %v4276_v61  ;;  %1303 = vmatprep.subr.bf16.mxu0 %v4279_v63  ;;  %v4346_v61 = vld [vmem:[#allocation2 + $0x680] ss:$16 sps:$4 sm:$0xff]  }
  0x91   : > { %v4349_v63 = vld [vmem:[#allocation2 + $0x520] ss:$16 sps:$4 sm:$0xff]   ;;  %v2172_v54 = vor.u32 %v4878_v60, %v4874_v59  ;;  %v4463_v60 = vld [vmem:[#allocation2 + $0x7ac] ss:$16 sps:$4 sm:$0xff]  }
  0x93   : > { %1384 = vmatpush1.bf16.msra.mxu1 %v4274_v1  ;;  %1304 = vmatpush2.bf16.msra.mxu0 %v4277_v2  ;;  %v4354_v1 = vld [vmem:[#allocation2 + $0x56c] ss:$16 sps:$4 sm:$0xff]   ;;  %v4357_v2 = vld [vmem:[#allocation2 + $0x504] ss:$16 sps:$4 sm:$0xff]  }
  0x94   : > { %1385 = vmatprep.subr.bf16.mxu1 %v4282_v3  ;;  %1305 = vmatprep.subr.bf16.mxu0 %v4285_v4  ;;  %v1534_v3 = vrot.slane %v4868_v51, 1  ;;  %v4355_v4 = vld [vmem:[#allocation2 + $0x500] ss:$16 sps:$4 sm:$0xff]  }
  0x97   : > { %1386 = vmatpush1.bf16.msra.mxu1 %v4280_v6  ;;  %1306 = vmatpush2.bf16.msra.mxu0 %v4283_v7  ;;  %v4363_v6 = vld [vmem:[#allocation2 + $0x4e4] ss:$16 sps:$4 sm:$0xff]   ;;  %v4358_v7 = vld [vmem:[#allocation2 + $0x548] ss:$16 sps:$4 sm:$0xff]  }
  0x98   : > { %1387 = vmatprep.subr.bf16.mxu1 %v4288_v8  ;;  %1307 = vmatprep.subr.bf16.mxu0 %v4291_v9  ;;  %v4361_v8 = vld [vmem:[#allocation2 + $0x4e0] ss:$16 sps:$4 sm:$0xff]   ;;  %v4366_v9 = vld [vmem:[#allocation2 + $0x52c] ss:$16 sps:$4 sm:$0xff]  }
  0x9b   : > { %1388 = vmatpush1.bf16.msra.mxu1 %v4286_v12  ;;  %1308 = vmatpush2.bf16.msra.mxu0 %v4289_v15  ;;  %v4369_v12 = vld [vmem:[#allocation2 + $0x4c4] ss:$16 sps:$4 sm:$0xff]   ;;  %v4364_v15 = vld [vmem:[#allocation2 + $0x528] ss:$16 sps:$4 sm:$0xff]  }
  0x9c   : > { %1389 = vmatprep.subr.bf16.mxu1 %v4294_v16  ;;  %1309 = vmatprep.subr.bf16.mxu0 %v4297_v17  ;;  %v4367_v16 = vld [vmem:[#allocation2 + $0x4c0] ss:$16 sps:$4 sm:$0xff]   ;;  %v4372_v17 = vld [vmem:[#allocation2 + $0x50c] ss:$16 sps:$4 sm:$0xff]  }
  0x9f   : > { %1390 = vmatpush2.bf16.msra.mxu1 %v4292_v18  ;;  %1310 = vmatpush2.bf16.msra.mxu0 %v4295_v19  ;;  %v4375_v18 = vld [vmem:[#allocation2 + $0x4a4] ss:$16 sps:$4 sm:$0xff]   ;;  %v4370_v19 = vld [vmem:[#allocation2 + $0x508] ss:$16 sps:$4 sm:$0xff]  }
  0xa0   : > { %1391 = vmatprep.subr.bf16.mxu1 %v4300_v21  ;;  %1311 = vmatprep.subr.bf16.mxu0 %v4303_v22  ;;  %v4373_v21 = vld [vmem:[#allocation2 + $0x4a0] ss:$16 sps:$4 sm:$0xff]   ;;  %v4378_v22 = vld [vmem:[#allocation2 + $0x4ec] ss:$16 sps:$4 sm:$0xff]  }
  0xa3   : > { %1392 = vmatpush2.bf16.msra.mxu1 %v4298_v23  ;;  %1312 = vmatpush2.bf16.msra.mxu0 %v4301_v24  ;;  %v4381_v23 = vld [vmem:[#allocation2 + $0x484] ss:$16 sps:$4 sm:$0xff]   ;;  %v4376_v24 = vld [vmem:[#allocation2 + $0x4e8] ss:$16 sps:$4 sm:$0xff]  }
  0xa4   : > { %1393 = vmatprep.subr.bf16.mxu1 %v4306_v25  ;;  %1313 = vmatprep.subr.bf16.mxu0 %v4309_v26  ;;  %v4379_v25 = vld [vmem:[#allocation2 + $0x480] ss:$16 sps:$4 sm:$0xff]   ;;  %v4384_v26 = vld [vmem:[#allocation2 + $0x4cc] ss:$16 sps:$4 sm:$0xff]  }
  0xa7   : > { %1394 = vmatpush2.bf16.msra.mxu1 %v4304_v27  ;;  %1314 = vmatpush2.bf16.msra.mxu0 %v4307_v28  ;;  %v4387_v27 = vld [vmem:[#allocation2 + $0x664] ss:$16 sps:$4 sm:$0xff]   ;;  %v4382_v28 = vld [vmem:[#allocation2 + $0x4c8] ss:$16 sps:$4 sm:$0xff]  }
  0xa8   : > { %1395 = vmatprep.subr.bf16.mxu1 %v4312_v29  ;;  %1315 = vmatprep.subr.bf16.mxu0 %v4315_v30  ;;  %v4385_v29 = vld [vmem:[#allocation2 + $0x660] ss:$16 sps:$4 sm:$0xff]   ;;  %v4390_v30 = vld [vmem:[#allocation2 + $0x4ac] ss:$16 sps:$4 sm:$0xff]  }
  0xab   : > { %1396 = vmatpush2.bf16.msra.mxu1 %v4310_v31  ;;  %1316 = vmatpush2.bf16.msra.mxu0 %v4313_v32  ;;  %v4393_v31 = vld [vmem:[#allocation2 + $0x644] ss:$16 sps:$4 sm:$0xff]   ;;  %v4388_v32 = vld [vmem:[#allocation2 + $0x4a8] ss:$16 sps:$4 sm:$0xff]  }
  0xac   : > { %1397 = vmatprep.subr.bf16.mxu1 %v4318_v33  ;;  %1317 = vmatprep.subr.bf16.mxu0 %v4321_v34  ;;  %v4391_v33 = vld [vmem:[#allocation2 + $0x640] ss:$16 sps:$4 sm:$0xff]   ;;  %v4396_v34 = vld [vmem:[#allocation2 + $0x48c] ss:$16 sps:$4 sm:$0xff]  }
  0xaf   : > { %1398 = vmatpush2.bf16.msra.mxu1 %v4316_v35  ;;  %1318 = vmatpush2.bf16.msra.mxu0 %v4319_v36  ;;  %v4399_v35 = vld [vmem:[#allocation2 + $0x624] ss:$16 sps:$4 sm:$0xff]   ;;  %v4394_v36 = vld [vmem:[#allocation2 + $0x488] ss:$16 sps:$4 sm:$0xff]  }
  0xb0   : > { %1399 = vmatprep.subr.bf16.mxu1 %v4324_v37  ;;  %1428 = vmatprep.subr.bf16.mxu0 %v4330_v38  ;;  %v4397_v37 = vld [vmem:[#allocation2 + $0x620] ss:$16 sps:$4 sm:$0xff]   ;;  %v4402_v38 = vld [vmem:[#allocation2 + $0x66c] ss:$16 sps:$4 sm:$0xff]  }
  0xb2   : > { %1320 = vmatmul.mubr.bf16.vlgmr.msra.gmra.mxu0 %v4846_v62 }
  0xb3   : > { %1400 = vmatpush2.bf16.msra.mxu1 %v4322_v39  ;;  %1429 = vmatpush1.bf16.msra.mxu0 %v4328_v20  ;;  %v4405_v39 = vld [vmem:[#allocation2 + $0x604] ss:$16 sps:$4 sm:$0xff]   ;;  %v4400_v20 = vld [vmem:[#allocation2 + $0x668] ss:$16 sps:$4 sm:$0xff]  }
  0xb4   : > { %1401 = vmatprep.subr.bf16.mxu1 %v4327_v40  ;;  %1430 = vmatprep.subr.bf16.mxu0 %v4336_v41  ;;  %v4403_v40 = vld [vmem:[#allocation2 + $0x600] ss:$16 sps:$4 sm:$0xff]   ;;  %v4408_v41 = vld [vmem:[#allocation2 + $0x64c] ss:$16 sps:$4 sm:$0xff]  }
  0xb5   : > { %1448 = vmatprep.mubr.bf16.mxu0 %v4739_v0 }
  0xb7   : > { %1402 = vmatpush2.bf16.msra.mxu1 %v4325_v42  ;;  %1431 = vmatpush1.bf16.msra.mxu0 %v4334_v43  ;;  %v4411_v42 = vld [vmem:[#allocation2 + $0x5e4] ss:$16 sps:$4 sm:$0xff]   ;;  %v4406_v43 = vld [vmem:[#allocation2 + $0x648] ss:$16 sps:$4 sm:$0xff]  }
  0xb8   : > { %1403 = vmatprep.subr.bf16.mxu1 %v4333_v44  ;;  %1900 = vmatprep.subr.bf16.mxu0 %v4339_v45  ;;  %v4409_v44 = vld [vmem:[#allocation2 + $0x5e0] ss:$16 sps:$4 sm:$0xff]   ;;  %v4414_v45 = vld [vmem:[#allocation2 + $0x62c] ss:$16 sps:$4 sm:$0xff]  }
  0xba   : > { %3830 = vmatmul.mubr.msk.bf16.vlgmr.msra.gmra.mxu0 %vm747_vm0, %v4868_v51 }
  0xbb   : > { %1404 = vmatpush2.bf16.msra.mxu1 %v4331_v46  ;;  %1901 = vmatpush1.bf16.msra.mxu0 %v4337_v47  ;;  %v4417_v46 = vld [vmem:[#allocation2 + $0x5c4] ss:$16 sps:$4 sm:$0xff]   ;;  %v4412_v47 = vld [vmem:[#allocation2 + $0x628] ss:$16 sps:$4 sm:$0xff]  }
  0xbc   : > { %1955 = vmatprep.subr.bf16.mxu1 %v4342_v48  ;;  %1902 = vmatprep.subr.bf16.mxu0 %v4345_v49  ;;  %v4415_v48 = vld [vmem:[#allocation2 + $0x5c0] ss:$16 sps:$4 sm:$0xff]   ;;  %v4420_v49 = vld [vmem:[#allocation2 + $0x60c] ss:$16 sps:$4 sm:$0xff]  }
  0xbd   : > { %1932 = vmatprep.mubr.bf16.mxu0 %v1533_v50 }
  0xbe   : > { %1406 = vmatmul.mubr.bf16.vlgmr.msra.gmra.mxu1 %v4846_v62 }
  0xbf   : > { %1956 = vmatpush1.bf16.msra.mxu1 %v4340_v52  ;;  %1903 = vmatpush1.bf16.msra.mxu0 %v4343_v53  ;;  %v4418_v52 = vld [vmem:[#allocation2 + $0x608] ss:$16 sps:$4 sm:$0xff]   ;;  %v4421_v53 = vld [vmem:[#allocation2 + $0x5a0] ss:$16 sps:$4 sm:$0xff]  }
  0xc0   : > { %1957 = vmatprep.subr.bf16.mxu1 %v4348_v55  ;;  %1975 = vmatprep.mubr.bf16.mxu1 %v4739_v0  ;;  %v4426_v55 = vld [vmem:[#allocation2 + $0x5ec] ss:$16 sps:$4 sm:$0xff]  }
  0xc1   : > { %1904 = vmatprep.subr.bf16.mxu0 %v4351_v58  ;;  %v4429_v58 = vld [vmem:[#allocation2 + $0x584] ss:$16 sps:$4 sm:$0xff]  }
  0xc3   : > { %1958 = vmatpush1.bf16.msra.mxu1 %v4346_v61  ;;  %1905 = vmatpush1.bf16.msra.mxu0 %v4349_v63  ;;  %v4424_v61 = vld [vmem:[#allocation2 + $0x5e8] ss:$16 sps:$4 sm:$0xff]   ;;  %v4427_v63 = vld [vmem:[#allocation2 + $0x580] ss:$16 sps:$4 sm:$0xff]  }
  0xc4   : > { %1986 = vmatprep.subr.bf16.mxu1 %v4354_v1  ;;  %1906 = vmatprep.subr.bf16.mxu0 %v4357_v2  ;;  %v4889_v1 = vld [vmem:[%s4823_s4 + $0x18] sm:$0x11] }
  0xc5   : > { %v4432_v2 = vld [vmem:[#allocation2 + $0x5cc] ss:$16 sps:$4 sm:$0xff]  }
  0xc6   : > { %3903 = vmatmul.mubr.msk.bf16.vlgmr.msra.gmra.mxu1 %vm747_vm0, %v1534_v3 }
  0xc7   : > { %1987 = vmatpush1.bf16.msra.mxu1 %v4352_v56  ;;  %1907 = vmatpush1.bf16.msra.mxu0 %v4355_v4  ;;  %v4438_v56 = vld [vmem:[#allocation2 + $0x6ac] ss:$16 sps:$4 sm:$0xff]  }
  0xc8   : > { %1988 = vmatprep.subr.bf16.mxu1 %v4360_v57  ;;  %1908 = vmatprep.subr.bf16.mxu0 %v4363_v6  ;;  %v4892_v4 = vld [vmem:[%s4823_s4] ss:$12 sps:$4 sm:$0xff]   ;;  %v4897_v6 = vcombine.high %v4889_v1, %v4889_v1 }
  0xc9   : > { %2018 = vmatprep.mubr.bf16.mxu1 %v1533_v50  ;;  %v4423_v50 = vld [vmem:[#allocation2 + $0x5a4] ss:$16 sps:$4 sm:$0xff]   ;;  %v1532_v57 = vrot.slane %v4892_v4, 1 }
  0xcb   : > { %1989 = vmatpush1.bf16.msra.mxu1 %v4358_v7  ;;  %1909 = vmatpush1.bf16.msra.mxu0 %v4361_v8  ;;  %v4430_v7 = vld [vmem:[#allocation2 + $0x5c8] ss:$16 sps:$4 sm:$0xff]  }
  0xcc   : > { %1990 = vmatprep.subr.bf16.mxu1 %v4366_v9  ;;  %1910 = vmatprep.subr.bf16.mxu0 %v4369_v12  ;;  %v4436_v8 = vld [vmem:[#allocation2 + $0x6a8] ss:$16 sps:$4 sm:$0xff]   ;;  %v4435_v9 = vld [vmem:[#allocation2 + $0x5ac] ss:$16 sps:$4 sm:$0xff]  }
  0xcd   : > { %v4444_v12 = vld [vmem:[#allocation2 + $0x68c] ss:$16 sps:$4 sm:$0xff]  }
  0xcf   : > { %1991 = vmatpush1.bf16.msra.mxu1 %v4364_v15  ;;  %1911 = vmatpush1.bf16.msra.mxu0 %v4367_v16  ;;  %v2174_v15 = vshll.u32 %v4897_v6, 16  ;;  %v4433_v16 = vld [vmem:[#allocation2 + $0x5a8] ss:$16 sps:$4 sm:$0xff]  }
  0xd0   : > { %1992 = vmatprep.subr.bf16.mxu1 %v4372_v17  ;;  %1912 = vmatprep.subr.bf16.mxu0 %v4375_v18  ;;  %v4442_v17 = vld [vmem:[#allocation2 + $0x688] ss:$16 sps:$4 sm:$0xff]   ;;  %v4441_v18 = vld [vmem:[#allocation2 + $0x58c] ss:$16 sps:$4 sm:$0xff]  }
  0xd3   : > { %1993 = vmatpush1.bf16.msra.mxu1 %v4370_v19  ;;  %1913 = vmatpush1.bf16.msra.mxu0 %v4373_v21  ;;  %v4447_v19 = vld [vmem:[#allocation2 + $0x7a4] ss:$16 sps:$4 sm:$0xff]   ;;  %v4439_v21 = vld [vmem:[#allocation2 + $0x588] ss:$16 sps:$4 sm:$0xff]  }
  0xd4   : > { %1994 = vmatprep.subr.bf16.mxu1 %v4378_v22  ;;  %1914 = vmatprep.subr.bf16.mxu0 %v4381_v23  ;;  %v2176_v22 = vrot.slane %v2174_v15, 2  ;;  %v4445_v23 = vld [vmem:[#allocation2 + $0x7a0] ss:$16 sps:$4 sm:$0xff]   ;;  %v4511_v15 = vld [vmem:[#allocation2 + $0x8ac] ss:$16 sps:$4 sm:$0xff]  }
  0xd7   : > { %1995 = vmatpush1.bf16.msra.mxu1 %v4376_v24  ;;  %1915 = vmatpush1.bf16.msra.mxu0 %v4379_v25  ;;  %v4902_v24 = vld [vmem:[%s4823_s4 + $0x20] ss:$0 sps:$4 sm:$0x11]   ;;  %v4450_v25 = vld [vmem:[#allocation2 + $0x8e4] ss:$16 sps:$4 sm:$0xff]  }
  0xd8   : > { %1996 = vmatprep.subr.bf16.mxu1 %v4384_v26  ;;  %1916 = vmatprep.subr.bf16.mxu0 %v4387_v27  ;;  %v4453_v26 = vld [vmem:[#allocation2 + $0x784] ss:$16 sps:$4 sm:$0xff]   ;;  %v2178_v27 = vrot.slane %v379_v13, 1 }
  0xd9   : > { %v4456_v13 = vld [vmem:[#allocation2 + $0x8c4] ss:$16 sps:$4 sm:$0xff]  }
  0xdb   : > { %1997 = vmatpush1.bf16.msra.mxu1 %v4382_v28  ;;  %1917 = vmatpush2.bf16.msra.mxu0 %v4385_v29  ;;  %v2179_v28 = vrot.slane %v381_v14, 2  ;;  %v2177_v29 = vsel %vm2161_vm1, %v2172_v54, %v2176_v22  ;;  %v4457_v14 = vld [vmem:[#allocation2 + $0x760] ss:$16 sps:$4 sm:$0xff]   ;;  %v4466_v54 = vld [vmem:[#allocation2 + $0x744] ss:$16 sps:$4 sm:$0xff]  }
  0xdc   : > { %1998 = vmatprep.subr.bf16.mxu1 %v4390_v30  ;;  %1918 = vmatprep.subr.bf16.mxu0 %v4393_v31  ;;  %v4448_v30 = vld [vmem:[#allocation2 + $0x8e0] ss:$16 sps:$4 sm:$0xff]   ;;  %v4515_v22 = vld [vmem:[#allocation2 + $0x888] ss:$16 sps:$4 sm:$0xff]  }
  0xdd   : > { %v4451_v31 = vld [vmem:[#allocation2 + $0x780] ss:$16 sps:$4 sm:$0xff]  }
  0xdf   : > { %1999 = vmatpush1.bf16.msra.mxu1 %v4388_v32  ;;  %1919 = vmatpush2.bf16.msra.mxu0 %v4391_v33  ;;  %v2182_v32 = vshll.u32 %v4902_v24, 16  ;;  %v4459_v33 = vld [vmem:[#allocation2 + $0x764] ss:$16 sps:$4 sm:$0xff]  }
  0xe0   : > { %2000 = vmatprep.subr.bf16.mxu1 %v4396_v34  ;;  %1920 = vmatprep.subr.bf16.mxu0 %v4399_v35  ;;  %v4461_v35 = vld [vmem:[#allocation2 + $0x7a8] ss:$16 sps:$4 sm:$0xff]  }
  0xe1   : > { %v2184_v59 = vrot.slane %v2182_v32, 2  ;;  %v2162_v32 = vrot.slane %v365_v11, 1  ;;  %v4541_v11 = vld [vmem:[#allocation2 + $0x80c] ss:$16 sps:$4 sm:$0xff]  }
  0xe3   : > { %2001 = vmatpush1.bf16.msra.mxu1 %v4394_v36  ;;  %1921 = vmatpush2.bf16.msra.mxu0 %v4397_v37  ;;  %v4464_v36 = vld [vmem:[#allocation2 + $0x740] ss:$16 sps:$4 sm:$0xff]   ;;  %v4469_v37 = vld [vmem:[#allocation2 + $0x78c] ss:$16 sps:$4 sm:$0xff]  }
  0xe4   : > { %2002 = vmatprep.subr.bf16.mxu1 %v4402_v38  ;;  %1922 = vmatprep.subr.bf16.mxu0 %v4405_v39  ;;  %v4472_v38 = vld [vmem:[#allocation2 + $0x724] ss:$16 sps:$4 sm:$0xff]   ;;  %v4467_v39 = vld [vmem:[#allocation2 + $0x788] ss:$16 sps:$4 sm:$0xff]  }
  0xe7   : > { %2003 = vmatpush2.bf16.msra.mxu1 %v4400_v20  ;;  %1923 = vmatpush2.bf16.msra.mxu0 %v4403_v40  ;;  %v4470_v20 = vld [vmem:[#allocation2 + $0x720] ss:$16 sps:$4 sm:$0xff]   ;;  %v4475_v40 = vld [vmem:[#allocation2 + $0x76c] ss:$16 sps:$4 sm:$0xff]  }
  0xe8   : > { %2004 = vmatprep.subr.bf16.mxu1 %v4408_v41  ;;  %1924 = vmatprep.subr.bf16.mxu0 %v4411_v42  ;;  %v4478_v41 = vld [vmem:[#allocation2 + $0x704] ss:$16 sps:$4 sm:$0xff]   ;;  %v4473_v42 = vld [vmem:[#allocation2 + $0x768] ss:$16 sps:$4 sm:$0xff]  }
  0xeb   : > { %2005 = vmatpush2.bf16.msra.mxu1 %v4406_v43  ;;  %1925 = vmatpush2.bf16.msra.mxu0 %v4409_v44  ;;  %v4476_v43 = vld [vmem:[#allocation2 + $0x700] ss:$16 sps:$4 sm:$0xff]   ;;  %v4481_v44 = vld [vmem:[#allocation2 + $0x74c] ss:$16 sps:$4 sm:$0xff]  }
  0xec   : > { %2006 = vmatprep.subr.bf16.mxu1 %v4414_v45  ;;  %1926 = vmatprep.subr.bf16.mxu0 %v4417_v46  ;;  %v4484_v45 = vld [vmem:[#allocation2 + $0x6e4] ss:$16 sps:$4 sm:$0xff]   ;;  %v4479_v46 = vld [vmem:[#allocation2 + $0x748] ss:$16 sps:$4 sm:$0xff]  }
  0xef   : > { %2007 = vmatpush2.bf16.msra.mxu1 %v4412_v47  ;;  %1927 = vmatpush2.bf16.msra.mxu0 %v4415_v48  ;;  %v4482_v47 = vld [vmem:[#allocation2 + $0x6e0] ss:$16 sps:$4 sm:$0xff]   ;;  %v4487_v48 = vld [vmem:[#allocation2 + $0x72c] ss:$16 sps:$4 sm:$0xff]  }
  0xf0   : > { %2008 = vmatprep.subr.bf16.mxu1 %v4420_v49  ;;  %1928 = vmatprep.subr.bf16.mxu0 %v4423_v50  ;;  %v4490_v49 = vld [vmem:[#allocation2 + $0x6c4] ss:$16 sps:$4 sm:$0xff]   ;;  %v4485_v50 = vld [vmem:[#allocation2 + $0x728] ss:$16 sps:$4 sm:$0xff]  }
  0xf3   : > { %2009 = vmatpush2.bf16.msra.mxu1 %v4418_v52  ;;  %1929 = vmatpush2.bf16.msra.mxu0 %v4421_v53  ;;  %v4488_v52 = vld [vmem:[#allocation2 + $0x6c0] ss:$16 sps:$4 sm:$0xff]   ;;  %v4493_v53 = vld [vmem:[#allocation2 + $0x70c] ss:$16 sps:$4 sm:$0xff]  }
  0xf4   : > { %2010 = vmatprep.subr.bf16.mxu1 %v4426_v55  ;;  %1930 = vmatprep.subr.bf16.mxu0 %v4429_v58  ;;  %v4496_v55 = vld [vmem:[#allocation2 + $0x8a4] ss:$16 sps:$4 sm:$0xff]   ;;  %v4491_v58 = vld [vmem:[#allocation2 + $0x708] ss:$16 sps:$4 sm:$0xff]  }
  0xf7   : > { %2011 = vmatpush2.bf16.msra.mxu1 %v4424_v61  ;;  %1931 = vmatpush2.bf16.msra.mxu0 %v4427_v63  ;;  %v4494_v61 = vld [vmem:[#allocation2 + $0x8a0] ss:$16 sps:$4 sm:$0xff]   ;;  %v4499_v63 = vld [vmem:[#allocation2 + $0x6ec] ss:$16 sps:$4 sm:$0xff]  }
  0xf8   : > { %2012 = vmatprep.subr.bf16.mxu1 %v4432_v2  ;;  %2041 = vmatprep.subr.bf16.mxu0 %v4438_v56  ;;  %v4502_v2 = vld [vmem:[#allocation2 + $0x884] ss:$16 sps:$4 sm:$0xff]   ;;  %v4497_v56 = vld [vmem:[#allocation2 + $0x6e8] ss:$16 sps:$4 sm:$0xff]  }
  0xfa   : > { %1933 = vmatmul.mubr.bf16.vlgmr.msra.gmra.mxu0 %v1532_v57 }
  0xfb   : > { %2013 = vmatpush2.bf16.msra.mxu1 %v4430_v7  ;;  %2042 = vmatpush1.bf16.msra.mxu0 %v4436_v8  ;;  %v4505_v7 = vld [vmem:[#allocation2 + $0x6cc] ss:$16 sps:$4 sm:$0xff]   ;;  %v4508_v8 = vld [vmem:[#allocation2 + $0x864] ss:$16 sps:$4 sm:$0xff]  }
  0xfc   : > { %2014 = vmatprep.subr.bf16.mxu1 %v4435_v9  ;;  %2043 = vmatprep.subr.bf16.mxu0 %v4444_v12  ;;  %v4503_v9 = vld [vmem:[#allocation2 + $0x6c8] ss:$16 sps:$4 sm:$0xff]   ;;  %v4506_v12 = vld [vmem:[#allocation2 + $0x860] ss:$16 sps:$4 sm:$0xff]  }
  0xfd   : > { %2061 = vmatprep.mubr.bf16.mxu0 %v4739_v0 }
  0xff   : > { %2015 = vmatpush2.bf16.msra.mxu1 %v4433_v16  ;;  %2044 = vmatpush1.bf16.msra.mxu0 %v4442_v17  ;;  %v4514_v16 = vld [vmem:[#allocation2 + $0x844] ss:$16 sps:$4 sm:$0xff]   ;;  %v4509_v17 = vld [vmem:[#allocation2 + $0x8a8] ss:$16 sps:$4 sm:$0xff]  }
 0x100   : > { %2016 = vmatprep.subr.bf16.mxu1 %v4441_v18  ;;  %2551 = vmatprep.subr.bf16.mxu0 %v4447_v19  ;;  %v4512_v18 = vld [vmem:[#allocation2 + $0x840] ss:$16 sps:$4 sm:$0xff]   ;;  %v4517_v19 = vld [vmem:[#allocation2 + $0x88c] ss:$16 sps:$4 sm:$0xff]  }
 0x102   : > { %3904 = vmatmul.mubr.msk.bf16.vlgmr.msra.gmra.mxu0 %vm747_vm0, %v1534_v3  ;;  %v2180_v3 = vor.u32 %v2179_v28, %v2178_v27  ;;  %v4521_v27 = vld [vmem:[#allocation2 + $0x868] ss:$16 sps:$4 sm:$0xff]   ;;  %v4524_v28 = vld [vmem:[#allocation2 + $0x800] ss:$16 sps:$4 sm:$0xff]  }
 0x103   : > { %2017 = vmatpush2.bf16.msra.mxu1 %v4439_v21  ;;  %2552 = vmatpush1.bf16.msra.mxu0 %v4445_v23  ;;  %v4520_v21 = vld [vmem:[#allocation2 + $0x824] ss:$16 sps:$4 sm:$0xff]   ;;  %v4518_v23 = vld [vmem:[#allocation2 + $0x820] ss:$16 sps:$4 sm:$0xff]  }
 0x104   : > { %2606 = vmatprep.subr.bf16.mxu1 %v4450_v25  ;;  %2553 = vmatprep.subr.bf16.mxu0 %v4453_v26  ;;  %v4918_v34 = vsel %vm2161_vm1, %v2180_v3, %v2184_v59  ;;  %v4523_v25 = vld [vmem:[#allocation2 + $0x86c] ss:$16 sps:$4 sm:$0xff]   ;;  %v4526_v26 = vld [vmem:[#allocation2 + $0x804] ss:$16 sps:$4 sm:$0xff]   ;;  %v4533_v59 = vld [vmem:[#allocation2 + $0x828] ss:$16 sps:$4 sm:$0xff]  }
 0x105   : > { %2583 = vmatprep.mubr.bf16.mxu0 %v2177_v29  ;;  %v4538_v3 = vld [vmem:[#allocation2 + $0x7c4] ss:$16 sps:$4 sm:$0xff]  }
 0x106   : > { %2019 = vmatmul.mubr.bf16.vlgmr.msra.gmra.mxu1 %v1532_v57  ;;  %v4500_v57 = vld [vmem:[#allocation2 + $0x880] ss:$16 sps:$4 sm:$0xff]  }
 0x107   : > { %2607 = vmatpush1.bf16.msra.mxu1 %v4448_v30  ;;  %2554 = vmatpush1.bf16.msra.mxu0 %v4451_v31  ;;  %v4529_v30 = vld [vmem:[#allocation2 + $0x84c] ss:$16 sps:$4 sm:$0xff]   ;;  %v4532_v31 = vld [vmem:[#allocation2 + $0x7e4] ss:$16 sps:$4 sm:$0xff]  }
 0x108   : > { %2608 = vmatprep.subr.bf16.mxu1 %v4456_v13  ;;  %2626 = vmatprep.mubr.bf16.mxu1 %v4739_v0  ;;  %v4527_v13 = vld [vmem:[#allocation2 + $0x848] ss:$16 sps:$4 sm:$0xff]  }
 0x109   : > { %2555 = vmatprep.subr.bf16.mxu0 %v4459_v33  ;;  %v4530_v33 = vld [vmem:[#allocation2 + $0x7e0] ss:$16 sps:$4 sm:$0xff]  }
 0x10b   : > { %2609 = vmatpush1.bf16.msra.mxu1 %v4454_v10  ;;  %2556 = vmatpush1.bf16.msra.mxu0 %v4457_v14  ;;  %v2163_v10 = vrot.slane %v367_v5, 2  ;;  %v4547_v5 = vld [vmem:[#allocation2 + $0x8e8] ss:$16 sps:$4 sm:$0xff]  }
 0x10c   : > { %2637 = vmatprep.subr.bf16.mxu1 %v4463_v60  ;;  %2557 = vmatprep.subr.bf16.mxu0 %v4466_v54  ;;  %v4536_v60 = vld [vmem:[#allocation2 + $0x7c0] ss:$16 sps:$4 sm:$0xff]  }
 0x10d   : > { %v2164_v54 = vor.u32 %v2163_v10, %v2162_v32  ;;  %v4601_v32 = vld [vmem:[#allocation2 + $0x948] ss:$16 sps:$4 sm:$0xff]   ;;  %v4612_v10 = vld [vmem:[#allocation2 + $0xac4] ss:$16 sps:$4 sm:$0xff]  }
 0x10e   : > { %3980 = vmatmul.mubr.msk.bf16.vlgmr.msra.gmra.mxu1 %vm747_vm0, %v4918_v34 }
 0x10f   : > { %2638 = vmatpush1.bf16.msra.mxu1 %v4461_v35  ;;  %2558 = vmatpush1.bf16.msra.mxu0 %v4464_v36  ;;  %v4549_v36 = vld [vmem:[#allocation2 + $0x8ec] ss:$16 sps:$4 sm:$0xff]  }
 0x110   : > { %2639 = vmatprep.subr.bf16.mxu1 %v4469_v37  ;;  %2559 = vmatprep.subr.bf16.mxu0 %v4472_v38  ;;  %v4539_v37 = vld [vmem:[#allocation2 + $0x808] ss:$16 sps:$4 sm:$0xff]   ;;  %v4546_v38 = vld [vmem:[#allocation2 + $0x7ec] ss:$16 sps:$4 sm:$0xff]  }
 0x111   : > { %2669 = vmatprep.mubr.bf16.mxu1 %v2177_v29  ;;  %v4924_v29 = vcombine.low %v4889_v1, %v4889_v1  ;;  %v4535_v1 = vld [vmem:[#allocation2 + $0x82c] ss:$16 sps:$4 sm:$0xff]  }
 0x113   : > { %2640 = vmatpush1.bf16.msra.mxu1 %v4467_v39  ;;  %2560 = vmatpush1.bf16.msra.mxu0 %v4470_v20  ;;  %v2166_v14 = vshll.u32 %v4924_v29, 16  ;;  %v4555_v39 = vld [vmem:[#allocation2 + $0x8cc] ss:$16 sps:$4 sm:$0xff]   ;;  %v4544_v20 = vld [vmem:[#allocation2 + $0x7e8] ss:$16 sps:$4 sm:$0xff]  }
 0x114   : > { %2641 = vmatprep.subr.bf16.mxu1 %v4475_v40  ;;  %2561 = vmatprep.subr.bf16.mxu0 %v4478_v41  ;;  %v4553_v40 = vld [vmem:[#allocation2 + $0x8c8] ss:$16 sps:$4 sm:$0xff]   ;;  %v4552_v41 = vld [vmem:[#allocation2 + $0x7cc] ss:$16 sps:$4 sm:$0xff]  }
 0x115   : > { %v2168_v35 = vrot.slane %v2166_v14, 2  ;;  %v4607_v14 = vld [vmem:[#allocation2 + $0x928] ss:$16 sps:$4 sm:$0xff]  }
 0x117   : > { %2642 = vmatpush1.bf16.msra.mxu1 %v4473_v42  ;;  %2562 = vmatpush1.bf16.msra.mxu0 %v4476_v43  ;;  %v2169_v62 = vsel %vm2161_vm1, %v2164_v54, %v2168_v35  ;;  %v4558_v42 = vld [vmem:[#allocation2 + $0x9e4] ss:$16 sps:$4 sm:$0xff]   ;;  %v4616_v54 = vld [vmem:[#allocation2 + $0xaa0] ss:$16 sps:$4 sm:$0xff]   ;;  %v4621_v35 = vld [vmem:[#allocation2 + $0xaec] ss:$16 sps:$4 sm:$0xff]  }
 0x118   : > { %2643 = vmatprep.subr.bf16.mxu1 %v4481_v44  ;;  %2563 = vmatprep.subr.bf16.mxu0 %v4484_v45  ;;  %v4666_v43 = vld [vmem:[%s4823_s4 + $0x4] ss:$12 sps:$4 sm:$0xff]   ;;  %v2809_v45 = vrot.slane %v4897_v6, 2 }
 0x119   : > { %v2808_v44 = vrot.slane %v4666_v43, 2  ;;  %v4567_v6 = vld [vmem:[#allocation2 + $0xb04] ss:$16 sps:$4 sm:$0xff]   ;;  %v4639_v43 = vld [vmem:[#allocation2 + $0xa8c] ss:$16 sps:$4 sm:$0xff]  }
 0x11b   : > { %2644 = vmatpush1.bf16.msra.mxu1 %v4479_v46  ;;  %2564 = vmatpush1.bf16.msra.mxu0 %v4482_v47  ;;  %v4550_v46 = vld [vmem:[#allocation2 + $0x7c8] ss:$16 sps:$4 sm:$0xff]   ;;  %v4556_v47 = vld [vmem:[#allocation2 + $0x9e0] ss:$16 sps:$4 sm:$0xff]  }
 0x11c   : > { %2645 = vmatprep.subr.bf16.mxu1 %v4487_v48  ;;  %2565 = vmatprep.subr.bf16.mxu0 %v4490_v49  ;;  %v4561_v48 = vld [vmem:[#allocation2 + $0xb24] ss:$16 sps:$4 sm:$0xff]  }
 0x11d   : > { %v4564_v49 = vld [vmem:[#allocation2 + $0x9c4] ss:$16 sps:$4 sm:$0xff]  }
 0x11f   : > { %2646 = vmatpush1.bf16.msra.mxu1 %v4485_v50  ;;  %2566 = vmatpush1.bf16.msra.mxu0 %v4488_v52  ;;  %v2810_v50 = vsel %vm2804_vm2, %v2808_v44, %v2809_v45  ;;  %v4559_v52 = vld [vmem:[#allocation2 + $0xb20] ss:$16 sps:$4 sm:$0xff]   ;;  %v4642_v44 = vld [vmem:[#allocation2 + $0xa24] ss:$16 sps:$4 sm:$0xff]   ;;  %v4637_v45 = vld [vmem:[#allocation2 + $0xa88] ss:$16 sps:$4 sm:$0xff]  }
 0x120   : > { %2647 = vmatprep.subr.bf16.mxu1 %v4493_v53  ;;  %2567 = vmatprep.subr.bf16.mxu0 %v4496_v55  ;;  %v4562_v53 = vld [vmem:[#allocation2 + $0x9c0] ss:$16 sps:$4 sm:$0xff]   ;;  %v4570_v55 = vld [vmem:[#allocation2 + $0x9a4] ss:$16 sps:$4 sm:$0xff]  }
 0x123   : > { %2648 = vmatpush1.bf16.msra.mxu1 %v4491_v58  ;;  %2568 = vmatpush2.bf16.msra.mxu0 %v4494_v61  ;;  %v4565_v58 = vld [vmem:[#allocation2 + $0xb00] ss:$16 sps:$4 sm:$0xff]  }
 0x124   : > { %2649 = vmatprep.subr.bf16.mxu1 %v4499_v63  ;;  %2569 = vmatprep.subr.bf16.mxu0 %v4502_v2  ;;  %v4568_v61 = vld [vmem:[#allocation2 + $0x9a0] ss:$16 sps:$4 sm:$0xff]   ;;  %v2811_v63 = vrot.slane %v4868_v51, 2  ;;  %v4573_v2 = vld [vmem:[#allocation2 + $0x9ec] ss:$16 sps:$4 sm:$0xff]  }
 0x125   : > { %v4577_v51 = vld [vmem:[#allocation2 + $0x9c8] ss:$16 sps:$4 sm:$0xff]  }
 0x127   : > { %2650 = vmatpush1.bf16.msra.mxu1 %v4497_v56  ;;  %2570 = vmatpush2.bf16.msra.mxu0 %v4500_v57  ;;  %v4576_v56 = vld [vmem:[#allocation2 + $0x984] ss:$16 sps:$4 sm:$0xff]  }
 0x128   : > { %2651 = vmatprep.subr.bf16.mxu1 %v4505_v7  ;;  %2571 = vmatprep.subr.bf16.mxu0 %v4508_v8  ;;  %v4571_v7 = vld [vmem:[#allocation2 + $0x9e8] ss:$16 sps:$4 sm:$0xff]   ;;  %v4574_v8 = vld [vmem:[#allocation2 + $0x980] ss:$16 sps:$4 sm:$0xff]  }
 0x12b   : > { %2652 = vmatpush1.bf16.msra.mxu1 %v4503_v9  ;;  %2572 = vmatpush2.bf16.msra.mxu0 %v4506_v12  ;;  %v4579_v9 = vld [vmem:[#allocation2 + $0x9cc] ss:$16 sps:$4 sm:$0xff]   ;;  %v4582_v12 = vld [vmem:[#allocation2 + $0x964] ss:$16 sps:$4 sm:$0xff]  }
 0x12c   : > { %2653 = vmatprep.subr.bf16.mxu1 %v4511_v15  ;;  %2573 = vmatprep.subr.bf16.mxu0 %v4514_v16  ;;  %v4585_v15 = vld [vmem:[#allocation2 + $0x9ac] ss:$16 sps:$4 sm:$0xff]   ;;  %v4588_v16 = vld [vmem:[#allocation2 + $0x944] ss:$16 sps:$4 sm:$0xff]  }
 0x12f   : > { %2654 = vmatpush2.bf16.msra.mxu1 %v4509_v17  ;;  %2574 = vmatpush2.bf16.msra.mxu0 %v4512_v18  ;;  %v4583_v17 = vld [vmem:[#allocation2 + $0x9a8] ss:$16 sps:$4 sm:$0xff]   ;;  %v4586_v18 = vld [vmem:[#allocation2 + $0x940] ss:$16 sps:$4 sm:$0xff]  }
 0x130   : > { %2655 = vmatprep.subr.bf16.mxu1 %v4517_v19  ;;  %2575 = vmatprep.subr.bf16.mxu0 %v4520_v21  ;;  %v4591_v19 = vld [vmem:[#allocation2 + $0x98c] ss:$16 sps:$4 sm:$0xff]   ;;  %v4594_v21 = vld [vmem:[#allocation2 + $0x924] ss:$16 sps:$4 sm:$0xff]  }
 0x133   : > { %2656 = vmatpush2.bf16.msra.mxu1 %v4515_v22  ;;  %2576 = vmatpush2.bf16.msra.mxu0 %v4518_v23  ;;  %v4589_v22 = vld [vmem:[#allocation2 + $0x988] ss:$16 sps:$4 sm:$0xff]   ;;  %v4592_v23 = vld [vmem:[#allocation2 + $0x920] ss:$16 sps:$4 sm:$0xff]  }
 0x134   : > { %2657 = vmatprep.subr.bf16.mxu1 %v4523_v25  ;;  %2577 = vmatprep.subr.bf16.mxu0 %v4526_v26  ;;  %v4597_v25 = vld [vmem:[#allocation2 + $0x96c] ss:$16 sps:$4 sm:$0xff]   ;;  %v4600_v26 = vld [vmem:[#allocation2 + $0x904] ss:$16 sps:$4 sm:$0xff]  }
 0x137   : > { %2658 = vmatpush2.bf16.msra.mxu1 %v4521_v27  ;;  %2578 = vmatpush2.bf16.msra.mxu0 %v4524_v28  ;;  %v4595_v27 = vld [vmem:[#allocation2 + $0x968] ss:$16 sps:$4 sm:$0xff]   ;;  %v4598_v28 = vld [vmem:[#allocation2 + $0x900] ss:$16 sps:$4 sm:$0xff]  }
 0x138   : > { %2659 = vmatprep.subr.bf16.mxu1 %v4529_v30  ;;  %2579 = vmatprep.subr.bf16.mxu0 %v4532_v31  ;;  %v4603_v30 = vld [vmem:[#allocation2 + $0x94c] ss:$16 sps:$4 sm:$0xff]   ;;  %v4606_v31 = vld [vmem:[#allocation2 + $0xae4] ss:$16 sps:$4 sm:$0xff]  }
 0x13b   : > { %2660 = vmatpush2.bf16.msra.mxu1 %v4527_v13  ;;  %2580 = vmatpush2.bf16.msra.mxu0 %v4530_v33  ;;  %v4604_v13 = vld [vmem:[#allocation2 + $0xae0] ss:$16 sps:$4 sm:$0xff]   ;;  %v4609_v33 = vld [vmem:[#allocation2 + $0x92c] ss:$16 sps:$4 sm:$0xff]  }
 0x13c   : > { %2661 = vmatprep.subr.bf16.mxu1 %v4535_v1  ;;  %2581 = vmatprep.subr.bf16.mxu0 %v4538_v3  ;;  %v4610_v1 = vld [vmem:[#allocation2 + $0xac0] ss:$16 sps:$4 sm:$0xff]   ;;  %v4615_v3 = vld [vmem:[#allocation2 + $0x90c] ss:$16 sps:$4 sm:$0xff]  }
 0x13f   : > { %2662 = vmatpush2.bf16.msra.mxu1 %v4533_v59  ;;  %2582 = vmatpush2.bf16.msra.mxu0 %v4536_v60  ;;  %v4618_v59 = vld [vmem:[#allocation2 + $0xaa4] ss:$16 sps:$4 sm:$0xff]   ;;  %v4613_v60 = vld [vmem:[#allocation2 + $0x908] ss:$16 sps:$4 sm:$0xff]  }
 0x140   : > { %2663 = vmatprep.subr.bf16.mxu1 %v4541_v11  ;;  %2692 = vmatprep.subr.bf16.mxu0 %v4549_v36  ;;  %v4624_v11 = vld [vmem:[#allocation2 + $0xa84] ss:$16 sps:$4 sm:$0xff]   ;;  %v4619_v36 = vld [vmem:[#allocation2 + $0xae8] ss:$16 sps:$4 sm:$0xff]  }
 0x142   : > { %2584 = vmatmul.mubr.bf16.vlgmr.msra.gmra.mxu0 %v2169_v62 }
 0x143   : > { %2664 = vmatpush2.bf16.msra.mxu1 %v4539_v37  ;;  %2693 = vmatpush1.bf16.msra.mxu0 %v4547_v5  ;;  %v4622_v37 = vld [vmem:[#allocation2 + $0xa80] ss:$16 sps:$4 sm:$0xff]   ;;  %v4630_v5 = vld [vmem:[#allocation2 + $0xa64] ss:$16 sps:$4 sm:$0xff]  }
 0x144   : > { %2665 = vmatprep.subr.bf16.mxu1 %v4546_v38  ;;  %2694 = vmatprep.subr.bf16.mxu0 %v4555_v39  ;;  %v4625_v38 = vld [vmem:[#allocation2 + $0xac8] ss:$16 sps:$4 sm:$0xff]   ;;  %v4628_v39 = vld [vmem:[#allocation2 + $0xa60] ss:$16 sps:$4 sm:$0xff]  }
 0x145   : > { %2712 = vmatprep.mubr.bf16.mxu0 %v4739_v0 }
 0x147   : > { %2666 = vmatpush2.bf16.msra.mxu1 %v4544_v20  ;;  %2695 = vmatpush1.bf16.msra.mxu0 %v4553_v40  ;;  %v4633_v20 = vld [vmem:[#allocation2 + $0xaac] ss:$16 sps:$4 sm:$0xff]   ;;  %v4636_v40 = vld [vmem:[#allocation2 + $0xa44] ss:$16 sps:$4 sm:$0xff]  }
 0x148   : > { %2667 = vmatprep.subr.bf16.mxu1 %v4552_v41  ;;  %3179 = vmatprep.subr.bf16.mxu0 %v4558_v42  ;;  %v4631_v41 = vld [vmem:[#allocation2 + $0xaa8] ss:$16 sps:$4 sm:$0xff]   ;;  %v4634_v42 = vld [vmem:[#allocation2 + $0xa40] ss:$16 sps:$4 sm:$0xff]  }
 0x14a   : > { %3981 = vmatmul.mubr.msk.bf16.vlgmr.msra.gmra.mxu0 %vm747_vm0, %v4918_v34  ;;  %v2812_v34 = vrot.slane %v4902_v24, 2  ;;  %v4580_v24 = vld [vmem:[#allocation2 + $0x960] ss:$16 sps:$4 sm:$0xff]  }
 0x14b   : > { %2668 = vmatpush2.bf16.msra.mxu1 %v4550_v46  ;;  %3180 = vmatpush1.bf16.msra.mxu0 %v4556_v47  ;;  %v4640_v46 = vld [vmem:[#allocation2 + $0xa20] ss:$16 sps:$4 sm:$0xff]   ;;  %v4645_v47 = vld [vmem:[#allocation2 + $0xa6c] ss:$16 sps:$4 sm:$0xff]  }
 0x14c   : > { %3234 = vmatprep.subr.bf16.mxu1 %v4561_v48  ;;  %3181 = vmatprep.subr.bf16.mxu0 %v4564_v49  ;;  %v4942_v57 = vsel %vm2804_vm2, %v2811_v63, %v2812_v34  ;;  %v4648_v48 = vld [vmem:[#allocation2 + $0xa04] ss:$16 sps:$4 sm:$0xff]   ;;  %v4643_v49 = vld [vmem:[#allocation2 + $0xa68] ss:$16 sps:$4 sm:$0xff]   ;;  %v4654_v34 = vld [vmem:[#allocation2 + $0xa2c] ss:$16 sps:$4 sm:$0xff]  }
 0x14d   : > { %3211 = vmatprep.mubr.bf16.mxu0 %v2810_v50  ;;  %v4655_v63 = vld [vmem:[#allocation2 + $0xb28] ss:$16 sps:$4 sm:$0xff]  }
 0x14e   : > { %2670 = vmatmul.mubr.bf16.vlgmr.msra.gmra.mxu1 %v2169_v62  ;;  %v4627_v62 = vld [vmem:[#allocation2 + $0xacc] ss:$16 sps:$4 sm:$0xff]  }
 0x14f   : > { %3235 = vmatpush1.bf16.msra.mxu1 %v4559_v52  ;;  %3182 = vmatpush1.bf16.msra.mxu0 %v4562_v53  ;;  %v2805_v52 = vrot.slane %v4892_v4, 2  ;;  %v2806_v53 = vrot.slane %v4924_v29, 2  ;;  %v4661_v4 = vld [vmem:[#allocation2 + $0xb08] ss:$16 sps:$4 sm:$0xff]   ;;  %v4660_v29 = vld [vmem:[#allocation2 + $0xa0c] ss:$16 sps:$4 sm:$0xff]  }
 0x150   : > { %3236 = vmatprep.subr.bf16.mxu1 %v4567_v6  ;;  %3254 = vmatprep.mubr.bf16.mxu1 %v4739_v0  ;;  %v4651_v6 = vld [vmem:[#allocation2 + $0xa4c] ss:$16 sps:$4 sm:$0xff]  }
 0x151   : > { %3183 = vmatprep.subr.bf16.mxu0 %v4570_v55  ;;  %v4657_v55 = vld [vmem:[#allocation2 + $0xb2c] ss:$16 sps:$4 sm:$0xff]  }
 0x153   : > { %3237 = vmatpush1.bf16.msra.mxu1 %v4565_v58  ;;  %3184 = vmatpush1.bf16.msra.mxu0 %v4568_v61  ;;  %v4649_v58 = vld [vmem:[#allocation2 + $0xa48] ss:$16 sps:$4 sm:$0xff]   ;;  %v2807_v61 = vsel %vm2804_vm2, %v2805_v52, %v2806_v53 }
 0x154   : > { %3265 = vmatprep.subr.bf16.mxu1 %v4573_v2  ;;  %3185 = vmatprep.subr.bf16.mxu0 %v4576_v56  ;;  %v4663_v2 = vld [vmem:[#allocation2 + $0xb0c] ss:$16 sps:$4 sm:$0xff]   ;;  %v4652_v56 = vld [vmem:[#allocation2 + $0xa28] ss:$16 sps:$4 sm:$0xff]  }
 0x156   : > { %4054 = vmatmul.mubr.msk.bf16.vlgmr.msra.gmra.mxu1 %vm747_vm0, %v4942_v57 }
 0x157   : > { %3266 = vmatpush1.bf16.msra.mxu1 %v4571_v7  ;;  %3186 = vmatpush1.bf16.msra.mxu0 %v4574_v8  ;;  %v4658_v7 = vld [vmem:[#allocation2 + $0xa08] ss:$16 sps:$4 sm:$0xff]   ;;  %v828_v8 = vpop.f32.mrf.mxu1 }
 0x158   : > { %3267 = vmatprep.subr.bf16.mxu1 %v4579_v9  ;;  %3187 = vmatprep.subr.bf16.mxu0 %v4582_v12  ;;  %v785_v12 = vpop.f32.mrf.mxu0 }
 0x159   : > { %3297 = vmatprep.mubr.bf16.mxu1 %v2810_v50  ;;  %v4646_v50 = vld [vmem:[#allocation2 + $0xa00] ss:$16 sps:$4 sm:$0xff]   ;;  %v830_v9 = vpop.f32.mrf.mxu1 }
 0x15b   : > { %3268 = vmatpush1.bf16.msra.mxu1 %v4577_v51  ;;  %3188 = vmatpush1.bf16.msra.mxu0 %v4580_v24  ;;  %v832_v51 = vpop.f32.mrf.mxu1  ;;  %v787_v24 = vpop.f32.mrf.mxu0 }
 0x15c   : > { %3269 = vmatprep.subr.bf16.mxu1 %v4585_v15  ;;  %3189 = vmatprep.subr.bf16.mxu0 %v4588_v16 }
 0x15d   : > { %v834_v15 = vpop.f32.mrf.mxu1  ;;  %v789_v16 = vpop.f32.mrf.mxu0 }
 0x15f   : > { %3270 = vmatpush1.bf16.msra.mxu1 %v4583_v17  ;;  %3190 = vmatpush1.bf16.msra.mxu0 %v4586_v18  ;;  %v871_v17 = vpop.f32.mrf.mxu1  ;;  %v791_v18 = vpop.f32.mrf.mxu0 }
 0x160   : > { %3271 = vmatprep.subr.bf16.mxu1 %v4591_v19  ;;  %3191 = vmatprep.subr.bf16.mxu0 %v4594_v21 }
 0x161   : > { %v873_v19 = vpop.f32.mrf.mxu1 }
 0x163   : > { %3272 = vmatpush1.bf16.msra.mxu1 %v4589_v22  ;;  %3192 = vmatpush1.bf16.msra.mxu0 %v4592_v23  ;;  %v875_v21 = vpop.f32.mrf.mxu1 }
 0x164   : > { %3273 = vmatprep.subr.bf16.mxu1 %v4597_v25  ;;  %3193 = vmatprep.subr.bf16.mxu0 %v4600_v26 }
 0x165   : > { %v877_v23 = vpop.f32.mrf.mxu1 }
 0x167   : > { %3274 = vmatpush1.bf16.msra.mxu1 %v4595_v27  ;;  %3194 = vmatpush1.bf16.msra.mxu0 %v4598_v28  ;;  %v4952_v26 = vpop.f32.mrf.mxu1 }
 0x168   : > { %3275 = vmatprep.subr.bf16.mxu1 %v4603_v30  ;;  %3195 = vmatprep.subr.bf16.mxu0 %v4606_v31  ;;  %5104 = vst [vmem:[#allocation8_spill] sm:$0xff] %v4952_v26 }
 0x169   : > { %v4954_v27 = vpop.f32.mrf.mxu1 }
 0x16a   : > { %5105 = vst [vmem:[#allocation9_spill] sm:$0xff] %v4954_v27 }
 0x16b   : > { %3276 = vmatpush1.bf16.msra.mxu1 %v4601_v32  ;;  %3196 = vmatpush2.bf16.msra.mxu0 %v4604_v13  ;;  %v4956_v30 = vpop.f32.mrf.mxu1 }
 0x16c   : > { %3277 = vmatprep.subr.bf16.mxu1 %v4609_v33  ;;  %3197 = vmatprep.subr.bf16.mxu0 %v4612_v10  ;;  %5106 = vst [vmem:[#allocation10_spill] sm:$0xff] %v4956_v30 }
 0x16d   : > { %v4958_v32 = vpop.f32.mrf.mxu1 }
 0x16e   : > { %5107 = vst [vmem:[#allocation11_spill] sm:$0xff] %v4958_v32 }
 0x16f   : > { %3278 = vmatpush1.bf16.msra.mxu1 %v4607_v14  ;;  %3198 = vmatpush2.bf16.msra.mxu0 %v4610_v1 }
 0x170   : > { %3279 = vmatprep.subr.bf16.mxu1 %v4615_v3  ;;  %3199 = vmatprep.subr.bf16.mxu0 %v4618_v59 }
 0x173   : > { %3280 = vmatpush1.bf16.msra.mxu1 %v4613_v60  ;;  %3200 = vmatpush2.bf16.msra.mxu0 %v4616_v54 }
 0x174   : > { %3281 = vmatprep.subr.bf16.mxu1 %v4621_v35  ;;  %3201 = vmatprep.subr.bf16.mxu0 %v4624_v11 }
 0x177   : > { %3282 = vmatpush2.bf16.msra.mxu1 %v4619_v36  ;;  %3202 = vmatpush2.bf16.msra.mxu0 %v4622_v37 }
 0x178   : > { %3283 = vmatprep.subr.bf16.mxu1 %v4627_v62  ;;  %3203 = vmatprep.subr.bf16.mxu0 %v4630_v5 }
 0x17b   : > { %3284 = vmatpush2.bf16.msra.mxu1 %v4625_v38  ;;  %3204 = vmatpush2.bf16.msra.mxu0 %v4628_v39 }
 0x17c   : > { %3285 = vmatprep.subr.bf16.mxu1 %v4633_v20  ;;  %3205 = vmatprep.subr.bf16.mxu0 %v4636_v40 }
 0x17e   : > { %v1407_v33 = vpop.f32.mrf.mxu1 }
 0x17f   : > { %3286 = vmatpush2.bf16.msra.mxu1 %v4631_v41  ;;  %3206 = vmatpush2.bf16.msra.mxu0 %v4634_v42 }
 0x180   : > { %3287 = vmatprep.subr.bf16.mxu1 %v4639_v43  ;;  %3207 = vmatprep.subr.bf16.mxu0 %v4642_v44  ;;  %v1409_v14 = vpop.f32.mrf.mxu1 }
 0x182   : > { %v1411_v3 = vpop.f32.mrf.mxu1 }
 0x183   : > { %3288 = vmatpush2.bf16.msra.mxu1 %v4637_v45  ;;  %3208 = vmatpush2.bf16.msra.mxu0 %v4640_v46 }
 0x184   : > { %3289 = vmatprep.subr.bf16.mxu1 %v4645_v47  ;;  %3209 = vmatprep.subr.bf16.mxu0 %v4648_v48  ;;  %v1413_v60 = vpop.f32.mrf.mxu1 }
 0x186   : > { %v1977_v35 = vpop.f32.mrf.mxu1 }
 0x187   : > { %3290 = vmatpush2.bf16.msra.mxu1 %v4643_v49  ;;  %3210 = vmatpush2.bf16.msra.mxu0 %v4646_v50 }
 0x188   : > { %3291 = vmatprep.subr.bf16.mxu1 %v4651_v6  ;;  %3320 = vmatprep.subr.bf16.mxu0 %v4657_v55  ;;  %v1979_v36 = vpop.f32.mrf.mxu1 }
 0x18a   : > { %3212 = vmatmul.mubr.bf16.vlgmr.msra.gmra.mxu0 %v2807_v61  ;;  %v1981_v62 = vpop.f32.mrf.mxu1 }
 0x18b   : > { %3292 = vmatpush2.bf16.msra.mxu1 %v4649_v58  ;;  %3321 = vmatpush1.bf16.msra.mxu0 %v4655_v63 }
 0x18c   : > { %3293 = vmatprep.subr.bf16.mxu1 %v4654_v34  ;;  %3322 = vmatprep.subr.bf16.mxu0 %v4663_v2  ;;  %v1983_v38 = vpop.f32.mrf.mxu1 }
 0x18d   : > { %3340 = vmatprep.mubr.bf16.mxu0 %v4739_v0  ;;  %v914_v0 = vpop.f32.mrf.mxu0 }
 0x18f   : > { %3294 = vmatpush2.bf16.msra.mxu1 %v4652_v56  ;;  %3323 = vmatpush1.bf16.msra.mxu0 %v4661_v4  ;;  %v916_v22 = vpop.f32.mrf.mxu0  ;;  %v829_v56 = vadd.f32 %v828_v8, %v785_v12  ;;  %v831_v4 = vadd.f32 %v830_v9, %v787_v24 }
 0x190   : > { %3295 = vmatprep.subr.bf16.mxu1 %v4660_v29  ;;  %v833_v29 = vadd.f32 %v832_v51, %v789_v16  ;;  %v5117_v51 = vld [vmem:[#allocation8_spill] sm:$0xff] }
 0x191   : > { %v918_v25 = vpop.f32.mrf.mxu0 }
 0x192   : > { %4055 = vmatmul.mubr.msk.bf16.vlgmr.msra.gmra.mxu0 %vm747_vm0, %v4942_v57 }
 0x193   : > { %3296 = vmatpush2.bf16.msra.mxu1 %v4658_v7  ;;  %v920_v57 = vpop.f32.mrf.mxu0  ;;  %v835_v7 = vadd.f32 %v834_v15, %v791_v18  ;;  %v5118_v15 = vld [vmem:[#allocation9_spill] sm:$0xff] }
 0x195   : > { %v1321_v28 = vpop.f32.mrf.mxu0 }
 0x196   : > { %3298 = vmatmul.mubr.bf16.vlgmr.msra.gmra.mxu1 %v2807_v61  ;;  %v1322_v32 = vadd.f32 %v1321_v28, %v829_v56  ;;  %v5120_v28 = vld [vmem:[#allocation11_spill] sm:$0xff] }
 0x197   : > { %v1323_v31 = vpop.f32.mrf.mxu0 }
 0x198   : > { %v1365_v24 = vadd.f32 %v5117_v51, %v1322_v32 }
 0x199   : > { %v1325_v13 = vpop.f32.mrf.mxu0 }
 0x19a   : > { %v1326_v30 = vadd.f32 %v1325_v13, %v833_v29 }
 0x19b   : > { %v1327_v10 = vpop.f32.mrf.mxu0 }
 0x19c   : > { %v1328_v26 = vadd.f32 %v1327_v10, %v835_v7 }
 0x19d   : > { %v1450_v1 = vpop.f32.mrf.mxu0 }
 0x19f   : > { %v1452_v59 = vpop.f32.mrf.mxu0 }
 0x1a1   : > { %v4960_v54 = vpop.f32.mrf.mxu0 }
 0x1a2   : > { %5108 = vst [vmem:[#allocation12_spill] sm:$0xff] %v4960_v54  ;;  %v917_v54 = vadd.f32 %v916_v22, %v873_v19 }
 0x1a3   : > { %v4962_v11 = vpop.f32.mrf.mxu0 }
 0x1a4   : > { %5109 = vst [vmem:[#allocation13_spill] sm:$0xff] %v4962_v11  ;;  %v915_v11 = vadd.f32 %v914_v0, %v871_v17  ;;  %v5119_v17 = vld [vmem:[#allocation10_spill] sm:$0xff] }
 0x1a5   : > { %v1369_v18 = vadd.f32 %v5119_v17, %v1326_v30 }
 0x1ba   : > { %v1934_v37 = vpop.f32.mrf.mxu0 }
 0x1bb   : > { %v1978_v19 = vadd.f32 %v1977_v35, %v1934_v37 }
 0x1bc   : > { %v1936_v5 = vpop.f32.mrf.mxu0 }
 0x1be   : > { %v1938_v39 = vpop.f32.mrf.mxu0 }
 0x1c0   : > { %v1940_v40 = vpop.f32.mrf.mxu0 }
 0x1c2   : > { %v2063_v42 = vpop.f32.mrf.mxu0 }
 0x1c4   : > { %v2065_v44 = vpop.f32.mrf.mxu0 }
 0x1c6   : > { %v2020_v20 = vpop.f32.mrf.mxu1  ;;  %v2067_v46 = vpop.f32.mrf.mxu0 }
 0x1c8   : > { %v2022_v41 = vpop.f32.mrf.mxu1  ;;  %v2069_v48 = vpop.f32.mrf.mxu0 }
 0x1c9   : > { %v2066_v10 = vadd.f32 %v2065_v44, %v2022_v41 }
 0x1ca   : > { %v2024_v43 = vpop.f32.mrf.mxu1 }
 0x1cb   : > { %v2068_v30 = vadd.f32 %v2067_v46, %v2024_v43 }
 0x1cc   : > { %v2026_v45 = vpop.f32.mrf.mxu1 }
 0x1cd   : > { %v2070_v35 = vadd.f32 %v2069_v48, %v2026_v45 }
 0x1ce   : > { %v2628_v47 = vpop.f32.mrf.mxu1 }
 0x1d0   : > { %v2630_v49 = vpop.f32.mrf.mxu1 }
 0x1d2   : > { %v4964_v52 = vpop.f32.mrf.mxu1 }
 0x1d3   : > { %5110 = vst [vmem:[#allocation14_spill] sm:$0xff] %v4964_v52  ;;  %v3361_v52 = vlaneseq }
 0x1d4   : > { %v4966_v6 = vpop.f32.mrf.mxu1 }
 0x1d5   : > { %5111 = vst [vmem:[#allocation15_spill] sm:$0xff] %v4966_v6  ;;  %v1324_v6 = vadd.f32 %v1323_v31, %v831_v4  ;;  %v3362_v9 = vshrl.u32 %v3361_v52, 7  ;;  %v1371_v31 = vadd.f32 %v5120_v28, %v1328_v26  ;;  %v2072_v52 = vadd.f32 %v1978_v19, %v1365_v24 }
 0x1d7   : > { %v1367_v16 = vadd.f32 %v5118_v15, %v1324_v6  ;;  %v3367_v26 = vsub.s32 1, %v3362_v9 }
 0x1dc   : > { %v5125_v4 = vld [vmem:[#allocation15_spill] sm:$0xff] }
 0x202   : > { %v2585_v50 = vpop.f32.mrf.mxu0 }
 0x204   : > { %v2587_v53 = vpop.f32.mrf.mxu0 }
 0x206   : > { %v2589_v55 = vpop.f32.mrf.mxu0 }
 0x208   : > { %v4970_v61 = vpop.f32.mrf.mxu0 }
 0x209   : > { %5113 = vst [vmem:[#allocation17_spill] sm:$0xff] %v4970_v61  ;;  %v919_v61 = vadd.f32 %v918_v25, %v875_v21  ;;  %v1980_v21 = vadd.f32 %v1979_v36, %v1936_v5 }
 0x20a   : > { %v4974_v34 = vpop.f32.mrf.mxu0 }
 0x20b   : > { %5115 = vst [vmem:[#allocation19_spill] sm:$0xff] %v4974_v34  ;;  %v1408_v34 = vadd.f32 %v1407_v33, %v915_v11  ;;  %v1412_v8 = vadd.f32 %v1411_v3, %v919_v61  ;;  %v2064_v33 = vadd.f32 %v2063_v42, %v2020_v20  ;;  %v3363_v11 = vsub.s32 0, %v3362_v9  ;;  %v3359_v61 = vld [vmem:[#allocation4] sm:$0xf]  ;;  %v5123_v42 = vld [vmem:[#allocation14_spill] sm:$0xff] }
 0x20c   : > { %v4978_v27 = vpop.f32.mrf.mxu0  ;;  %v2633_v44 = vadd.f32 %v5123_v42, %v2589_v55 }
 0x20d   : > { %v1451_v13 = vadd.f32 %v1450_v1, %v1408_v34  ;;  %v2073_v1 = vadd.f32 %v1980_v21, %v1367_v16 }
 0x20e   : > { %v4968_v58 = vpop.f32.mrf.mxu1  ;;  %v2718_v0 = vpop.f32.mrf.mxu0 }
 0x20f   : > { %5112 = vst [vmem:[#allocation16_spill] sm:$0xff] %v4968_v58 }
 0x210   : > { %v4972_v63 = vpop.f32.mrf.mxu1  ;;  %v2720_v37 = vpop.f32.mrf.mxu0  ;;  %v5124_v56 = vld [vmem:[#allocation17_spill] sm:$0xff] }
 0x211   : > { %5114 = vst [vmem:[#allocation18_spill] sm:$0xff] %v4972_v63  ;;  %v921_v63 = vadd.f32 %v920_v57, %v877_v23  ;;  %v1982_v23 = vadd.f32 %v1981_v62, %v1938_v39  ;;  %v1984_v57 = vadd.f32 %v1983_v38, %v1940_v40  ;;  %v2631_v62 = vadd.f32 %v2630_v49, %v2587_v53 }
 0x212   : > { %v4976_v2 = vpop.f32.mrf.mxu1  ;;  %v2074_v38 = vadd.f32 %v2064_v33, %v1451_v13  ;;  %v3375_v40 = vsub.s32 3, %v3362_v9  ;;  %v2635_v29 = vadd.f32 %v5125_v4, %v5124_v56 }
 0x213   : > { %5116 = vst [vmem:[#allocation20_spill] sm:$0xff] %v4976_v2  ;;  %v1410_v2 = vadd.f32 %v1409_v14, %v917_v54  ;;  %v1414_v12 = vadd.f32 %v1413_v60, %v921_v63  ;;  %v5121_v14 = vld [vmem:[#allocation12_spill] sm:$0xff]  ;;  %v5122_v60 = vld [vmem:[#allocation13_spill] sm:$0xff]  ;;  %v2629_v54 = vadd.f32 %v2628_v47, %v2585_v50  ;;  %v2076_v36 = vadd.f32 %v1982_v23, %v1369_v18 }
 0x214   : > { %v4980_v58 = vpop.f32.mrf.mxu1  ;;  %v1455_v3 = vadd.f32 %v5121_v14, %v1412_v8  ;;  %v2077_v5 = vadd.f32 %v1984_v57, %v1371_v31  ;;  %v3364_v50 = vrot.slane %v3359_v61, %v3363_v11  ;;  %v3368_v63 = vrot.slane %v3359_v61, %v3367_v26  ;;  %v5127_v8 = vld [vmem:[#allocation19_spill] sm:$0xff] }
 0x215   : > { %v1453_v25 = vadd.f32 %v1452_v59, %v1410_v2  ;;  %v1457_v32 = vadd.f32 %v5122_v60, %v1414_v12  ;;  %v3371_v59 = vsub.s32 2, %v3362_v9  ;;  %v2723_v41 = vadd.f32 %v2629_v54, %v2072_v52 }
 0x216   : > { %v3256_v22 = vpop.f32.mrf.mxu1  ;;  %v2078_v43 = vadd.f32 %v2068_v30, %v1455_v3  ;;  %v2724_v34 = vadd.f32 %v2631_v62, %v2073_v1  ;;  %v5126_v7 = vld [vmem:[#allocation16_spill] sm:$0xff]  ;;  %v4995_v9 = vrot.slane %v3359_v61, %v3375_v40  ;;  %v2727_v51 = vadd.f32 %v2633_v44, %v2076_v36 }
 0x217   : > { %v2075_v39 = vadd.f32 %v2066_v10, %v1453_v25  ;;  %v2079_v45 = vadd.f32 %v2070_v35, %v1457_v32  ;;  %v4989_v53 = vrot.slane %v3359_v61, %v3371_v59  ;;  %v2715_v12 = vadd.f32 %v5127_v8, %v5126_v7 }
 0x218   : > { %v3258_v6 = vpop.f32.mrf.mxu1  ;;  %v5128_v17 = vld [vmem:[#allocation18_spill] sm:$0xff]  ;;  %v2721_v28 = vadd.f32 %v2720_v37, %v4980_v58  ;;  %v2728_v33 = vadd.f32 %v2635_v29, %v2077_v5 }
 0x219   : > { %v2717_v18 = vadd.f32 %v4978_v27, %v5128_v17  ;;  %v2725_v10 = vadd.f32 %v2715_v12, %v2074_v38 }
 0x21a   : > { %v3260_v46 = vpop.f32.mrf.mxu1  ;;  %v5129_v19 = vld [vmem:[#allocation20_spill] sm:$0xff]  ;;  %v2730_v54 = vadd.f32 %v2721_v28, %v2079_v45 }
 0x21b   : > { %v2726_v60 = vadd.f32 %v2717_v18, %v2075_v39 }
 0x21c   : > { %v3262_v31 = vpop.f32.mrf.mxu1 }
 0x24a   : > { %v3213_v20 = vpop.f32.mrf.mxu0 }
 0x24b   : > { %v3257_v47 = vadd.f32 %v3256_v22, %v3213_v20  ;;  %v2719_v22 = vadd.f32 %v2718_v0, %v5129_v19 }
 0x24c   : > { %v3215_v48 = vpop.f32.mrf.mxu0 }
 0x24d   : > { %v3351_v2 = vadd.f32 %v3257_v47, %v2723_v41  ;;  %v3259_v49 = vadd.f32 %v3258_v6, %v3215_v48  ;;  %v2729_v32 = vadd.f32 %v2719_v22, %v2078_v43 }
 0x24e   : > { %v3217_v55 = vpop.f32.mrf.mxu0 }
 0x24f   : > { %v3381_v24 = vadd.f32 %v3364_v50, %v3351_v2  ;;  %v3352_v15 = vadd.f32 %v3259_v49, %v2724_v34  ;;  %v3261_v16 = vadd.f32 %v3260_v46, %v3217_v55 }
 0x250   : > { %v3219_v13 = vpop.f32.mrf.mxu0 }
 0x251   : > { %v5001_v21 = vmax.f32 %v3381_v24, 0.0  ;;  %v3382_v23 = vadd.f32 %v3368_v63, %v3352_v15  ;;  %v3355_v25 = vadd.f32 %v3261_v16, %v2727_v51  ;;  %v3263_v57 = vadd.f32 %v3262_v31, %v3219_v13 }
 0x252   : > { %v3342_v14 = vpop.f32.mrf.mxu0 }
 0x253   : > { %v3401_v3 = vrot.slane %v5001_v21, 1  ;;  %v3409_v27 = vrot.slane %v5001_v21, 2  ;;  %v5005_v0 = vmax.f32 %v3382_v23, 0.0  ;;  %v3385_v58 = vadd.f32 %v3364_v50, %v3355_v25 }
 0x254   : > { %v3356_v11 = vadd.f32 %v3263_v57, %v2728_v33  ;;  %v3344_v52 = vpop.f32.mrf.mxu0  ;;  %v3417_v6 = vrot.slane %v5001_v21, 3  ;;  %v3483_v59 = vrot.slane %v5001_v21, 4 }
 0x255   : > { %v3402_v30 = vrot.slane %v5005_v0, 1  ;;  %v3410_v35 = vrot.slane %v5005_v0, 2  ;;  %v5009_v37 = vmax.f32 %v3385_v58, 0.0  ;;  %v3418_v36 = vrot.slane %v5005_v0, 3 }
 0x256   : > { %v3386_v61 = vadd.f32 %v3368_v63, %v3356_v11  ;;  %v3299_v26 = vpop.f32.mrf.mxu1  ;;  %v3346_v1 = vpop.f32.mrf.mxu0  ;;  %v3454_v62 = vsel %vm3453_vm3, %v5001_v21, %v3401_v3  ;;  %v3484_v39 = vrot.slane %v5005_v0, 4  ;;  %v3499_v20 = vsel %vm3453_vm3, %v3401_v3, %v3409_v27 }
 0x257   : > { %v3429_v5 = vrot.slane %v5009_v37, 4  ;;  %v3343_v38 = vadd.f32 %v3342_v14, %v3299_v26  ;;  %v3437_v42 = vrot.slane %v5009_v37, 5  ;;  %v3455_v44 = vsel %vm3453_vm3, %v5005_v0, %v3402_v30 }
 0x258   : > { %v5019_v40 = vmax.f32 %v3386_v61, 0.0  ;;  %v3301_v41 = vpop.f32.mrf.mxu1  ;;  %v3459_v47 = vsel %vm3458_vm4, %v3454_v62, %v3409_v27  ;;  %v3460_v45 = vsel %vm3458_vm4, %v3455_v44, %v3410_v35  ;;  %v3348_v34 = vpop.f32.mrf.mxu0  ;;  %v3445_v49 = vrot.slane %v5009_v37, 6 }
 0x259   : > { %v3353_v50 = vadd.f32 %v3343_v38, %v2725_v10  ;;  %v3345_v43 = vadd.f32 %v3344_v52, %v3301_v41  ;;  %v3464_v46 = vsel %vm3463_vm5, %v3459_v47, %v3417_v6  ;;  %v3465_v56 = vsel %vm3463_vm5, %v3460_v45, %v3418_v36 }
 0x25a   : > { %v3430_v48 = vrot.slane %v5019_v40, 4  ;;  %v3303_v63 = vpop.f32.mrf.mxu1  ;;  %v3438_v2 = vrot.slane %v5019_v40, 5  ;;  %v3469_v8 = vsel %vm3468_vm6, %v3464_v46, %v3429_v5  ;;  %v3491_v24 = vrot.slane %v5009_v37, 7 }
 0x25b   : > { %v3383_v4 = vadd.f32 %v4989_v53, %v3353_v50  ;;  %v3354_v29 = vadd.f32 %v3345_v43, %v2726_v60  ;;  %v3347_v7 = vadd.f32 %v3346_v1, %v3303_v63  ;;  %v3474_v51 = vsel %vm3473_vm7, %v3469_v8, %v3437_v42 }
 0x25c   : > { %v3305_v12 = vpop.f32.mrf.mxu1  ;;  %v3470_v55 = vsel %vm3468_vm6, %v3465_v56, %v3430_v48  ;;  %v3500_v15 = vsel %vm3453_vm3, %v3402_v30, %v3410_v35  ;;  %v3446_v22 = vrot.slane %v5019_v40, 6  ;;  %v3503_v31 = vsel %vm3458_vm4, %v3499_v20, %v3417_v6 }
 0x25d   : > { %v3391_v16 = vmax.f32 %v3383_v4, 0.0  ;;  %v3384_v17 = vadd.f32 %v4995_v9, %v3354_v29  ;;  %v3357_v18 = vadd.f32 %v3347_v7, %v2729_v32  ;;  %v3349_v19 = vadd.f32 %v3348_v34, %v3305_v12 }
 0x25e   : > { %v3475_v28 = vsel %vm3473_vm7, %v3470_v55, %v3438_v2  ;;  %v3504_v13 = vsel %vm3458_vm4, %v3500_v15, %v3418_v36  ;;  %v3479_v25 = vsel %vm2804_vm2, %v3474_v51, %v3445_v49  ;;  %v3492_v57 = vrot.slane %v5019_v40, 7 }
 0x25f   : > { %v3403_v21 = vrot.slane %v3391_v16, 1  ;;  %v3411_v23 = vrot.slane %v3391_v16, 2  ;;  %v3419_v33 = vrot.slane %v3391_v16, 3  ;;  %v3392_v10 = vmax.f32 %v3384_v17, 0.0 }
 0x260   : > { %v3387_v14 = vadd.f32 %v4989_v53, %v3357_v18  ;;  %v3358_v3 = vadd.f32 %v3349_v19, %v2730_v54  ;;  %v3485_v27 = vrot.slane %v3391_v16, 4  ;;  %v3480_v0 = vsel %vm2804_vm2, %v3475_v28, %v3446_v22 }
 0x261   : > { %v3507_v58 = vsel %vm3463_vm5, %v3503_v31, %v3483_v59  ;;  %v3508_v60 = vsel %vm3463_vm5, %v3504_v13, %v3484_v39  ;;  %v3456_v32 = vsel %vm3453_vm3, %v3391_v16, %v3403_v21  ;;  %v3404_v11 = vrot.slane %v3392_v10, 1 }
 0x262   : > { %v3412_v52 = vrot.slane %v3392_v10, 2  ;;  %v3501_v30 = vsel %vm3453_vm3, %v3403_v21, %v3411_v23  ;;  %v3395_v35 = vmax.f32 %v3387_v14, 0.0  ;;  %v3388_v37 = vadd.f32 %v4995_v9, %v3358_v3 }
 0x263   : > { %v3511_v6 = vsel %vm3468_vm6, %v3507_v58, %v3437_v42  ;;  %v3512_v53 = vsel %vm3468_vm6, %v3508_v60, %v3438_v2  ;;  %v3420_v54 = vrot.slane %v3392_v10, 3  ;;  %v3457_v61 = vsel %vm3453_vm3, %v3392_v10, %v3404_v11 }
 0x264   : > { %v3515_v26 = vsel %vm3473_vm7, %v3511_v6, %v3445_v49  ;;  %v3516_v1 = vsel %vm3473_vm7, %v3512_v53, %v3446_v22  ;;  %v3431_v36 = vrot.slane %v3395_v35, 4  ;;  %v3396_v62 = vmax.f32 %v3388_v37, 0.0 }
 0x265   : > { %v3519_v59 = vsel %vm2804_vm2, %v3515_v26, %v3491_v24  ;;  %v3461_v5 = vsel %vm3458_vm4, %v3456_v32, %v3411_v23  ;;  %v3486_v38 = vrot.slane %v3392_v10, 4  ;;  %v3439_v39 = vrot.slane %v3395_v35, 5 }
 0x266   : > { %v3520_v9 = vsel %vm2804_vm2, %v3516_v1, %v3492_v57  ;;  %v3462_v20 = vsel %vm3458_vm4, %v3457_v61, %v3412_v52  ;;  %v3432_v40 = vrot.slane %v3396_v62, 4  ;;  %v3440_v41 = vrot.slane %v3396_v62, 5  ;;  %v3588_v1 = vld [vmem:[%s198_s11] sm:$0xff] }
 0x267   : > { %v3523_v42 = vmax.f32 %v3479_v25, %v3519_v59  ;;  %v3524_v44 = vmax.f32 %v3480_v0, %v3520_v9  ;;  %v3447_v47 = vrot.slane %v3395_v35, 6  ;;  %v3448_v50 = vrot.slane %v3396_v62, 6 }
 0x268   : > { %v3466_v43 = vsel %vm3463_vm5, %v3461_v5, %v3419_v33  ;;  %v3467_v45 = vsel %vm3463_vm5, %v3462_v20, %v3420_v54  ;;  %v3502_v34 = vsel %vm3453_vm3, %v3404_v11, %v3412_v52  ;;  %v3505_v56 = vsel %vm3458_vm4, %v3501_v30, %v3419_v33 }
 0x269   : > { %v4097_v46 = vpack.i.bf16 %v3524_v44, %v3523_v42  ;;  %v3471_v48 = vsel %vm3468_vm6, %v3466_v43, %v3431_v36  ;;  %v3472_v63 = vsel %vm3468_vm6, %v3467_v45, %v3432_v40  ;;  %v3506_v4 = vsel %vm3458_vm4, %v3502_v34, %v3420_v54 }
 0x26a   : > { %v3476_v2 = vsel %vm3473_vm7, %v3471_v48, %v3439_v39  ;;  %v3477_v49 = vsel %vm3473_vm7, %v3472_v63, %v3440_v41  ;;  %v3493_v29 = vrot.slane %v3395_v35, 7  ;;  %v3494_v7 = vrot.slane %v3396_v62, 7 }
 0x26b   : > { %4098 = vrot.lane.b32.xlu0 %v4097_v46, %s4740_s5  ;;  %v3509_v8 = vsel %vm3463_vm5, %v3505_v56, %v3485_v27  ;;  %v3510_v12 = vsel %vm3463_vm5, %v3506_v4, %v3486_v38  ;;  %v3481_v55 = vsel %vm2804_vm2, %v3476_v2, %v3447_v47  ;;  %v3482_v51 = vsel %vm2804_vm2, %v3477_v49, %v3448_v50 }
 0x26c   : > { %v3513_v24 = vsel %vm3468_vm6, %v3509_v8, %v3439_v39  ;;  %v3514_v15 = vsel %vm3468_vm6, %v3510_v12, %v3440_v41 }
 0x26d   : > { %v3517_v16 = vsel %vm3473_vm7, %v3513_v24, %v3447_v47  ;;  %v3518_v17 = vsel %vm3473_vm7, %v3514_v15, %v3448_v50 }
 0x26e   : > { %v3521_v18 = vsel %vm2804_vm2, %v3517_v16, %v3493_v29  ;;  %v3522_v19 = vsel %vm2804_vm2, %v3518_v17, %v3494_v7 }
 0x26f   : > { %v3525_v22 = vmax.f32 %v3481_v55, %v3521_v18  ;;  %v3526_v28 = vmax.f32 %v3482_v51, %v3522_v19 }
 0x271   : > { %v4102_v31 = vpack.i.bf16 %v3526_v28, %v3525_v22 }
 0x273   : > { %4103 = vrot.lane.b32.xlu0 %v4102_v31, %s4740_s5 }
 0x2dd   : > { %v4099_v13 = vpop.permute.xlu0 %4098 }
 0x2de   : > { %v4101_v21 = vunpack.i.h.bf16 %v4099_v13  ;;  %v4100_v25 = vunpack.i.l.bf16 %v4099_v13 }
 0x2e0   : > { %v3536_v23 = vmax.f32 %v3524_v44, %v4101_v21  ;;  %v3531_v14 = vmax.f32 %v3523_v42, %v4100_v25 }
 0x2e2   : > { %3555 = vrot.lane.b32.xlu0 %v3536_v23, %s4741_s6 }
 0x2e5   : > { %v4104_v57 = vpop.permute.xlu0 %4103 }
 0x2e6   : > { %v4106_v33 = vunpack.i.h.bf16 %v4104_v57  ;;  %v4105_v10 = vunpack.i.l.bf16 %v4104_v57 }
 0x2e8   : > { %v3541_v3 = vmax.f32 %v3525_v22, %v4105_v10  ;;  %v3546_v27 = vmax.f32 %v3526_v28, %v4106_v33 }
 0x2ea   : > { %v4107_v0 = vpack.i.bf16 %v3541_v3, %v3531_v14  ;;  %v4112_v58 = vpack.i.bf16 %v3546_v27, %v3536_v23 }
 0x2ec   : > { %4108 = vrot.lane.b32.xlu1 %v4107_v0, %s4740_s5 }
 0x2f0   : > { %4113 = vrot.lane.b32.xlu1 %v4112_v58, %s4742_s7 }
 0x354   : > { %v3556_v54 = vpop.permute.xlu0 %3555 }
 0x35e   : > { %v4109_v60 = vpop.permute.xlu1 %4108 }
 0x35f   : > { %v4111_v32 = vunpack.i.h.bf16 %v4109_v60  ;;  %v4110_v11 = vunpack.i.l.bf16 %v4109_v60 }
 0x361   : > { %v3571_v6 = vsel %vm747_vm0, %v3541_v3, %v4111_v32  ;;  %v3566_v53 = vsel %vm747_vm0, %v3531_v14, %v4110_v11 }
 0x362   : > { %v4114_v30 = vpop.permute.xlu1 %4113 }
 0x363   : > { %v4116_v35 = vunpack.i.h.bf16 %v4114_v30  ;;  %v4115_v37 = vunpack.i.l.bf16 %v4114_v30 }
 0x365   : > { %v3568_v61 = vsel %vm3567_vm11, %v3566_v53, %v4115_v37  ;;  %v3572_v26 = vsel %vm3567_vm11, %v3571_v6, %v4116_v35 }
 0x366   : > { %v3570_v36 = vsel %vm3569_vm13, %v3568_v61, %v3556_v54 }
 0x367   : > { %v4060_v62 = vpack.c.bf16 %v3572_v26, %v3570_v36 }
 0x369   : > { %v3589_v59 = vsel %vm3587_vm15, %v4060_v62, %v3588_v1 }
 0x36a   : > { %3590 = vst [vmem:[%s198_s11] sm:$0xff] %v3589_v59 }
 0x36b PF: > { %s15_s12 = sadd.s32 1, %s4733_s12  }
 0x36c   : > { %p12_p2 = scmp.ge.s32.totalorder %s15_s12, 4  }
 0x36e   :  { %14 = sbr.rel (!%p12_p2) target bundleno = 2 (0x2), region = 75 }
 0x373   :  { %3612 = vsyncpa [#allocation3], 1 }
 0x374   :  { %3614 = vsyncpa [#allocation3 + $0x1], 1 }
 0x375   :  { %3615 = vsyncpa [#allocation5], 1 }

// kernel: cnn_forward.5
= control target key start
LH: loop header
LB: loop body
LE: loop exit
PB: predicated region body
PF: predicated region fallthrough
CT: control target
= control target key end

     0   :  { %v424_v36 = vlaneseq  ;;  %v4609_v37 = vmov 1966171168   ;;  %vm2506_vm0 = vcmask 261120   ;;  %s6068_s0 = inlined_call_operand.vmem [shape: bf16[2,1568], index: 0, kind: input, shape index: {}]   ;;  %s6069_s1 = inlined_call_operand.vmem [shape: bf16[1568,400], index: 1, kind: input, shape index: {}]   ;;  %s6070_s2 = inlined_call_operand.vmem [shape: f32[1,400], index: 2, kind: input, shape index: {}]   ;;  %s6071_s3 = inlined_call_operand.vmem [shape: bf16[400,80], index: 3, kind: input, shape index: {}]   ;;  %s6072_s4 = inlined_call_operand.vmem [shape: f32[1,80], index: 4, kind: input, shape index: {}]   ;;  %s6073_s5 = inlined_call_operand.vmem [shape: bf16[80,47], index: 5, kind: input, shape index: {}]   ;;  %s6074_s6 = inlined_call_operand.vmem [shape: f32[1,47], index: 6, kind: input, shape index: {}]   ;;  %s6075_s7 = inlined_call_operand.hbm [shape: f32[2,47], index: 7, kind: output, shape index: {}]  }
   0x1   :  { %v3967_v0 = vld [vmem:[%s6069_s1 + $0xe4] ss:$16 sps:$4 sm:$0xff]   ;;  %v3971_v2 = vld [vmem:[%s6069_s1 + $0xe0] ss:$16 sps:$4 sm:$0xff]   ;;  %v448_v38 = vunpack.c.l.s4 %v4609_v37 }
   0x2   :  { %v3969_v1 = vld [vmem:[%s6069_s1 + $0x2e4] ss:$16 sps:$4 sm:$0xff]   ;;  %2510 = vmatprep.subr.bf16.mxu0 %v3967_v0  ;;  %v3972_v3 = vld [vmem:[%s6069_s1 + $0x2e0] ss:$16 sps:$4 sm:$0xff]   ;;  %v4771_v42 = vshrl.u32 %v424_v36, 7 }
   0x3   :  { %2551 = vmatprep.subr.bf16.mxu1 %v3969_v1  ;;  %v3973_v4 = vld [vmem:[%s6069_s1 + $0xc4] ss:$16 sps:$4 sm:$0xff]   ;;  %2511 = vmatpush1.bf16.msra.mxu0 %v3971_v2  ;;  %v3977_v6 = vld [vmem:[%s6069_s1 + $0xc0] ss:$16 sps:$4 sm:$0xff]   ;;  %v449_v43 = vunpack.c.0.s8 %v448_v38 }
   0x4   :  { %2552 = vmatpush1.bf16.msra.mxu1 %v3972_v3  ;;  %v3975_v5 = vld [vmem:[%s6069_s1 + $0x2c4] ss:$16 sps:$4 sm:$0xff]   ;;  %2512 = vmatprep.subr.bf16.mxu0 %v3973_v4  ;;  %v3978_v7 = vld [vmem:[%s6069_s1 + $0x2c0] ss:$16 sps:$4 sm:$0xff]  }
   0x5   :  { %2553 = vmatprep.subr.bf16.mxu1 %v3975_v5  ;;  %v3979_v8 = vld [vmem:[%s6069_s1 + $0xa4] ss:$16 sps:$4 sm:$0xff]   ;;  %v3983_v10 = vld [vmem:[%s6069_s1 + $0xa0] ss:$16 sps:$4 sm:$0xff]   ;;  %v4789_v49 = vsub.s32 %v449_v43, %v4771_v42 }
   0x6   :  { %v3981_v9 = vld [vmem:[%s6069_s1 + $0x2a4] ss:$16 sps:$4 sm:$0xff]   ;;  %v3984_v11 = vld [vmem:[%s6069_s1 + $0x2a0] ss:$16 sps:$4 sm:$0xff]  }
   0x7   :  { %2513 = vmatpush1.bf16.msra.mxu0 %v3977_v6  ;;  %v3985_v12 = vld [vmem:[%s6069_s1 + $0x84] ss:$16 sps:$4 sm:$0xff]   ;;  %v3989_v14 = vld [vmem:[%s6069_s1 + $0x80] ss:$16 sps:$4 sm:$0xff]  }
   0x8   :  { %2554 = vmatpush1.bf16.msra.mxu1 %v3978_v7  ;;  %2514 = vmatprep.subr.bf16.mxu0 %v3979_v8  ;;  %v3987_v13 = vld [vmem:[%s6069_s1 + $0x284] ss:$16 sps:$4 sm:$0xff]   ;;  %v3990_v15 = vld [vmem:[%s6069_s1 + $0x280] ss:$16 sps:$4 sm:$0xff]  }
   0x9   :  { %2555 = vmatprep.subr.bf16.mxu1 %v3981_v9  ;;  %v3991_v16 = vld [vmem:[%s6069_s1 + $0x64] ss:$16 sps:$4 sm:$0xff]   ;;  %v3995_v18 = vld [vmem:[%s6069_s1 + $0x60] ss:$16 sps:$4 sm:$0xff]  }
   0xa   :  { %v3993_v17 = vld [vmem:[%s6069_s1 + $0x264] ss:$16 sps:$4 sm:$0xff]   ;;  %v3996_v19 = vld [vmem:[%s6069_s1 + $0x260] ss:$16 sps:$4 sm:$0xff]  }
   0xb   :  { %2515 = vmatpush1.bf16.msra.mxu0 %v3983_v10  ;;  %v3997_v20 = vld [vmem:[%s6069_s1 + $0x44] ss:$16 sps:$4 sm:$0xff]   ;;  %v4001_v22 = vld [vmem:[%s6069_s1 + $0x40] ss:$16 sps:$4 sm:$0xff]  }
   0xc   :  { %2556 = vmatpush1.bf16.msra.mxu1 %v3984_v11  ;;  %2516 = vmatprep.subr.bf16.mxu0 %v3985_v12  ;;  %v3999_v21 = vld [vmem:[%s6069_s1 + $0x244] ss:$16 sps:$4 sm:$0xff]   ;;  %v4002_v23 = vld [vmem:[%s6069_s1 + $0x240] ss:$16 sps:$4 sm:$0xff]  }
   0xd   :  { %2557 = vmatprep.subr.bf16.mxu1 %v3987_v13  ;;  %v4003_v24 = vld [vmem:[%s6069_s1 + $0x24] ss:$16 sps:$4 sm:$0xff]   ;;  %v4007_v26 = vld [vmem:[%s6069_s1 + $0x20] ss:$16 sps:$4 sm:$0xff]  }
   0xe   :  { %v4005_v25 = vld [vmem:[%s6069_s1 + $0x224] ss:$16 sps:$4 sm:$0xff]   ;;  %v4008_v27 = vld [vmem:[%s6069_s1 + $0x220] ss:$16 sps:$4 sm:$0xff]  }
   0xf   :  { %2517 = vmatpush1.bf16.msra.mxu0 %v3989_v14  ;;  %v4009_v28 = vld [vmem:[%s6069_s1 + $0x4] ss:$16 sps:$4 sm:$0xff]   ;;  %v4013_v30 = vld [vmem:[%s6069_s1] ss:$16 sps:$4 sm:$0xff]  }
  0x10   :  { %2558 = vmatpush1.bf16.msra.mxu1 %v3990_v15  ;;  %2518 = vmatprep.subr.bf16.mxu0 %v3991_v16  ;;  %v4011_v29 = vld [vmem:[%s6069_s1 + $0x204] ss:$16 sps:$4 sm:$0xff]   ;;  %v4014_v31 = vld [vmem:[%s6069_s1 + $0x200] ss:$16 sps:$4 sm:$0xff]  }
  0x11   :  { %2559 = vmatprep.subr.bf16.mxu1 %v3993_v17  ;;  %v4015_v32 = vld [vmem:[%s6069_s1 + $0x1e4] ss:$16 sps:$4 sm:$0xff]   ;;  %v4019_v34 = vld [vmem:[%s6069_s1 + $0x1e0] ss:$16 sps:$4 sm:$0xff]  }
  0x12   :  { %v4017_v33 = vld [vmem:[%s6069_s1 + $0x3e4] ss:$16 sps:$4 sm:$0xff]   ;;  %v4020_v35 = vld [vmem:[%s6069_s1 + $0x3e0] ss:$16 sps:$4 sm:$0xff]  }
  0x13   :  { %2519 = vmatpush1.bf16.msra.mxu0 %v3995_v18  ;;  %v4021_v39 = vld [vmem:[%s6069_s1 + $0x1c4] ss:$16 sps:$4 sm:$0xff]   ;;  %v4025_v41 = vld [vmem:[%s6069_s1 + $0x1c0] ss:$16 sps:$4 sm:$0xff]  }
  0x14   :  { %2560 = vmatpush1.bf16.msra.mxu1 %v3996_v19  ;;  %2520 = vmatprep.subr.bf16.mxu0 %v3997_v20  ;;  %v4023_v40 = vld [vmem:[%s6069_s1 + $0x3c4] ss:$16 sps:$4 sm:$0xff]   ;;  %v4026_v44 = vld [vmem:[%s6069_s1 + $0x3c0] ss:$16 sps:$4 sm:$0xff]  }
  0x15   :  { %2561 = vmatprep.subr.bf16.mxu1 %v3999_v21  ;;  %v4027_v45 = vld [vmem:[%s6069_s1 + $0x1a4] ss:$16 sps:$4 sm:$0xff]   ;;  %v4031_v47 = vld [vmem:[%s6069_s1 + $0x1a0] ss:$16 sps:$4 sm:$0xff]  }
  0x16   :  { %v4029_v46 = vld [vmem:[%s6069_s1 + $0x3a4] ss:$16 sps:$4 sm:$0xff]   ;;  %v4032_v48 = vld [vmem:[%s6069_s1 + $0x3a0] ss:$16 sps:$4 sm:$0xff]  }
  0x17   :  { %2521 = vmatpush1.bf16.msra.mxu0 %v4001_v22  ;;  %v4033_v50 = vld [vmem:[%s6069_s1 + $0x184] ss:$16 sps:$4 sm:$0xff]   ;;  %v4037_v53 = vld [vmem:[%s6069_s1 + $0x180] ss:$16 sps:$4 sm:$0xff]  }
  0x18   :  { %2562 = vmatpush1.bf16.msra.mxu1 %v4002_v23  ;;  %2522 = vmatprep.subr.bf16.mxu0 %v4003_v24  ;;  %v4035_v51 = vld [vmem:[%s6069_s1 + $0x384] ss:$16 sps:$4 sm:$0xff]   ;;  %v4038_v55 = vld [vmem:[%s6069_s1 + $0x380] ss:$16 sps:$4 sm:$0xff]  }
  0x19   :  { %2563 = vmatprep.subr.bf16.mxu1 %v4005_v25  ;;  %v28_v52 = vld [vmem:[%s6068_s0] sm:$0xff] }
  0x1a   :  { %v453_v54 = vrot.slane %v28_v52, %v4789_v49  ;;  %v4039_v56 = vld [vmem:[%s6069_s1 + $0x164] ss:$16 sps:$4 sm:$0xff]   ;;  %v4043_v59 = vld [vmem:[%s6069_s1 + $0x160] ss:$16 sps:$4 sm:$0xff]   ;;  %v446_v1 = vcombine.high %v28_v52, %v28_v52 }
  0x1b   :  { %2523 = vmatpush1.bf16.msra.mxu0 %v4007_v26  ;;  %v4041_v57 = vld [vmem:[%s6069_s1 + $0x364] ss:$16 sps:$4 sm:$0xff]   ;;  %v4044_v61 = vld [vmem:[%s6069_s1 + $0x360] ss:$16 sps:$4 sm:$0xff]  }
  0x1c   :  { %2564 = vmatpush1.bf16.msra.mxu1 %v4008_v27  ;;  %2524 = vmatprep.subr.bf16.mxu0 %v4009_v28  ;;  %v461_v58 = vcombine.high %v453_v54, %v453_v54  ;;  %v4045_v62 = vld [vmem:[%s6069_s1 + $0x144] ss:$16 sps:$4 sm:$0xff]   ;;  %v4049_v2 = vld [vmem:[%s6069_s1 + $0x140] ss:$16 sps:$4 sm:$0xff]   ;;  %v4847_v6 = vrot.slane %v446_v1, %v4789_v49  ;;  %v4867_v13 = vrot.slane %v453_v54, %v4789_v49 }
  0x1d   :  { %2565 = vmatprep.subr.bf16.mxu1 %v4011_v29  ;;  %v4047_v63 = vld [vmem:[%s6069_s1 + $0x344] ss:$16 sps:$4 sm:$0xff]   ;;  %v4050_v3 = vld [vmem:[%s6069_s1 + $0x340] ss:$16 sps:$4 sm:$0xff]  }
  0x1e   :  { %v4817_v60 = vrot.slane %v461_v58, %v4789_v49  ;;  %v4051_v4 = vld [vmem:[%s6069_s1 + $0x124] ss:$16 sps:$4 sm:$0xff]   ;;  %v4055_v7 = vld [vmem:[%s6069_s1 + $0x120] ss:$16 sps:$4 sm:$0xff]   ;;  %v462_v11 = vcombine.high %v4847_v6, %v4847_v6  ;;  %v4883_v18 = vcombine.high %v4867_v13, %v4867_v13 }
  0x1f   :  { %2525 = vmatpush1.bf16.msra.mxu0 %v4013_v30  ;;  %v4053_v5 = vld [vmem:[%s6069_s1 + $0x324] ss:$16 sps:$4 sm:$0xff]   ;;  %v4056_v8 = vld [vmem:[%s6069_s1 + $0x320] ss:$16 sps:$4 sm:$0xff]  }
  0x20   :  { %2566 = vmatpush1.bf16.msra.mxu1 %v4014_v31  ;;  %2526 = vmatprep.subr.bf16.mxu0 %v4015_v32  ;;  %v4830_v0 = vcombine.high %v4817_v60, %v4817_v60  ;;  %v4057_v9 = vld [vmem:[%s6069_s1 + $0x104] ss:$16 sps:$4 sm:$0xff]   ;;  %v4061_v12 = vld [vmem:[%s6069_s1 + $0x100] ss:$16 sps:$4 sm:$0xff]   ;;  %v4879_v17 = vrot.slane %v462_v11, %v4789_v49 }
  0x21   :  { %2567 = vmatprep.subr.bf16.mxu1 %v4017_v33  ;;  %2542 = vmatprep.mubr.bf16.mxu0 %v4817_v60  ;;  %v4059_v10 = vld [vmem:[%s6069_s1 + $0x304] ss:$16 sps:$4 sm:$0xff]   ;;  %v4062_v14 = vld [vmem:[%s6069_s1 + $0x300] ss:$16 sps:$4 sm:$0xff]  }
  0x22   :  { %2583 = vmatprep.mubr.bf16.mxu1 %v4830_v0  ;;  %v4065_v15 = vld [vmem:[%s6069_s1 + $0x4e4] ss:$16 sps:$4 sm:$0xff]   ;;  %v4063_v19 = vld [vmem:[%s6069_s1 + $0x4e0] ss:$16 sps:$4 sm:$0xff]   ;;  %v4899_v23 = vcombine.high %v4879_v17, %v4879_v17 }
  0x23   :  { %2527 = vmatpush2.bf16.msra.mxu0 %v4019_v34  ;;  %v4068_v16 = vld [vmem:[%s6069_s1 + $0x6e4] ss:$16 sps:$4 sm:$0xff]   ;;  %v4066_v20 = vld [vmem:[%s6069_s1 + $0x6e0] ss:$16 sps:$4 sm:$0xff]  }
  0x24   :  { %2568 = vmatpush2.bf16.msra.mxu1 %v4020_v35  ;;  %2528 = vmatprep.subr.bf16.mxu0 %v4021_v39  ;;  %v4071_v21 = vld [vmem:[%s6069_s1 + $0x4c4] ss:$16 sps:$4 sm:$0xff]   ;;  %v4069_v24 = vld [vmem:[%s6069_s1 + $0x4c0] ss:$16 sps:$4 sm:$0xff]  }
  0x25   :  { %2569 = vmatprep.subr.bf16.mxu1 %v4023_v40  ;;  %v4074_v22 = vld [vmem:[%s6069_s1 + $0x6c4] ss:$16 sps:$4 sm:$0xff]   ;;  %v4072_v25 = vld [vmem:[%s6069_s1 + $0x6c0] ss:$16 sps:$4 sm:$0xff]  }
  0x26   :  { %v4077_v26 = vld [vmem:[%s6069_s1 + $0x4a4] ss:$16 sps:$4 sm:$0xff]   ;;  %v4075_v28 = vld [vmem:[%s6069_s1 + $0x4a0] ss:$16 sps:$4 sm:$0xff]  }
  0x27   :  { %2529 = vmatpush2.bf16.msra.mxu0 %v4025_v41  ;;  %v4080_v27 = vld [vmem:[%s6069_s1 + $0x6a4] ss:$16 sps:$4 sm:$0xff]   ;;  %v4078_v29 = vld [vmem:[%s6069_s1 + $0x6a0] ss:$16 sps:$4 sm:$0xff]  }
  0x28   :  { %2570 = vmatpush2.bf16.msra.mxu1 %v4026_v44  ;;  %2530 = vmatprep.subr.bf16.mxu0 %v4027_v45  ;;  %v4083_v30 = vld [vmem:[%s6069_s1 + $0x484] ss:$16 sps:$4 sm:$0xff]   ;;  %v4081_v32 = vld [vmem:[%s6069_s1 + $0x480] ss:$16 sps:$4 sm:$0xff]  }
  0x29   :  { %2571 = vmatprep.subr.bf16.mxu1 %v4029_v46  ;;  %v4086_v31 = vld [vmem:[%s6069_s1 + $0x684] ss:$16 sps:$4 sm:$0xff]   ;;  %v4084_v33 = vld [vmem:[%s6069_s1 + $0x680] ss:$16 sps:$4 sm:$0xff]  }
  0x2a   :  { %v4089_v34 = vld [vmem:[%s6069_s1 + $0x464] ss:$16 sps:$4 sm:$0xff]   ;;  %v4087_v36 = vld [vmem:[%s6069_s1 + $0x460] ss:$16 sps:$4 sm:$0xff]  }
  0x2b   :  { %2531 = vmatpush2.bf16.msra.mxu0 %v4031_v47  ;;  %v4092_v35 = vld [vmem:[%s6069_s1 + $0x664] ss:$16 sps:$4 sm:$0xff]   ;;  %v4090_v37 = vld [vmem:[%s6069_s1 + $0x660] ss:$16 sps:$4 sm:$0xff]  }
  0x2c   :  { %2572 = vmatpush2.bf16.msra.mxu1 %v4032_v48  ;;  %2532 = vmatprep.subr.bf16.mxu0 %v4033_v50  ;;  %v4095_v38 = vld [vmem:[%s6069_s1 + $0x444] ss:$16 sps:$4 sm:$0xff]   ;;  %v4093_v40 = vld [vmem:[%s6069_s1 + $0x440] ss:$16 sps:$4 sm:$0xff]  }
  0x2d   :  { %2573 = vmatprep.subr.bf16.mxu1 %v4035_v51  ;;  %v4098_v39 = vld [vmem:[%s6069_s1 + $0x644] ss:$16 sps:$4 sm:$0xff]   ;;  %v4096_v41 = vld [vmem:[%s6069_s1 + $0x640] ss:$16 sps:$4 sm:$0xff]  }
  0x2e   :  { %v4101_v43 = vld [vmem:[%s6069_s1 + $0x424] ss:$16 sps:$4 sm:$0xff]   ;;  %v4099_v45 = vld [vmem:[%s6069_s1 + $0x420] ss:$16 sps:$4 sm:$0xff]  }
  0x2f   :  { %2533 = vmatpush2.bf16.msra.mxu0 %v4037_v53  ;;  %v4104_v44 = vld [vmem:[%s6069_s1 + $0x624] ss:$16 sps:$4 sm:$0xff]   ;;  %v4102_v46 = vld [vmem:[%s6069_s1 + $0x620] ss:$16 sps:$4 sm:$0xff]  }
  0x30   :  { %2574 = vmatpush2.bf16.msra.mxu1 %v4038_v55  ;;  %2534 = vmatprep.subr.bf16.mxu0 %v4039_v56  ;;  %v4107_v47 = vld [vmem:[%s6069_s1 + $0x404] ss:$16 sps:$4 sm:$0xff]   ;;  %v4105_v50 = vld [vmem:[%s6069_s1 + $0x400] ss:$16 sps:$4 sm:$0xff]  }
  0x31   :  { %2575 = vmatprep.subr.bf16.mxu1 %v4041_v57  ;;  %v4110_v48 = vld [vmem:[%s6069_s1 + $0x604] ss:$16 sps:$4 sm:$0xff]   ;;  %v4108_v51 = vld [vmem:[%s6069_s1 + $0x600] ss:$16 sps:$4 sm:$0xff]  }
  0x32   :  { %v4113_v52 = vld [vmem:[%s6069_s1 + $0x5e4] ss:$16 sps:$4 sm:$0xff]   ;;  %v4111_v54 = vld [vmem:[%s6069_s1 + $0x5e0] ss:$16 sps:$4 sm:$0xff]  }
  0x33   :  { %2535 = vmatpush2.bf16.msra.mxu0 %v4043_v59  ;;  %v4116_v53 = vld [vmem:[%s6069_s1 + $0x7e4] ss:$16 sps:$4 sm:$0xff]   ;;  %v4114_v55 = vld [vmem:[%s6069_s1 + $0x7e0] ss:$16 sps:$4 sm:$0xff]  }
  0x34   :  { %2576 = vmatpush2.bf16.msra.mxu1 %v4044_v61  ;;  %2536 = vmatprep.subr.bf16.mxu0 %v4045_v62  ;;  %v4119_v56 = vld [vmem:[%s6069_s1 + $0x5c4] ss:$16 sps:$4 sm:$0xff]   ;;  %v4117_v58 = vld [vmem:[%s6069_s1 + $0x5c0] ss:$16 sps:$4 sm:$0xff]  }
  0x35   :  { %2577 = vmatprep.subr.bf16.mxu1 %v4047_v63  ;;  %v4122_v57 = vld [vmem:[%s6069_s1 + $0x7c4] ss:$16 sps:$4 sm:$0xff]   ;;  %v4120_v59 = vld [vmem:[%s6069_s1 + $0x7c0] ss:$16 sps:$4 sm:$0xff]  }
  0x36   :  { %v4125_v61 = vld [vmem:[%s6069_s1 + $0x5a4] ss:$16 sps:$4 sm:$0xff]   ;;  %v4123_v63 = vld [vmem:[%s6069_s1 + $0x5a0] ss:$16 sps:$4 sm:$0xff]  }
  0x37   :  { %2537 = vmatpush2.bf16.msra.mxu0 %v4049_v2  ;;  %v4128_v62 = vld [vmem:[%s6069_s1 + $0x7a4] ss:$16 sps:$4 sm:$0xff]   ;;  %v4126_v1 = vld [vmem:[%s6069_s1 + $0x7a0] ss:$16 sps:$4 sm:$0xff]  }
  0x38   :  { %2578 = vmatpush2.bf16.msra.mxu1 %v4050_v3  ;;  %2538 = vmatprep.subr.bf16.mxu0 %v4051_v4  ;;  %v4131_v2 = vld [vmem:[%s6069_s1 + $0x584] ss:$16 sps:$4 sm:$0xff]   ;;  %v4129_v4 = vld [vmem:[%s6069_s1 + $0x580] ss:$16 sps:$4 sm:$0xff]  }
  0x39   :  { %2579 = vmatprep.subr.bf16.mxu1 %v4053_v5  ;;  %v4134_v3 = vld [vmem:[%s6069_s1 + $0x784] ss:$16 sps:$4 sm:$0xff]   ;;  %v4132_v5 = vld [vmem:[%s6069_s1 + $0x780] ss:$16 sps:$4 sm:$0xff]  }
  0x3a   :  { %v4143_v11 = vld [vmem:[%s6069_s1 + $0x544] ss:$16 sps:$4 sm:$0xff]  }
  0x3b   :  { %2539 = vmatpush2.bf16.msra.mxu0 %v4055_v7  ;;  %v4137_v7 = vld [vmem:[%s6069_s1 + $0x564] ss:$16 sps:$4 sm:$0xff]  }
  0x3c   :  { %2580 = vmatpush2.bf16.msra.mxu1 %v4056_v8  ;;  %2540 = vmatprep.subr.bf16.mxu0 %v4057_v9  ;;  %v4140_v8 = vld [vmem:[%s6069_s1 + $0x764] ss:$16 sps:$4 sm:$0xff]   ;;  %v4135_v9 = vld [vmem:[%s6069_s1 + $0x560] ss:$16 sps:$4 sm:$0xff]  }
  0x3d   :  { %2581 = vmatprep.subr.bf16.mxu1 %v4059_v10  ;;  %v4138_v10 = vld [vmem:[%s6069_s1 + $0x760] ss:$16 sps:$4 sm:$0xff]  }
  0x3f   :  { %2541 = vmatpush2.bf16.msra.mxu0 %v4061_v12  ;;  %v4146_v12 = vld [vmem:[%s6069_s1 + $0x744] ss:$16 sps:$4 sm:$0xff]  }
  0x40   :  { %2582 = vmatpush2.bf16.msra.mxu1 %v4062_v14  ;;  %2592 = vmatprep.subr.bf16.mxu0 %v4065_v15  ;;  %v4141_v14 = vld [vmem:[%s6069_s1 + $0x540] ss:$16 sps:$4 sm:$0xff]  }
  0x41   :  { %2633 = vmatprep.subr.bf16.mxu1 %v4068_v16  ;;  %v4144_v15 = vld [vmem:[%s6069_s1 + $0x740] ss:$16 sps:$4 sm:$0xff]   ;;  %v4149_v16 = vld [vmem:[%s6069_s1 + $0x524] ss:$16 sps:$4 sm:$0xff]  }
  0x42   :  { %2543 = vmatmul.mubr.bf16.vlgmr.msra.gmra.mxu0 %v4867_v13 }
  0x43   :  { %2584 = vmatmul.mubr.bf16.vlgmr.msra.gmra.mxu1 %v4883_v18  ;;  %2593 = vmatpush1.bf16.msra.mxu0 %v4063_v19  ;;  %v4152_v19 = vld [vmem:[%s6069_s1 + $0x724] ss:$16 sps:$4 sm:$0xff]  }
  0x44   :  { %2634 = vmatpush1.bf16.msra.mxu1 %v4066_v20  ;;  %2594 = vmatprep.subr.bf16.mxu0 %v4071_v21  ;;  %v4147_v20 = vld [vmem:[%s6069_s1 + $0x520] ss:$16 sps:$4 sm:$0xff]  }
  0x45   :  { %2635 = vmatprep.subr.bf16.mxu1 %v4074_v22  ;;  %2624 = vmatprep.mubr.bf16.mxu0 %v4879_v17  ;;  %v4150_v21 = vld [vmem:[%s6069_s1 + $0x720] ss:$16 sps:$4 sm:$0xff]   ;;  %v4155_v22 = vld [vmem:[%s6069_s1 + $0x504] ss:$16 sps:$4 sm:$0xff]  }
  0x46   :  { %2665 = vmatprep.mubr.bf16.mxu1 %v4899_v23 }
  0x47   :  { %2595 = vmatpush1.bf16.msra.mxu0 %v4069_v24  ;;  %v4158_v24 = vld [vmem:[%s6069_s1 + $0x704] ss:$16 sps:$4 sm:$0xff]  }
  0x48   :  { %2636 = vmatpush1.bf16.msra.mxu1 %v4072_v25  ;;  %2596 = vmatprep.subr.bf16.mxu0 %v4077_v26  ;;  %v4153_v25 = vld [vmem:[%s6069_s1 + $0x500] ss:$16 sps:$4 sm:$0xff]   ;;  %v5078_v26 = vrot.slane %v4847_v6, %v4789_v49 }
  0x49   :  { %2637 = vmatprep.subr.bf16.mxu1 %v4080_v27  ;;  %v4156_v27 = vld [vmem:[%s6069_s1 + $0x700] ss:$16 sps:$4 sm:$0xff]  }
  0x4a   :  { %v5091_v6 = vcombine.high %v5078_v26, %v5078_v26 }
  0x4b   :  { %2597 = vmatpush1.bf16.msra.mxu0 %v4075_v28  ;;  %v4162_v28 = vld [vmem:[%s6069_s1 + $0x8e4] ss:$16 sps:$4 sm:$0xff]  }
  0x4c   :  { %2638 = vmatpush1.bf16.msra.mxu1 %v4078_v29  ;;  %2598 = vmatprep.subr.bf16.mxu0 %v4083_v30  ;;  %v4165_v29 = vld [vmem:[%s6069_s1 + $0xae4] ss:$16 sps:$4 sm:$0xff]   ;;  %v4160_v30 = vld [vmem:[%s6069_s1 + $0x8e0] ss:$16 sps:$4 sm:$0xff]  }
  0x4d   :  { %2639 = vmatprep.subr.bf16.mxu1 %v4086_v31  ;;  %v4163_v31 = vld [vmem:[%s6069_s1 + $0xae0] ss:$16 sps:$4 sm:$0xff]  }
  0x4f   :  { %2599 = vmatpush1.bf16.msra.mxu0 %v4081_v32  ;;  %v5102_v32 = vld [vmem:[%s6068_s0 + $0x8] sm:$0x1f] }
  0x50   :  { %2640 = vmatpush1.bf16.msra.mxu1 %v4084_v33  ;;  %2600 = vmatprep.subr.bf16.mxu0 %v4089_v34  ;;  %v4168_v33 = vld [vmem:[%s6069_s1 + $0x8c4] ss:$16 sps:$4 sm:$0xff]  }
  0x51   :  { %2641 = vmatprep.subr.bf16.mxu1 %v4092_v35  ;;  %v4171_v34 = vld [vmem:[%s6069_s1 + $0xac4] ss:$16 sps:$4 sm:$0xff]   ;;  %v5112_v35 = vrot.slane %v5102_v32, %v4789_v49 }
  0x53   :  { %2601 = vmatpush1.bf16.msra.mxu0 %v4087_v36  ;;  %v510_v36 = vcombine.high %v5112_v35, %v5112_v35 }
  0x54   :  { %2642 = vmatpush1.bf16.msra.mxu1 %v4090_v37  ;;  %2602 = vmatprep.subr.bf16.mxu0 %v4095_v38  ;;  %v4166_v37 = vld [vmem:[%s6069_s1 + $0x8c0] ss:$16 sps:$4 sm:$0xff]  }
  0x55   :  { %2643 = vmatprep.subr.bf16.mxu1 %v4098_v39  ;;  %v4169_v38 = vld [vmem:[%s6069_s1 + $0xac0] ss:$16 sps:$4 sm:$0xff]   ;;  %v4174_v39 = vld [vmem:[%s6069_s1 + $0x8a4] ss:$16 sps:$4 sm:$0xff]  }
  0x57   :  { %2603 = vmatpush1.bf16.msra.mxu0 %v4093_v40  ;;  %v4177_v40 = vld [vmem:[%s6069_s1 + $0xaa4] ss:$16 sps:$4 sm:$0xff]  }
  0x58   :  { %2644 = vmatpush1.bf16.msra.mxu1 %v4096_v41  ;;  %2604 = vmatprep.subr.bf16.mxu0 %v4101_v43  ;;  %v5131_v41 = vrot.slane %v510_v36, %v4789_v49  ;;  %v4241_v36 = vld [vmem:[%s6069_s1 + $0xb40] ss:$16 sps:$4 sm:$0xff]  }
  0x59   :  { %2645 = vmatprep.subr.bf16.mxu1 %v4104_v44  ;;  %v4172_v44 = vld [vmem:[%s6069_s1 + $0x8a0] ss:$16 sps:$4 sm:$0xff]  }
  0x5a   :  { %v5136_v43 = vcombine.high %v5131_v41, %v5131_v41 }
  0x5b   :  { %2605 = vmatpush1.bf16.msra.mxu0 %v4099_v45  ;;  %v4175_v45 = vld [vmem:[%s6069_s1 + $0xaa0] ss:$16 sps:$4 sm:$0xff]  }
  0x5c   :  { %2646 = vmatpush1.bf16.msra.mxu1 %v4102_v46  ;;  %2606 = vmatprep.subr.bf16.mxu0 %v4107_v47  ;;  %v4180_v46 = vld [vmem:[%s6069_s1 + $0x884] ss:$16 sps:$4 sm:$0xff]  }
  0x5d   :  { %2647 = vmatprep.subr.bf16.mxu1 %v4110_v48  ;;  %v4183_v47 = vld [vmem:[%s6069_s1 + $0xa84] ss:$16 sps:$4 sm:$0xff]   ;;  %v4178_v48 = vld [vmem:[%s6069_s1 + $0x880] ss:$16 sps:$4 sm:$0xff]  }
  0x5f   :  { %2607 = vmatpush1.bf16.msra.mxu0 %v4105_v50  ;;  %v4181_v50 = vld [vmem:[%s6069_s1 + $0xa80] ss:$16 sps:$4 sm:$0xff]  }
  0x60   :  { %2648 = vmatpush1.bf16.msra.mxu1 %v4108_v51  ;;  %2608 = vmatprep.subr.bf16.mxu0 %v4113_v52  ;;  %v4186_v51 = vld [vmem:[%s6069_s1 + $0x864] ss:$16 sps:$4 sm:$0xff]  }
  0x61   :  { %2649 = vmatprep.subr.bf16.mxu1 %v4116_v53  ;;  %v4189_v52 = vld [vmem:[%s6069_s1 + $0xa64] ss:$16 sps:$4 sm:$0xff]   ;;  %v4184_v53 = vld [vmem:[%s6069_s1 + $0x860] ss:$16 sps:$4 sm:$0xff]  }
  0x63   :  { %2609 = vmatpush2.bf16.msra.mxu0 %v4111_v54  ;;  %v4187_v54 = vld [vmem:[%s6069_s1 + $0xa60] ss:$16 sps:$4 sm:$0xff]  }
  0x64   :  { %2650 = vmatpush2.bf16.msra.mxu1 %v4114_v55  ;;  %2610 = vmatprep.subr.bf16.mxu0 %v4119_v56  ;;  %v4192_v55 = vld [vmem:[%s6069_s1 + $0x844] ss:$16 sps:$4 sm:$0xff]  }
  0x65   :  { %2651 = vmatprep.subr.bf16.mxu1 %v4122_v57  ;;  %v4195_v56 = vld [vmem:[%s6069_s1 + $0xa44] ss:$16 sps:$4 sm:$0xff]   ;;  %v4190_v57 = vld [vmem:[%s6069_s1 + $0x840] ss:$16 sps:$4 sm:$0xff]  }
  0x67   :  { %2611 = vmatpush2.bf16.msra.mxu0 %v4117_v58  ;;  %v4193_v58 = vld [vmem:[%s6069_s1 + $0xa40] ss:$16 sps:$4 sm:$0xff]  }
  0x68   :  { %2652 = vmatpush2.bf16.msra.mxu1 %v4120_v59  ;;  %2612 = vmatprep.subr.bf16.mxu0 %v4125_v61  ;;  %v4198_v59 = vld [vmem:[%s6069_s1 + $0x824] ss:$16 sps:$4 sm:$0xff]  }
  0x69   :  { %2653 = vmatprep.subr.bf16.mxu1 %v4128_v62  ;;  %v4201_v61 = vld [vmem:[%s6069_s1 + $0xa24] ss:$16 sps:$4 sm:$0xff]   ;;  %v4196_v62 = vld [vmem:[%s6069_s1 + $0x820] ss:$16 sps:$4 sm:$0xff]  }
  0x6b   :  { %2613 = vmatpush2.bf16.msra.mxu0 %v4123_v63  ;;  %v4199_v63 = vld [vmem:[%s6069_s1 + $0xa20] ss:$16 sps:$4 sm:$0xff]  }
  0x6c   :  { %2654 = vmatpush2.bf16.msra.mxu1 %v4126_v1  ;;  %2614 = vmatprep.subr.bf16.mxu0 %v4131_v2  ;;  %v4204_v1 = vld [vmem:[%s6069_s1 + $0x804] ss:$16 sps:$4 sm:$0xff]  }
  0x6d   :  { %2655 = vmatprep.subr.bf16.mxu1 %v4134_v3  ;;  %v4207_v2 = vld [vmem:[%s6069_s1 + $0xa04] ss:$16 sps:$4 sm:$0xff]   ;;  %v4202_v3 = vld [vmem:[%s6069_s1 + $0x800] ss:$16 sps:$4 sm:$0xff]  }
  0x6f   :  { %2615 = vmatpush2.bf16.msra.mxu0 %v4129_v4  ;;  %v4205_v4 = vld [vmem:[%s6069_s1 + $0xa00] ss:$16 sps:$4 sm:$0xff]  }
  0x70   :  { %2656 = vmatpush2.bf16.msra.mxu1 %v4132_v5  ;;  %2616 = vmatprep.subr.bf16.mxu0 %v4137_v7  ;;  %v4210_v5 = vld [vmem:[%s6069_s1 + $0x9e4] ss:$16 sps:$4 sm:$0xff]  }
  0x71   :  { %2657 = vmatprep.subr.bf16.mxu1 %v4140_v8  ;;  %v4213_v7 = vld [vmem:[%s6069_s1 + $0xbe4] ss:$16 sps:$4 sm:$0xff]   ;;  %v4208_v8 = vld [vmem:[%s6069_s1 + $0x9e0] ss:$16 sps:$4 sm:$0xff]  }
  0x73   :  { %2617 = vmatpush2.bf16.msra.mxu0 %v4135_v9  ;;  %v4211_v9 = vld [vmem:[%s6069_s1 + $0xbe0] ss:$16 sps:$4 sm:$0xff]  }
  0x74   :  { %2658 = vmatpush2.bf16.msra.mxu1 %v4138_v10  ;;  %2618 = vmatprep.subr.bf16.mxu0 %v4143_v11  ;;  %v4216_v10 = vld [vmem:[%s6069_s1 + $0x9c4] ss:$16 sps:$4 sm:$0xff]  }
  0x75   :  { %2659 = vmatprep.subr.bf16.mxu1 %v4146_v12  ;;  %v4219_v11 = vld [vmem:[%s6069_s1 + $0xbc4] ss:$16 sps:$4 sm:$0xff]   ;;  %v4214_v12 = vld [vmem:[%s6069_s1 + $0x9c0] ss:$16 sps:$4 sm:$0xff]  }
  0x77   :  { %2619 = vmatpush2.bf16.msra.mxu0 %v4141_v14  ;;  %v4217_v14 = vld [vmem:[%s6069_s1 + $0xbc0] ss:$16 sps:$4 sm:$0xff]  }
  0x78   :  { %2660 = vmatpush2.bf16.msra.mxu1 %v4144_v15  ;;  %2620 = vmatprep.subr.bf16.mxu0 %v4149_v16  ;;  %v4222_v15 = vld [vmem:[%s6069_s1 + $0x9a4] ss:$16 sps:$4 sm:$0xff]  }
  0x79   :  { %2661 = vmatprep.subr.bf16.mxu1 %v4152_v19  ;;  %v4225_v16 = vld [vmem:[%s6069_s1 + $0xba4] ss:$16 sps:$4 sm:$0xff]   ;;  %v4220_v19 = vld [vmem:[%s6069_s1 + $0x9a0] ss:$16 sps:$4 sm:$0xff]  }
  0x7b   :  { %2621 = vmatpush2.bf16.msra.mxu0 %v4147_v20  ;;  %v4223_v20 = vld [vmem:[%s6069_s1 + $0xba0] ss:$16 sps:$4 sm:$0xff]  }
  0x7c   :  { %2662 = vmatpush2.bf16.msra.mxu1 %v4150_v21  ;;  %2622 = vmatprep.subr.bf16.mxu0 %v4155_v22  ;;  %v4228_v21 = vld [vmem:[%s6069_s1 + $0x984] ss:$16 sps:$4 sm:$0xff]  }
  0x7d   :  { %2663 = vmatprep.subr.bf16.mxu1 %v4158_v24  ;;  %v4231_v22 = vld [vmem:[%s6069_s1 + $0xb84] ss:$16 sps:$4 sm:$0xff]   ;;  %v4226_v24 = vld [vmem:[%s6069_s1 + $0x980] ss:$16 sps:$4 sm:$0xff]  }
  0x7f   :  { %2623 = vmatpush2.bf16.msra.mxu0 %v4153_v25  ;;  %v4229_v25 = vld [vmem:[%s6069_s1 + $0xb80] ss:$16 sps:$4 sm:$0xff]  }
  0x80   :  { %2664 = vmatpush2.bf16.msra.mxu1 %v4156_v27  ;;  %2674 = vmatprep.subr.bf16.mxu0 %v4162_v28  ;;  %v4234_v27 = vld [vmem:[%s6069_s1 + $0x964] ss:$16 sps:$4 sm:$0xff]  }
  0x81   :  { %2715 = vmatprep.subr.bf16.mxu1 %v4165_v29  ;;  %v4237_v28 = vld [vmem:[%s6069_s1 + $0xb64] ss:$16 sps:$4 sm:$0xff]   ;;  %v4232_v29 = vld [vmem:[%s6069_s1 + $0x960] ss:$16 sps:$4 sm:$0xff]  }
  0x82   :  { %2625 = vmatmul.mubr.bf16.vlgmr.msra.gmra.mxu0 %v5078_v26 }
  0x83   :  { %2666 = vmatmul.mubr.bf16.vlgmr.msra.gmra.mxu1 %v5091_v6  ;;  %2675 = vmatpush1.bf16.msra.mxu0 %v4160_v30  ;;  %v4235_v30 = vld [vmem:[%s6069_s1 + $0xb60] ss:$16 sps:$4 sm:$0xff]  }
  0x84   :  { %2716 = vmatpush1.bf16.msra.mxu1 %v4163_v31  ;;  %2676 = vmatprep.subr.bf16.mxu0 %v4168_v33  ;;  %v4240_v31 = vld [vmem:[%s6069_s1 + $0x944] ss:$16 sps:$4 sm:$0xff]  }
  0x85   :  { %2717 = vmatprep.subr.bf16.mxu1 %v4171_v34  ;;  %2706 = vmatprep.mubr.bf16.mxu0 %v5131_v41  ;;  %v4243_v33 = vld [vmem:[%s6069_s1 + $0xb44] ss:$16 sps:$4 sm:$0xff]   ;;  %v4238_v34 = vld [vmem:[%s6069_s1 + $0x940] ss:$16 sps:$4 sm:$0xff]  }
  0x86   :  { %2747 = vmatprep.mubr.bf16.mxu1 %v5136_v43 }
  0x87   :  { %2677 = vmatpush1.bf16.msra.mxu0 %v4166_v37  ;;  %v4246_v37 = vld [vmem:[%s6069_s1 + $0x924] ss:$16 sps:$4 sm:$0xff]  }
  0x88   :  { %2718 = vmatpush1.bf16.msra.mxu1 %v4169_v38  ;;  %2678 = vmatprep.subr.bf16.mxu0 %v4174_v39  ;;  %v4249_v38 = vld [vmem:[%s6069_s1 + $0xb24] ss:$16 sps:$4 sm:$0xff]   ;;  %v4244_v39 = vld [vmem:[%s6069_s1 + $0x920] ss:$16 sps:$4 sm:$0xff]  }
  0x89   :  { %2719 = vmatprep.subr.bf16.mxu1 %v4177_v40  ;;  %v4247_v40 = vld [vmem:[%s6069_s1 + $0xb20] ss:$16 sps:$4 sm:$0xff]  }
  0x8b   :  { %2679 = vmatpush1.bf16.msra.mxu0 %v4172_v44  ;;  %v4252_v44 = vld [vmem:[%s6069_s1 + $0x904] ss:$16 sps:$4 sm:$0xff]  }
  0x8c   :  { %2720 = vmatpush1.bf16.msra.mxu1 %v4175_v45  ;;  %2680 = vmatprep.subr.bf16.mxu0 %v4180_v46  ;;  %v4255_v45 = vld [vmem:[%s6069_s1 + $0xb04] ss:$16 sps:$4 sm:$0xff]   ;;  %v4250_v46 = vld [vmem:[%s6069_s1 + $0x900] ss:$16 sps:$4 sm:$0xff]  }
  0x8d   :  { %2721 = vmatprep.subr.bf16.mxu1 %v4183_v47  ;;  %v5300_v47 = vrot.slane %v5112_v35, %v4789_v49  ;;  %v495_v35 = vcombine.high %v5102_v32, %v5102_v32  ;;  %v4268_v32 = vld [vmem:[%s6069_s1 + $0x2cc] ss:$16 sps:$4 sm:$0xff]  }
  0x8f   :  { %2681 = vmatpush1.bf16.msra.mxu0 %v4178_v48  ;;  %v4253_v48 = vld [vmem:[%s6069_s1 + $0xb00] ss:$16 sps:$4 sm:$0xff]  }
  0x90   :  { %2722 = vmatpush1.bf16.msra.mxu1 %v4181_v50  ;;  %2682 = vmatprep.subr.bf16.mxu0 %v4186_v51  ;;  %v4259_v50 = vld [vmem:[%s6069_s1 + $0xc24] ss:$16 sps:$4 sm:$0xff]   ;;  %v4262_v51 = vld [vmem:[%s6069_s1 + $0x2ec] ss:$16 sps:$4 sm:$0xff]  }
  0x91   :  { %2723 = vmatprep.subr.bf16.mxu1 %v4189_v52  ;;  %v5315_v52 = vcombine.high %v5300_v47, %v5300_v47 }
  0x93   :  { %2683 = vmatpush1.bf16.msra.mxu0 %v4184_v53  ;;  %v4257_v53 = vld [vmem:[%s6069_s1 + $0xc20] ss:$16 sps:$4 sm:$0xff]  }
  0x94   :  { %2724 = vmatpush1.bf16.msra.mxu1 %v4187_v54  ;;  %2684 = vmatprep.subr.bf16.mxu0 %v4192_v55  ;;  %v4260_v54 = vld [vmem:[%s6069_s1 + $0x2e8] ss:$16 sps:$4 sm:$0xff]   ;;  %v4265_v55 = vld [vmem:[%s6069_s1 + $0xc04] ss:$16 sps:$4 sm:$0xff]  }
  0x95   :  { %2725 = vmatprep.subr.bf16.mxu1 %v4195_v56  ;;  %v509_v56 = vrot.slane %v495_v35, %v4789_v49  ;;  %v4332_v35 = vld [vmem:[%s6069_s1 + $0x368] ss:$16 sps:$4 sm:$0xff]  }
  0x97   :  { %2685 = vmatpush1.bf16.msra.mxu0 %v4190_v57  ;;  %v4263_v57 = vld [vmem:[%s6069_s1 + $0xc00] ss:$16 sps:$4 sm:$0xff]  }
  0x98   :  { %2726 = vmatpush1.bf16.msra.mxu1 %v4193_v58  ;;  %2686 = vmatprep.subr.bf16.mxu0 %v4198_v59  ;;  %v4266_v58 = vld [vmem:[%s6069_s1 + $0x2c8] ss:$16 sps:$4 sm:$0xff]   ;;  %v4271_v59 = vld [vmem:[%s6069_s1 + $0xec] ss:$16 sps:$4 sm:$0xff]  }
  0x99   :  { %2727 = vmatprep.subr.bf16.mxu1 %v4201_v61  ;;  %v4274_v61 = vld [vmem:[%s6069_s1 + $0x2ac] ss:$16 sps:$4 sm:$0xff]  }
  0x9b   :  { %2687 = vmatpush1.bf16.msra.mxu0 %v4196_v62  ;;  %v4610_v62 = vmov 0  }
  0x9c   :  { %2728 = vmatpush1.bf16.msra.mxu1 %v4199_v63  ;;  %2688 = vmatprep.subr.bf16.mxu0 %v4204_v1  ;;  %v5347_v63 = vrot.slane %v509_v56, %v4789_v49  ;;  %v4269_v1 = vld [vmem:[%s6069_s1 + $0xe8] ss:$16 sps:$4 sm:$0xff]   ;;  %v4280_v49 = vld [vmem:[%s6069_s1 + $0x28c] ss:$16 sps:$4 sm:$0xff]  }
  0x9d   :  { %2729 = vmatprep.subr.bf16.mxu1 %v4207_v2  ;;  %v4272_v2 = vld [vmem:[%s6069_s1 + $0x2a8] ss:$16 sps:$4 sm:$0xff]   ;;  %v4343_v56 = vld [vmem:[%s6069_s1 + $0x16c] ss:$16 sps:$4 sm:$0xff]  }
  0x9f   :  { %2689 = vmatpush1.bf16.msra.mxu0 %v4202_v3  ;;  %v4277_v3 = vld [vmem:[%s6069_s1 + $0xcc] ss:$16 sps:$4 sm:$0xff]  }
  0xa0   :  { %2730 = vmatpush1.bf16.msra.mxu1 %v4205_v4  ;;  %2690 = vmatprep.subr.bf16.mxu0 %v4210_v5  ;;  %v4278_v4 = vld [vmem:[%s6069_s1 + $0x288] ss:$16 sps:$4 sm:$0xff]   ;;  %v4283_v5 = vld [vmem:[%s6069_s1 + $0xac] ss:$16 sps:$4 sm:$0xff]  }
  0xa1   :  { %2731 = vmatprep.subr.bf16.mxu1 %v4213_v7  ;;  %v4286_v7 = vld [vmem:[%s6069_s1 + $0x26c] ss:$16 sps:$4 sm:$0xff]  }
  0xa3   :  { %2691 = vmatpush2.bf16.msra.mxu0 %v4208_v8  ;;  %v4281_v8 = vld [vmem:[%s6069_s1 + $0xa8] ss:$16 sps:$4 sm:$0xff]  }
  0xa4   :  { %2732 = vmatpush2.bf16.msra.mxu1 %v4211_v9  ;;  %2692 = vmatprep.subr.bf16.mxu0 %v4216_v10  ;;  %v4284_v9 = vld [vmem:[%s6069_s1 + $0x268] ss:$16 sps:$4 sm:$0xff]   ;;  %v4289_v10 = vld [vmem:[%s6069_s1 + $0x8c] ss:$16 sps:$4 sm:$0xff]  }
  0xa5   :  { %2733 = vmatprep.subr.bf16.mxu1 %v4219_v11  ;;  %v4287_v11 = vld [vmem:[%s6069_s1 + $0x88] ss:$16 sps:$4 sm:$0xff]  }
  0xa7   :  { %2693 = vmatpush2.bf16.msra.mxu0 %v4214_v12  ;;  %v4290_v12 = vld [vmem:[%s6069_s1 + $0x248] ss:$16 sps:$4 sm:$0xff]  }
  0xa8   :  { %2734 = vmatpush2.bf16.msra.mxu1 %v4217_v14  ;;  %2694 = vmatprep.subr.bf16.mxu0 %v4222_v15  ;;  %v4295_v14 = vld [vmem:[%s6069_s1 + $0x6c] ss:$16 sps:$4 sm:$0xff]  }
  0xa9   :  { %2735 = vmatprep.subr.bf16.mxu1 %v4225_v16  ;;  %v4298_v15 = vld [vmem:[%s6069_s1 + $0x22c] ss:$16 sps:$4 sm:$0xff]   ;;  %v4293_v16 = vld [vmem:[%s6069_s1 + $0x68] ss:$16 sps:$4 sm:$0xff]  }
  0xab   :  { %2695 = vmatpush2.bf16.msra.mxu0 %v4220_v19  ;;  %v4296_v19 = vld [vmem:[%s6069_s1 + $0x228] ss:$16 sps:$4 sm:$0xff]  }
  0xac   :  { %2736 = vmatpush2.bf16.msra.mxu1 %v4223_v20  ;;  %2696 = vmatprep.subr.bf16.mxu0 %v4228_v21  ;;  %v4301_v20 = vld [vmem:[%s6069_s1 + $0x4c] ss:$16 sps:$4 sm:$0xff]  }
  0xad   :  { %2737 = vmatprep.subr.bf16.mxu1 %v4231_v22  ;;  %v4304_v21 = vld [vmem:[%s6069_s1 + $0x20c] ss:$16 sps:$4 sm:$0xff]   ;;  %v4299_v22 = vld [vmem:[%s6069_s1 + $0x48] ss:$16 sps:$4 sm:$0xff]  }
  0xaf   :  { %2697 = vmatpush2.bf16.msra.mxu0 %v4226_v24  ;;  %v4302_v24 = vld [vmem:[%s6069_s1 + $0x208] ss:$16 sps:$4 sm:$0xff]  }
  0xb0   :  { %2738 = vmatpush2.bf16.msra.mxu1 %v4229_v25  ;;  %2698 = vmatprep.subr.bf16.mxu0 %v4234_v27  ;;  %v4307_v25 = vld [vmem:[%s6069_s1 + $0x2c] ss:$16 sps:$4 sm:$0xff]  }
  0xb1   :  { %2739 = vmatprep.subr.bf16.mxu1 %v4237_v28  ;;  %v4310_v27 = vld [vmem:[%s6069_s1 + $0x3ec] ss:$16 sps:$4 sm:$0xff]   ;;  %v4305_v28 = vld [vmem:[%s6069_s1 + $0x28] ss:$16 sps:$4 sm:$0xff]  }
  0xb3   :  { %2699 = vmatpush2.bf16.msra.mxu0 %v4232_v29  ;;  %v4308_v29 = vld [vmem:[%s6069_s1 + $0x3e8] ss:$16 sps:$4 sm:$0xff]  }
  0xb4   :  { %2740 = vmatpush2.bf16.msra.mxu1 %v4235_v30  ;;  %2700 = vmatprep.subr.bf16.mxu0 %v4240_v31  ;;  %v4313_v30 = vld [vmem:[%s6069_s1 + $0xc] ss:$16 sps:$4 sm:$0xff]  }
  0xb5   :  { %2741 = vmatprep.subr.bf16.mxu1 %v4243_v33  ;;  %v4316_v31 = vld [vmem:[%s6069_s1 + $0x3cc] ss:$16 sps:$4 sm:$0xff]   ;;  %v4311_v33 = vld [vmem:[%s6069_s1 + $0x8] ss:$16 sps:$4 sm:$0xff]  }
  0xb7   :  { %2701 = vmatpush2.bf16.msra.mxu0 %v4238_v34  ;;  %v4314_v34 = vld [vmem:[%s6069_s1 + $0x3c8] ss:$16 sps:$4 sm:$0xff]  }
  0xb8   :  { %2742 = vmatpush2.bf16.msra.mxu1 %v4241_v36  ;;  %2702 = vmatprep.subr.bf16.mxu0 %v4246_v37  ;;  %v4319_v36 = vld [vmem:[%s6069_s1 + $0x1ec] ss:$16 sps:$4 sm:$0xff]  }
  0xb9   :  { %2743 = vmatprep.subr.bf16.mxu1 %v4249_v38  ;;  %v4322_v37 = vld [vmem:[%s6069_s1 + $0x3ac] ss:$16 sps:$4 sm:$0xff]   ;;  %v4317_v38 = vld [vmem:[%s6069_s1 + $0x1e8] ss:$16 sps:$4 sm:$0xff]  }
  0xbb   :  { %2703 = vmatpush2.bf16.msra.mxu0 %v4244_v39  ;;  %v4320_v39 = vld [vmem:[%s6069_s1 + $0x3a8] ss:$16 sps:$4 sm:$0xff]  }
  0xbc   :  { %2744 = vmatpush2.bf16.msra.mxu1 %v4247_v40  ;;  %2704 = vmatprep.subr.bf16.mxu0 %v4252_v44  ;;  %v4325_v40 = vld [vmem:[%s6069_s1 + $0x1cc] ss:$16 sps:$4 sm:$0xff]  }
  0xbd   :  { %2745 = vmatprep.subr.bf16.mxu1 %v4255_v45  ;;  %v4328_v44 = vld [vmem:[%s6069_s1 + $0x38c] ss:$16 sps:$4 sm:$0xff]   ;;  %v4323_v45 = vld [vmem:[%s6069_s1 + $0x1c8] ss:$16 sps:$4 sm:$0xff]  }
  0xbf   :  { %2705 = vmatpush2.bf16.msra.mxu0 %v4250_v46  ;;  %v4326_v46 = vld [vmem:[%s6069_s1 + $0x388] ss:$16 sps:$4 sm:$0xff]  }
  0xc0   :  { %2746 = vmatpush2.bf16.msra.mxu1 %v4253_v48  ;;  %2838 = vmatprep.subr.bf16.mxu0 %v4262_v51  ;;  %v4331_v48 = vld [vmem:[%s6069_s1 + $0x1ac] ss:$16 sps:$4 sm:$0xff]   ;;  %v4329_v51 = vld [vmem:[%s6069_s1 + $0x1a8] ss:$16 sps:$4 sm:$0xff]  }
  0xc1   :  { %2768 = vmatprep.subr.bf16.mxu1 %v4259_v50  ;;  %v4334_v50 = vld [vmem:[%s6069_s1 + $0x36c] ss:$16 sps:$4 sm:$0xff]  }
  0xc2   :  { %2707 = vmatmul.mubr.bf16.vlgmr.msra.gmra.mxu0 %v5300_v47 }
  0xc3   :  { %2748 = vmatmul.mubr.bf16.vlgmr.msra.gmra.mxu1 %v5315_v52  ;;  %2839 = vmatpush1.bf16.msra.mxu0 %v4260_v54  ;;  %v4340_v54 = vld [vmem:[%s6069_s1 + $0x34c] ss:$16 sps:$4 sm:$0xff]  }
  0xc4   :  { %2769 = vmatpush1.bf16.msra.mxu1 %v4257_v53  ;;  %2840 = vmatprep.subr.bf16.mxu0 %v4268_v32  ;;  %v4337_v53 = vld [vmem:[%s6069_s1 + $0x18c] ss:$16 sps:$4 sm:$0xff]   ;;  %v4338_v32 = vld [vmem:[%s6069_s1 + $0x348] ss:$16 sps:$4 sm:$0xff]  }
  0xc5   :  { %2770 = vmatprep.subr.bf16.mxu1 %v4265_v55  ;;  %2788 = vmatprep.mubr.bf16.mxu1 %v4610_v62  ;;  %v4335_v55 = vld [vmem:[%s6069_s1 + $0x188] ss:$16 sps:$4 sm:$0xff]  }
  0xc6   :  { %2870 = vmatprep.mubr.bf16.mxu0 %v4830_v0  ;;  %v4275_v0 = vld [vmem:[%s6069_s1 + $0xc8] ss:$16 sps:$4 sm:$0xff]  }
  0xc7   :  { %2841 = vmatpush1.bf16.msra.mxu0 %v4266_v58  ;;  %v4341_v58 = vld [vmem:[%s6069_s1 + $0x168] ss:$16 sps:$4 sm:$0xff]  }
  0xc8   :  { %2771 = vmatpush1.bf16.msra.mxu1 %v4263_v57  ;;  %2842 = vmatprep.subr.bf16.mxu0 %v4274_v61  ;;  %v4346_v57 = vld [vmem:[%s6069_s1 + $0x32c] ss:$16 sps:$4 sm:$0xff]  }
  0xc9   :  { %2797 = vmatprep.subr.bf16.mxu1 %v4271_v59  ;;  %v4344_v59 = vld [vmem:[%s6069_s1 + $0x328] ss:$16 sps:$4 sm:$0xff]   ;;  %v4349_v61 = vld [vmem:[%s6069_s1 + $0x14c] ss:$16 sps:$4 sm:$0xff]  }
  0xcb   :  { %3884 = vmatmul.mubr.msk.bf16.vlgmr.msra.gmra.mxu1 %vm2506_vm0, %v5347_v63  ;;  %2843 = vmatpush1.bf16.msra.mxu0 %v4272_v2  ;;  %v4347_v2 = vld [vmem:[%s6069_s1 + $0x148] ss:$16 sps:$4 sm:$0xff]  }
  0xcc   :  { %2798 = vmatpush1.bf16.msra.mxu1 %v4269_v1  ;;  %2844 = vmatprep.subr.bf16.mxu0 %v4280_v49  ;;  %v4352_v1 = vld [vmem:[%s6069_s1 + $0x30c] ss:$16 sps:$4 sm:$0xff]   ;;  %v5517_v49 = vld [vmem:[%s6070_s2] sm:$0xf] }
  0xcd   :  { %2799 = vmatprep.subr.bf16.mxu1 %v4277_v3  ;;  %2829 = vmatprep.mubr.bf16.mxu1 %v4817_v60  ;;  %v4292_v60 = vld [vmem:[%s6069_s1 + $0x24c] ss:$16 sps:$4 sm:$0xff]   ;;  %v4350_v3 = vld [vmem:[%s6069_s1 + $0x308] ss:$16 sps:$4 sm:$0xff]  }
  0xcf   :  { %2845 = vmatpush1.bf16.msra.mxu0 %v4278_v4  ;;  %v4355_v4 = vld [vmem:[%s6069_s1 + $0x12c] ss:$16 sps:$4 sm:$0xff]  }
  0xd0   :  { %2800 = vmatpush1.bf16.msra.mxu1 %v4275_v0  ;;  %2846 = vmatprep.subr.bf16.mxu0 %v4286_v7  ;;  %v426_v0 = vsub.s32 0, %v4771_v42  ;;  %v430_v7 = vsub.s32 1, %v4771_v42 }
  0xd1   :  { %2801 = vmatprep.subr.bf16.mxu1 %v4283_v5  ;;  %v4358_v5 = vld [vmem:[%s6069_s1 + $0x6ec] ss:$16 sps:$4 sm:$0xff]  }
  0xd3   :  { %2847 = vmatpush1.bf16.msra.mxu0 %v4284_v9  ;;  %v427_v9 = vrot.slane %v5517_v49, %v426_v0 }
  0xd4   :  { %2802 = vmatpush1.bf16.msra.mxu1 %v4281_v8  ;;  %2848 = vmatprep.subr.bf16.mxu0 %v4292_v60  ;;  %v4353_v8 = vld [vmem:[%s6069_s1 + $0x128] ss:$16 sps:$4 sm:$0xff]   ;;  %v4361_v60 = vld [vmem:[%s6069_s1 + $0x10c] ss:$16 sps:$4 sm:$0xff]  }
  0xd5   :  { %2803 = vmatprep.subr.bf16.mxu1 %v4289_v10  ;;  %v4356_v10 = vld [vmem:[%s6069_s1 + $0x6e8] ss:$16 sps:$4 sm:$0xff]  }
  0xd7   :  { %2849 = vmatpush1.bf16.msra.mxu0 %v4290_v12  ;;  %v431_v12 = vrot.slane %v5517_v49, %v430_v7 }
  0xd8   :  { %2804 = vmatpush1.bf16.msra.mxu1 %v4287_v11  ;;  %2850 = vmatprep.subr.bf16.mxu0 %v4298_v15  ;;  %v4364_v11 = vld [vmem:[%s6069_s1 + $0x6cc] ss:$16 sps:$4 sm:$0xff]  }
  0xd9   :  { %2805 = vmatprep.subr.bf16.mxu1 %v4295_v14  ;;  %v4359_v14 = vld [vmem:[%s6069_s1 + $0x108] ss:$16 sps:$4 sm:$0xff]  }
  0xdb   :  { %2851 = vmatpush1.bf16.msra.mxu0 %v4296_v19  ;;  %v4362_v19 = vld [vmem:[%s6069_s1 + $0x6c8] ss:$16 sps:$4 sm:$0xff]  }
  0xdc   :  { %2806 = vmatpush1.bf16.msra.mxu1 %v4293_v16  ;;  %2852 = vmatprep.subr.bf16.mxu0 %v4304_v21  ;;  %v4367_v21 = vld [vmem:[%s6069_s1 + $0x4ec] ss:$16 sps:$4 sm:$0xff]  }
  0xdd   :  { %2807 = vmatprep.subr.bf16.mxu1 %v4301_v20 }
  0xdf   :  { %2853 = vmatpush1.bf16.msra.mxu0 %v4302_v24 }
  0xe0   :  { %2808 = vmatpush1.bf16.msra.mxu1 %v4299_v22  ;;  %2854 = vmatprep.subr.bf16.mxu0 %v4310_v27 }
  0xe1   :  { %2809 = vmatprep.subr.bf16.mxu1 %v4307_v25  ;;  %v4370_v25 = vld [vmem:[%s6069_s1 + $0x6ac] ss:$16 sps:$4 sm:$0xff]  }
  0xe3   :  { %2855 = vmatpush2.bf16.msra.mxu0 %v4308_v29 }
  0xe4   :  { %2810 = vmatpush1.bf16.msra.mxu1 %v4305_v28  ;;  %2856 = vmatprep.subr.bf16.mxu0 %v4316_v31  ;;  %v4365_v28 = vld [vmem:[%s6069_s1 + $0x4e8] ss:$16 sps:$4 sm:$0xff]  }
  0xe5   :  { %2811 = vmatprep.subr.bf16.mxu1 %v4313_v30  ;;  %v4368_v30 = vld [vmem:[%s6069_s1 + $0x6a8] ss:$16 sps:$4 sm:$0xff]  }
  0xe7   :  { %2857 = vmatpush2.bf16.msra.mxu0 %v4314_v34 }
  0xe8   :  { %2812 = vmatpush1.bf16.msra.mxu1 %v4311_v33  ;;  %2858 = vmatprep.subr.bf16.mxu0 %v4322_v37 }
  0xe9   :  { %2813 = vmatprep.subr.bf16.mxu1 %v4319_v36  ;;  %v4373_v36 = vld [vmem:[%s6069_s1 + $0x4cc] ss:$16 sps:$4 sm:$0xff]  }
  0xeb   :  { %2859 = vmatpush2.bf16.msra.mxu0 %v4320_v39  ;;  %v4374_v39 = vld [vmem:[%s6069_s1 + $0x688] ss:$16 sps:$4 sm:$0xff]  }
  0xec   :  { %2814 = vmatpush2.bf16.msra.mxu1 %v4317_v38  ;;  %2860 = vmatprep.subr.bf16.mxu0 %v4328_v44  ;;  %v4371_v38 = vld [vmem:[%s6069_s1 + $0x4c8] ss:$16 sps:$4 sm:$0xff]   ;;  %v4382_v44 = vld [vmem:[%s6069_s1 + $0x66c] ss:$16 sps:$4 sm:$0xff]  }
  0xed   :  { %2815 = vmatprep.subr.bf16.mxu1 %v4325_v40  ;;  %v4379_v40 = vld [vmem:[%s6069_s1 + $0x4ac] ss:$16 sps:$4 sm:$0xff]  }
  0xef   :  { %2861 = vmatpush2.bf16.msra.mxu0 %v4326_v46  ;;  %v4385_v46 = vld [vmem:[%s6069_s1 + $0x48c] ss:$16 sps:$4 sm:$0xff]  }
  0xf0   :  { %2816 = vmatpush2.bf16.msra.mxu1 %v4323_v45  ;;  %2862 = vmatprep.subr.bf16.mxu0 %v4334_v50  ;;  %v4377_v45 = vld [vmem:[%s6069_s1 + $0x4a8] ss:$16 sps:$4 sm:$0xff]  }
  0xf1   :  { %2817 = vmatprep.subr.bf16.mxu1 %v4331_v48  ;;  %v4388_v48 = vld [vmem:[%s6069_s1 + $0x64c] ss:$16 sps:$4 sm:$0xff]   ;;  %v4383_v50 = vld [vmem:[%s6069_s1 + $0x488] ss:$16 sps:$4 sm:$0xff]  }
  0xf3   :  { %2863 = vmatpush2.bf16.msra.mxu0 %v4332_v35  ;;  %v4394_v35 = vld [vmem:[%s6069_s1 + $0x62c] ss:$16 sps:$4 sm:$0xff]  }
  0xf4   :  { %2818 = vmatpush2.bf16.msra.mxu1 %v4329_v51  ;;  %2864 = vmatprep.subr.bf16.mxu0 %v4340_v54  ;;  %v4391_v51 = vld [vmem:[%s6069_s1 + $0x46c] ss:$16 sps:$4 sm:$0xff]   ;;  %v4392_v54 = vld [vmem:[%s6069_s1 + $0x628] ss:$16 sps:$4 sm:$0xff]  }
  0xf5   :  { %2819 = vmatprep.subr.bf16.mxu1 %v4337_v53  ;;  %v4389_v53 = vld [vmem:[%s6069_s1 + $0x468] ss:$16 sps:$4 sm:$0xff]  }
  0xf7   :  { %2865 = vmatpush2.bf16.msra.mxu0 %v4338_v32  ;;  %v4400_v32 = vld [vmem:[%s6069_s1 + $0x60c] ss:$16 sps:$4 sm:$0xff]  }
  0xf8   :  { %2820 = vmatpush2.bf16.msra.mxu1 %v4335_v55  ;;  %2866 = vmatprep.subr.bf16.mxu0 %v4346_v57  ;;  %v4397_v55 = vld [vmem:[%s6069_s1 + $0x44c] ss:$16 sps:$4 sm:$0xff]   ;;  %v4398_v57 = vld [vmem:[%s6069_s1 + $0x608] ss:$16 sps:$4 sm:$0xff]  }
  0xf9   :  { %2821 = vmatprep.subr.bf16.mxu1 %v4343_v56  ;;  %v4395_v56 = vld [vmem:[%s6069_s1 + $0x448] ss:$16 sps:$4 sm:$0xff]  }
  0xfb   :  { %2867 = vmatpush2.bf16.msra.mxu0 %v4344_v59  ;;  %v4406_v59 = vld [vmem:[%s6069_s1 + $0x7ec] ss:$16 sps:$4 sm:$0xff]  }
  0xfc   :  { %2822 = vmatpush2.bf16.msra.mxu1 %v4341_v58  ;;  %2868 = vmatprep.subr.bf16.mxu0 %v4352_v1  ;;  %v4403_v58 = vld [vmem:[%s6069_s1 + $0x42c] ss:$16 sps:$4 sm:$0xff]  }
  0xfd   :  { %2823 = vmatprep.subr.bf16.mxu1 %v4349_v61 }
  0xff   :  { %2869 = vmatpush2.bf16.msra.mxu0 %v4350_v3 }
 0x100   :  { %2824 = vmatpush2.bf16.msra.mxu1 %v4347_v2  ;;  %2920 = vmatprep.subr.bf16.mxu0 %v4358_v5 }
 0x101   :  { %2825 = vmatprep.subr.bf16.mxu1 %v4355_v4 }
 0x102   :  { %v2544_v15 = vpop.f32.mrf.mxu0  ;;  %2871 = vmatmul.mubr.bf16.vlgmr.msra.gmra.mxu0 %v4883_v18 }
 0x103   :  { %v2585_v16 = vpop.f32.mrf.mxu1  ;;  %v2545_v20 = vadd.f32 %v2544_v15, %v427_v9  ;;  %2921 = vmatpush1.bf16.msra.mxu0 %v4356_v10  ;;  %2952 = vmatprep.mubr.bf16.mxu0 %v4899_v23  ;;  %v4376_v23 = vld [vmem:[%s6069_s1 + $0x68c] ss:$16 sps:$4 sm:$0xff]  }
 0x104   :  { %2826 = vmatpush2.bf16.msra.mxu1 %v4353_v8  ;;  %v2546_v22 = vpop.f32.mrf.mxu0  ;;  %2922 = vmatprep.subr.bf16.mxu0 %v4364_v11 }
 0x105   :  { %v2587_v24 = vpop.f32.mrf.mxu1  ;;  %2827 = vmatprep.subr.bf16.mxu1 %v4361_v60  ;;  %v5554_v18 = vadd.f32 %v2585_v16, %v2545_v20  ;;  %v2547_v27 = vadd.f32 %v2546_v22, %v431_v12 }
 0x106   :  { %v2548_v31 = vpop.f32.mrf.mxu0 }
 0x107   :  { %v2589_v29 = vpop.f32.mrf.mxu1  ;;  %v5563_v33 = vadd.f32 %v2587_v24, %v2547_v27  ;;  %2923 = vmatpush1.bf16.msra.mxu0 %v4362_v19 }
 0x108   :  { %2828 = vmatpush2.bf16.msra.mxu1 %v4359_v14  ;;  %2924 = vmatprep.subr.bf16.mxu0 %v4370_v25  ;;  %v2549_v37 = vpop.f32.mrf.mxu0 }
 0x109   :  { %v2590_v34 = vpop.f32.mrf.mxu1  ;;  %2879 = vmatprep.subr.bf16.mxu1 %v4367_v21 }
 0x10b   :  { %2830 = vmatmul.mubr.bf16.vlgmr.msra.gmra.mxu1 %v4867_v13  ;;  %2925 = vmatpush1.bf16.msra.mxu0 %v4368_v30  ;;  %v4380_v13 = vld [vmem:[%s6069_s1 + $0x668] ss:$16 sps:$4 sm:$0xff]  }
 0x10c   :  { %2880 = vmatpush1.bf16.msra.mxu1 %v4365_v28  ;;  %2926 = vmatprep.subr.bf16.mxu0 %v4376_v23 }
 0x10d   :  { %2881 = vmatprep.subr.bf16.mxu1 %v4373_v36  ;;  %2911 = vmatprep.mubr.bf16.mxu1 %v4879_v17  ;;  %v4386_v17 = vld [vmem:[%s6069_s1 + $0x648] ss:$16 sps:$4 sm:$0xff]  }
 0x10f   :  { %2927 = vmatpush1.bf16.msra.mxu0 %v4374_v39 }
 0x110   :  { %2882 = vmatpush1.bf16.msra.mxu1 %v4371_v38  ;;  %2928 = vmatprep.subr.bf16.mxu0 %v4382_v44 }
 0x111   :  { %2883 = vmatprep.subr.bf16.mxu1 %v4379_v40 }
 0x113   :  { %2929 = vmatpush1.bf16.msra.mxu0 %v4380_v13 }
 0x114   :  { %2884 = vmatpush1.bf16.msra.mxu1 %v4377_v45  ;;  %2930 = vmatprep.subr.bf16.mxu0 %v4388_v48 }
 0x115   :  { %2885 = vmatprep.subr.bf16.mxu1 %v4385_v46 }
 0x117   :  { %2931 = vmatpush1.bf16.msra.mxu0 %v4386_v17 }
 0x118   :  { %2886 = vmatpush1.bf16.msra.mxu1 %v4383_v50  ;;  %2932 = vmatprep.subr.bf16.mxu0 %v4394_v35 }
 0x119   :  { %2887 = vmatprep.subr.bf16.mxu1 %v4391_v51 }
 0x11b   :  { %2933 = vmatpush1.bf16.msra.mxu0 %v4392_v54 }
 0x11c   :  { %2888 = vmatpush1.bf16.msra.mxu1 %v4389_v53  ;;  %2934 = vmatprep.subr.bf16.mxu0 %v4400_v32 }
 0x11d   :  { %2889 = vmatprep.subr.bf16.mxu1 %v4397_v55 }
 0x11e   :  { %12 = vsyncpa [#allocation3], 0  ;;  %v4401_v61 = vld [vmem:[%s6069_s1 + $0x428] ss:$16 sps:$4 sm:$0xff]   ;;  %v4409_v2 = vld [vmem:[%s6069_s1 + $0x40c] ss:$16 sps:$4 sm:$0xff]  }
 0x11f   :  { %2935 = vmatpush1.bf16.msra.mxu0 %v4398_v57  ;;  %v4404_v1 = vld [vmem:[%s6069_s1 + $0x7e8] ss:$16 sps:$4 sm:$0xff]   ;;  %v4412_v3 = vld [vmem:[%s6069_s1 + $0x7cc] ss:$16 sps:$4 sm:$0xff]   ;;  %vm3299_vm1 = vcmask 130048   ;;  %vm4612_vm2 = vmmov 0  }
 0x120   :  { %2890 = vmatpush1.bf16.msra.mxu1 %v4395_v56  ;;  %2936 = vmatprep.subr.bf16.mxu0 %v4406_v59  ;;  %v4407_v0 = vld [vmem:[%s6069_s1 + $0x408] ss:$16 sps:$4 sm:$0xff]   ;;  %v4415_v5 = vld [vmem:[%s6069_s1 + $0x5ec] ss:$16 sps:$4 sm:$0xff]   ;;  %vm3432_vm3 = vcmask 654336   ;;  %vm3476_vm4 = vcmask 377856  }
 0x121   :  { %2891 = vmatprep.subr.bf16.mxu1 %v4403_v58  ;;  %v4410_v4 = vld [vmem:[%s6069_s1 + $0x7c8] ss:$16 sps:$4 sm:$0xff]   ;;  %v4418_v7 = vld [vmem:[%s6069_s1 + $0x7ac] ss:$16 sps:$4 sm:$0xff]  }
 0x122   :  { %v4413_v8 = vld [vmem:[%s6069_s1 + $0x5e8] ss:$16 sps:$4 sm:$0xff]   ;;  %v4421_v10 = vld [vmem:[%s6069_s1 + $0x5cc] ss:$16 sps:$4 sm:$0xff]  }
 0x123   :  { %2937 = vmatpush2.bf16.msra.mxu0 %v4404_v1  ;;  %v4416_v9 = vld [vmem:[%s6069_s1 + $0x7a8] ss:$16 sps:$4 sm:$0xff]   ;;  %v4424_v60 = vld [vmem:[%s6069_s1 + $0x78c] ss:$16 sps:$4 sm:$0xff]  }
 0x124   :  { %2892 = vmatpush1.bf16.msra.mxu1 %v4401_v61  ;;  %2938 = vmatprep.subr.bf16.mxu0 %v4412_v3  ;;  %v4419_v11 = vld [vmem:[%s6069_s1 + $0x5c8] ss:$16 sps:$4 sm:$0xff]   ;;  %v4427_v14 = vld [vmem:[%s6069_s1 + $0x5ac] ss:$16 sps:$4 sm:$0xff]  }
 0x125   :  { %2893 = vmatprep.subr.bf16.mxu1 %v4409_v2  ;;  %v4422_v12 = vld [vmem:[%s6069_s1 + $0x788] ss:$16 sps:$4 sm:$0xff]   ;;  %v4430_v15 = vld [vmem:[%s6069_s1 + $0x76c] ss:$16 sps:$4 sm:$0xff]  }
 0x126   :  { %v4425_v16 = vld [vmem:[%s6069_s1 + $0x5a8] ss:$16 sps:$4 sm:$0xff]   ;;  %v4433_v20 = vld [vmem:[%s6069_s1 + $0x58c] ss:$16 sps:$4 sm:$0xff]  }
 0x127   :  { %2939 = vmatpush2.bf16.msra.mxu0 %v4410_v4  ;;  %v4428_v19 = vld [vmem:[%s6069_s1 + $0x768] ss:$16 sps:$4 sm:$0xff]   ;;  %v4436_v21 = vld [vmem:[%s6069_s1 + $0x74c] ss:$16 sps:$4 sm:$0xff]  }
 0x128   :  { %2894 = vmatpush1.bf16.msra.mxu1 %v4407_v0  ;;  %2940 = vmatprep.subr.bf16.mxu0 %v4418_v7  ;;  %v4431_v22 = vld [vmem:[%s6069_s1 + $0x588] ss:$16 sps:$4 sm:$0xff]   ;;  %v4439_v25 = vld [vmem:[%s6069_s1 + $0x56c] ss:$16 sps:$4 sm:$0xff]  }
 0x129   :  { %2895 = vmatprep.subr.bf16.mxu1 %v4415_v5  ;;  %v4434_v24 = vld [vmem:[%s6069_s1 + $0x748] ss:$16 sps:$4 sm:$0xff]   ;;  %v4442_v27 = vld [vmem:[%s6069_s1 + $0x72c] ss:$16 sps:$4 sm:$0xff]  }
 0x12a   :  { %v4437_v28 = vld [vmem:[%s6069_s1 + $0x568] ss:$16 sps:$4 sm:$0xff]   ;;  %v4445_v30 = vld [vmem:[%s6069_s1 + $0x54c] ss:$16 sps:$4 sm:$0xff]  }
 0x12b   :  { %2941 = vmatpush2.bf16.msra.mxu0 %v4416_v9  ;;  %v4440_v29 = vld [vmem:[%s6069_s1 + $0x728] ss:$16 sps:$4 sm:$0xff]   ;;  %v4448_v31 = vld [vmem:[%s6069_s1 + $0x70c] ss:$16 sps:$4 sm:$0xff]  }
 0x12c   :  { %2896 = vmatpush2.bf16.msra.mxu1 %v4413_v8  ;;  %2942 = vmatprep.subr.bf16.mxu0 %v4424_v60  ;;  %v4443_v34 = vld [vmem:[%s6069_s1 + $0x548] ss:$16 sps:$4 sm:$0xff]   ;;  %v4451_v23 = vld [vmem:[%s6069_s1 + $0x52c] ss:$16 sps:$4 sm:$0xff]  }
 0x12d   :  { %2897 = vmatprep.subr.bf16.mxu1 %v4421_v10  ;;  %v4446_v36 = vld [vmem:[%s6069_s1 + $0x708] ss:$16 sps:$4 sm:$0xff]   ;;  %v4454_v37 = vld [vmem:[%s6069_s1 + $0xaec] ss:$16 sps:$4 sm:$0xff]  }
 0x12e   :  { %v4449_v38 = vld [vmem:[%s6069_s1 + $0x528] ss:$16 sps:$4 sm:$0xff]   ;;  %v4457_v40 = vld [vmem:[%s6069_s1 + $0x50c] ss:$16 sps:$4 sm:$0xff]  }
 0x12f   :  { %2943 = vmatpush2.bf16.msra.mxu0 %v4422_v12  ;;  %v4452_v39 = vld [vmem:[%s6069_s1 + $0xae8] ss:$16 sps:$4 sm:$0xff]   ;;  %v4460_v44 = vld [vmem:[%s6069_s1 + $0xacc] ss:$16 sps:$4 sm:$0xff]  }
 0x130   :  { %2898 = vmatpush2.bf16.msra.mxu1 %v4419_v11  ;;  %2944 = vmatprep.subr.bf16.mxu0 %v4430_v15  ;;  %v4455_v48 = vld [vmem:[%s6069_s1 + $0x508] ss:$16 sps:$4 sm:$0xff]   ;;  %v4475_v2 = vld [vmem:[%s6069_s1 + $0x8ac] ss:$16 sps:$4 sm:$0xff]  }
 0x131   :  { %2899 = vmatprep.subr.bf16.mxu1 %v4427_v14  ;;  %v4458_v50 = vld [vmem:[%s6069_s1 + $0xac8] ss:$16 sps:$4 sm:$0xff]   ;;  %v4481_v4 = vld [vmem:[%s6069_s1 + $0x88c] ss:$16 sps:$4 sm:$0xff]  }
 0x132   :  { %v4461_v56 = vld [vmem:[%s6069_s1 + $0x8e8] ss:$16 sps:$4 sm:$0xff]   ;;  %v4487_v8 = vld [vmem:[%s6069_s1 + $0x86c] ss:$16 sps:$4 sm:$0xff]  }
 0x133   :  { %2945 = vmatpush2.bf16.msra.mxu0 %v4428_v19  ;;  %v4464_v57 = vld [vmem:[%s6069_s1 + $0xaa8] ss:$16 sps:$4 sm:$0xff]   ;;  %v4490_v9 = vld [vmem:[%s6069_s1 + $0xa2c] ss:$16 sps:$4 sm:$0xff]  }
 0x134   :  { %2900 = vmatpush2.bf16.msra.mxu1 %v4425_v16  ;;  %2946 = vmatprep.subr.bf16.mxu0 %v4436_v21  ;;  %v4467_v61 = vld [vmem:[%s6069_s1 + $0x8c8] ss:$16 sps:$4 sm:$0xff]   ;;  %v4493_v11 = vld [vmem:[%s6069_s1 + $0x84c] ss:$16 sps:$4 sm:$0xff]  }
 0x135   :  { %2901 = vmatprep.subr.bf16.mxu1 %v4433_v20  ;;  %v4470_v1 = vld [vmem:[%s6069_s1 + $0xa88] ss:$16 sps:$4 sm:$0xff]   ;;  %v4496_v12 = vld [vmem:[%s6069_s1 + $0xa0c] ss:$16 sps:$4 sm:$0xff]  }
 0x136   :  { %v4473_v3 = vld [vmem:[%s6069_s1 + $0x8a8] ss:$16 sps:$4 sm:$0xff]   ;;  %v4499_v16 = vld [vmem:[%s6069_s1 + $0x82c] ss:$16 sps:$4 sm:$0xff]  }
 0x137   :  { %2947 = vmatpush2.bf16.msra.mxu0 %v4434_v24  ;;  %v4476_v0 = vld [vmem:[%s6069_s1 + $0xa68] ss:$16 sps:$4 sm:$0xff]   ;;  %v4502_v19 = vld [vmem:[%s6069_s1 + $0xbec] ss:$16 sps:$4 sm:$0xff]  }
 0x138   :  { %2902 = vmatpush2.bf16.msra.mxu1 %v4431_v22  ;;  %2948 = vmatprep.subr.bf16.mxu0 %v4442_v27  ;;  %v4479_v5 = vld [vmem:[%s6069_s1 + $0x888] ss:$16 sps:$4 sm:$0xff]   ;;  %v4505_v22 = vld [vmem:[%s6069_s1 + $0x80c] ss:$16 sps:$4 sm:$0xff]  }
 0x139   :  { %2903 = vmatprep.subr.bf16.mxu1 %v4439_v25  ;;  %v4482_v7 = vld [vmem:[%s6069_s1 + $0xa48] ss:$16 sps:$4 sm:$0xff]   ;;  %v4508_v24 = vld [vmem:[%s6069_s1 + $0xbcc] ss:$16 sps:$4 sm:$0xff]  }
 0x13a   :  { %v4485_v10 = vld [vmem:[%s6069_s1 + $0x868] ss:$16 sps:$4 sm:$0xff]  }
 0x13b   :  { %2949 = vmatpush2.bf16.msra.mxu0 %v4440_v29  ;;  %v4488_v60 = vld [vmem:[%s6069_s1 + $0xa28] ss:$16 sps:$4 sm:$0xff]   ;;  %v4514_v29 = vld [vmem:[%s6069_s1 + $0xbac] ss:$16 sps:$4 sm:$0xff]  }
 0x13c   :  { %2904 = vmatpush2.bf16.msra.mxu1 %v4437_v28  ;;  %2950 = vmatprep.subr.bf16.mxu0 %v4448_v31  ;;  %v4491_v14 = vld [vmem:[%s6069_s1 + $0x848] ss:$16 sps:$4 sm:$0xff]   ;;  %v4511_v28 = vld [vmem:[%s6069_s1 + $0x9ec] ss:$16 sps:$4 sm:$0xff]  }
 0x13d   :  { %2905 = vmatprep.subr.bf16.mxu1 %v4445_v30  ;;  %v4494_v15 = vld [vmem:[%s6069_s1 + $0xa08] ss:$16 sps:$4 sm:$0xff]  }
 0x13e   :  { %v4497_v20 = vld [vmem:[%s6069_s1 + $0x828] ss:$16 sps:$4 sm:$0xff]  }
 0x13f   :  { %2951 = vmatpush2.bf16.msra.mxu0 %v4446_v36  ;;  %v4500_v21 = vld [vmem:[%s6069_s1 + $0xbe8] ss:$16 sps:$4 sm:$0xff]   ;;  %v4520_v36 = vld [vmem:[%s6069_s1 + $0xb8c] ss:$16 sps:$4 sm:$0xff]  }
 0x140   :  { %2906 = vmatpush2.bf16.msra.mxu1 %v4443_v34  ;;  %3002 = vmatprep.subr.bf16.mxu0 %v4454_v37  ;;  %v4503_v25 = vld [vmem:[%s6069_s1 + $0x808] ss:$16 sps:$4 sm:$0xff]   ;;  %v4517_v34 = vld [vmem:[%s6069_s1 + $0x9cc] ss:$16 sps:$4 sm:$0xff]  }
 0x141   :  { %2907 = vmatprep.subr.bf16.mxu1 %v4451_v23  ;;  %v4506_v27 = vld [vmem:[%s6069_s1 + $0xbc8] ss:$16 sps:$4 sm:$0xff]  }
 0x142   :  { %v2626_v45 = vpop.f32.mrf.mxu0  ;;  %2953 = vmatmul.mubr.bf16.vlgmr.msra.gmra.mxu0 %v5091_v6  ;;  %v4463_v6 = vld [vmem:[%s6069_s1 + $0x8ec] ss:$16 sps:$4 sm:$0xff]   ;;  %v4509_v30 = vld [vmem:[%s6069_s1 + $0x9e8] ss:$16 sps:$4 sm:$0xff]  }
 0x143   :  { %v2667_v13 = vpop.f32.mrf.mxu1  ;;  %v2627_v46 = vadd.f32 %v2626_v45, %v5554_v18  ;;  %3003 = vmatpush1.bf16.msra.mxu0 %v4452_v39  ;;  %v4466_v18 = vld [vmem:[%s6069_s1 + $0xaac] ss:$16 sps:$4 sm:$0xff]   ;;  %3034 = vmatprep.mubr.bf16.mxu0 %v5136_v43  ;;  %v4512_v31 = vld [vmem:[%s6069_s1 + $0xba8] ss:$16 sps:$4 sm:$0xff]  }
 0x144   :  { %2908 = vmatpush2.bf16.msra.mxu1 %v4449_v38  ;;  %v2628_v17 = vpop.f32.mrf.mxu0  ;;  %3004 = vmatprep.subr.bf16.mxu0 %v4460_v44  ;;  %v4469_v43 = vld [vmem:[%s6069_s1 + $0x8cc] ss:$16 sps:$4 sm:$0xff]   ;;  %v4515_v23 = vld [vmem:[%s6069_s1 + $0x9c8] ss:$16 sps:$4 sm:$0xff]  }
 0x145   :  { %v2669_v51 = vpop.f32.mrf.mxu1  ;;  %2909 = vmatprep.subr.bf16.mxu1 %v4457_v40  ;;  %v5755_v35 = vadd.f32 %v2667_v13, %v2627_v46  ;;  %v2629_v53 = vadd.f32 %v2628_v17, %v5563_v33  ;;  %v4472_v33 = vld [vmem:[%s6069_s1 + $0xa8c] ss:$16 sps:$4 sm:$0xff]   ;;  %v4518_v37 = vld [vmem:[%s6069_s1 + $0xb88] ss:$16 sps:$4 sm:$0xff]  }
 0x146   :  { %v2630_v55 = vpop.f32.mrf.mxu0  ;;  %v4523_v38 = vld [vmem:[%s6069_s1 + $0x9ac] ss:$16 sps:$4 sm:$0xff]   ;;  %v4521_v40 = vld [vmem:[%s6069_s1 + $0x9a8] ss:$16 sps:$4 sm:$0xff]  }
 0x147   :  { %v2671_v54 = vpop.f32.mrf.mxu1  ;;  %v5759_v32 = vadd.f32 %v2669_v51, %v2629_v53  ;;  %3005 = vmatpush1.bf16.msra.mxu0 %v4458_v50  ;;  %v4526_v39 = vld [vmem:[%s6069_s1 + $0xb6c] ss:$16 sps:$4 sm:$0xff]   ;;  %v4524_v44 = vld [vmem:[%s6069_s1 + $0xb68] ss:$16 sps:$4 sm:$0xff]  }
 0x148   :  { %2910 = vmatpush2.bf16.msra.mxu1 %v4455_v48  ;;  %3006 = vmatprep.subr.bf16.mxu0 %v4466_v18  ;;  %v2631_v59 = vpop.f32.mrf.mxu0  ;;  %v4529_v45 = vld [vmem:[%s6069_s1 + $0x98c] ss:$16 sps:$4 sm:$0xff]   ;;  %v4527_v46 = vld [vmem:[%s6069_s1 + $0x988] ss:$16 sps:$4 sm:$0xff]  }
 0x149   :  { %v2672_v58 = vpop.f32.mrf.mxu1  ;;  %2961 = vmatprep.subr.bf16.mxu1 %v4463_v6  ;;  %v4532_v13 = vld [vmem:[%s6069_s1 + $0xb4c] ss:$16 sps:$4 sm:$0xff]   ;;  %v4530_v48 = vld [vmem:[%s6069_s1 + $0xb48] ss:$16 sps:$4 sm:$0xff]   ;;  %v4553_v59 = vld [vmem:[%s6071_s3 + $0x70] sm:$0xff]  }
 0x14a   :  { %v4535_v50 = vld [vmem:[%s6069_s1 + $0x96c] ss:$16 sps:$4 sm:$0xff]   ;;  %v4533_v51 = vld [vmem:[%s6069_s1 + $0x968] ss:$16 sps:$4 sm:$0xff]  }
 0x14b   :  { %2912 = vmatmul.mubr.bf16.vlgmr.msra.gmra.mxu1 %v5078_v26  ;;  %3007 = vmatpush1.bf16.msra.mxu0 %v4464_v57  ;;  %v4478_v26 = vld [vmem:[%s6069_s1 + $0xa6c] ss:$16 sps:$4 sm:$0xff]   ;;  %v4536_v6 = vld [vmem:[%s6069_s1 + $0xb28] ss:$16 sps:$4 sm:$0xff]  }
 0x14c   :  { %2962 = vmatpush1.bf16.msra.mxu1 %v4461_v56  ;;  %3008 = vmatprep.subr.bf16.mxu0 %v4472_v33  ;;  %v4538_v17 = vld [vmem:[%s6069_s1 + $0xb2c] ss:$16 sps:$4 sm:$0xff]   ;;  %v4539_v54 = vld [vmem:[%s6069_s1 + $0x948] ss:$16 sps:$4 sm:$0xff]  }
 0x14d   :  { %2963 = vmatprep.subr.bf16.mxu1 %v4469_v43  ;;  %2993 = vmatprep.mubr.bf16.mxu1 %v5131_v41  ;;  %v4484_v41 = vld [vmem:[%s6069_s1 + $0xa4c] ss:$16 sps:$4 sm:$0xff]   ;;  %v4542_v55 = vld [vmem:[%s6069_s1 + $0xb08] ss:$16 sps:$4 sm:$0xff]  }
 0x14e   :  { %v4541_v18 = vld [vmem:[%s6069_s1 + $0x94c] ss:$16 sps:$4 sm:$0xff]   ;;  %v4545_v58 = vld [vmem:[%s6069_s1 + $0x928] ss:$16 sps:$4 sm:$0xff]  }
 0x14f   :  { %3009 = vmatpush1.bf16.msra.mxu0 %v4470_v1  ;;  %v4544_v53 = vld [vmem:[%s6069_s1 + $0xb0c] ss:$16 sps:$4 sm:$0xff]  }
 0x150   :  { %2964 = vmatpush1.bf16.msra.mxu1 %v4467_v61  ;;  %3010 = vmatprep.subr.bf16.mxu0 %v4478_v26  ;;  %v4547_v56 = vld [vmem:[%s6069_s1 + $0x92c] ss:$16 sps:$4 sm:$0xff]   ;;  %v4554_v26 = vld [vmem:[%s6071_s3 + $0x30] sm:$0xff]  }
 0x151   :  { %2965 = vmatprep.subr.bf16.mxu1 %v4475_v2  ;;  %v4548_v57 = vld [vmem:[%s6071_s3 + $0x78] sm:$0xff]  }
 0x152   :  { %v4549_v43 = vld [vmem:[%s6071_s3 + $0x38] sm:$0xff]  }
 0x153   :  { %3011 = vmatpush1.bf16.msra.mxu0 %v4476_v0  ;;  %v4552_v33 = vld [vmem:[%s6069_s1 + $0x90c] ss:$16 sps:$4 sm:$0xff]   ;;  %v4550_v2 = vld [vmem:[%s6069_s1 + $0x908] ss:$16 sps:$4 sm:$0xff]  }
 0x154   :  { %2966 = vmatpush1.bf16.msra.mxu1 %v4473_v3  ;;  %3012 = vmatprep.subr.bf16.mxu0 %v4484_v41 }
 0x155   :  { %2967 = vmatprep.subr.bf16.mxu1 %v4481_v4  ;;  %v4557_v4 = vld [vmem:[%s6069_s1 + $0xc2c] ss:$16 sps:$4 sm:$0xff]  }
 0x157   :  { %3013 = vmatpush1.bf16.msra.mxu0 %v4482_v7 }
 0x158   :  { %2968 = vmatpush1.bf16.msra.mxu1 %v4479_v5  ;;  %3014 = vmatprep.subr.bf16.mxu0 %v4490_v9  ;;  %v4559_v9 = vld [vmem:[%s6071_s3 + $0x28] sm:$0xff]  }
 0x159   :  { %2969 = vmatprep.subr.bf16.mxu1 %v4487_v8  ;;  %v4555_v8 = vld [vmem:[%s6069_s1 + $0xc28] ss:$16 sps:$4 sm:$0xff]  }
 0x15b   :  { %3015 = vmatpush1.bf16.msra.mxu0 %v4488_v60  ;;  %v4562_v60 = vld [vmem:[%s6069_s1 + $0xc0c] ss:$16 sps:$4 sm:$0xff]  }
 0x15c   :  { %2970 = vmatpush1.bf16.msra.mxu1 %v4485_v10  ;;  %3016 = vmatprep.subr.bf16.mxu0 %v4496_v12 }
 0x15d   :  { %2971 = vmatprep.subr.bf16.mxu1 %v4493_v11 }
 0x15f   :  { %3017 = vmatpush1.bf16.msra.mxu0 %v4494_v15  ;;  %v4560_v15 = vld [vmem:[%s6069_s1 + $0xc08] ss:$16 sps:$4 sm:$0xff]  }
 0x160   :  { %2972 = vmatpush1.bf16.msra.mxu1 %v4491_v14  ;;  %3018 = vmatprep.subr.bf16.mxu0 %v4502_v19 }
 0x161   :  { %2973 = vmatprep.subr.bf16.mxu1 %v4499_v16  ;;  %v4564_v16 = vld [vmem:[%s6071_s3 + $0x20] sm:$0xff]  }
 0x163   :  { %3019 = vmatpush2.bf16.msra.mxu0 %v4500_v21 }
 0x164   :  { %2974 = vmatpush1.bf16.msra.mxu1 %v4497_v20  ;;  %3020 = vmatprep.subr.bf16.mxu0 %v4508_v24  ;;  %v4565_v20 = vld [vmem:[%s6071_s3 + $0x58] sm:$0xff]  }
 0x165   :  { %2975 = vmatprep.subr.bf16.mxu1 %v4505_v22  ;;  %v4566_v24 = vld [vmem:[%s6071_s3 + $0x18] sm:$0xff]  }
 0x167   :  { %3021 = vmatpush2.bf16.msra.mxu0 %v4506_v27  ;;  %v4567_v27 = vld [vmem:[%s6071_s3 + $0x50] sm:$0xff]  }
 0x168   :  { %2976 = vmatpush1.bf16.msra.mxu1 %v4503_v25  ;;  %3022 = vmatprep.subr.bf16.mxu0 %v4514_v29 }
 0x169   :  { %2977 = vmatprep.subr.bf16.mxu1 %v4511_v28  ;;  %v4573_v28 = vld [vmem:[%s6071_s3 + $0xb8] sm:$0xff]  }
 0x16b   :  { %3023 = vmatpush2.bf16.msra.mxu0 %v4512_v31  ;;  %v4568_v31 = vld [vmem:[%s6071_s3 + $0x10] sm:$0xff]  }
 0x16c   :  { %2978 = vmatpush2.bf16.msra.mxu1 %v4509_v30  ;;  %3024 = vmatprep.subr.bf16.mxu0 %v4520_v36  ;;  %v4574_v36 = vld [vmem:[%s6071_s3 + $0xb0] sm:$0xff]  }
 0x16d   :  { %2979 = vmatprep.subr.bf16.mxu1 %v4517_v34  ;;  %v4569_v34 = vld [vmem:[%s6071_s3 + $0x48] sm:$0xff]  }
 0x16f   :  { %3025 = vmatpush2.bf16.msra.mxu0 %v4518_v37  ;;  %v4571_v37 = vld [vmem:[%s6071_s3 + $0x40] sm:$0xff]  }
 0x170   :  { %2980 = vmatpush2.bf16.msra.mxu1 %v4515_v23  ;;  %3026 = vmatprep.subr.bf16.mxu0 %v4526_v39  ;;  %v4572_v39 = vld [vmem:[%s6071_s3] sm:$0xff]  }
 0x171   :  { %2981 = vmatprep.subr.bf16.mxu1 %v4523_v38  ;;  %v4575_v38 = vld [vmem:[%s6071_s3 + $0xa8] sm:$0xff]  }
 0x173   :  { %3027 = vmatpush2.bf16.msra.mxu0 %v4524_v44  ;;  %v4576_v44 = vld [vmem:[%s6071_s3 + $0xa0] sm:$0xff]  }
 0x174   :  { %2982 = vmatpush2.bf16.msra.mxu1 %v4521_v40  ;;  %3028 = vmatprep.subr.bf16.mxu0 %v4532_v13  ;;  %v4577_v13 = vld [vmem:[%s6071_s3 + $0x98] sm:$0xff]  }
 0x175   :  { %2983 = vmatprep.subr.bf16.mxu1 %v4529_v45 }
 0x177   :  { %3029 = vmatpush2.bf16.msra.mxu0 %v4530_v48  ;;  %v434_v48 = vsub.s32 2, %v4771_v42 }
 0x178   :  { %2984 = vmatpush2.bf16.msra.mxu1 %v4527_v46  ;;  %3030 = vmatprep.subr.bf16.mxu0 %v4538_v17  ;;  %v438_v17 = vsub.s32 3, %v4771_v42 }
 0x179   :  { %2985 = vmatprep.subr.bf16.mxu1 %v4535_v50 }
 0x17b   :  { %3031 = vmatpush2.bf16.msra.mxu0 %v4536_v6  ;;  %v435_v6 = vrot.slane %v5517_v49, %v434_v48  ;;  %v3886_v48 = vld [vmem:[%s6072_s4] ss:$0 sm:$0xff] }
 0x17c   :  { %2986 = vmatpush2.bf16.msra.mxu1 %v4533_v51  ;;  %3032 = vmatprep.subr.bf16.mxu0 %v4544_v53  ;;  %v439_v53 = vrot.slane %v5517_v49, %v438_v17  ;;  %v4580_v49 = vld [vmem:[%s6071_s3 + $0x80] sm:$0xff]  }
 0x17d   :  { %2987 = vmatprep.subr.bf16.mxu1 %v4541_v18 }
 0x17f   :  { %3033 = vmatpush2.bf16.msra.mxu0 %v4542_v55 }
 0x180   :  { %2988 = vmatpush2.bf16.msra.mxu1 %v4539_v54  ;;  %3920 = vmatprep.subr.bf16.mxu0 %v4548_v57 }
 0x181   :  { %2989 = vmatprep.subr.bf16.mxu1 %v4547_v56  ;;  %v4578_v56 = vld [vmem:[%s6071_s3 + $0x90] sm:$0xff]  }
 0x182   :  { %v2708_v61 = vpop.f32.mrf.mxu0  ;;  %3035 = vmatmul.mubr.bf16.vlgmr.msra.gmra.mxu0 %v5315_v52  ;;  %v4558_v52 = vld [vmem:[%s6071_s3 + $0x68] sm:$0xff]  }
 0x183   :  { %v2749_v1 = vpop.f32.mrf.mxu1  ;;  %3921 = vmatpush3.bf16.msra.mxu0 %v4549_v43  ;;  %v2709_v30 = vadd.f32 %v2708_v61, %v5755_v35 }
 0x184   :  { %2990 = vmatpush2.bf16.msra.mxu1 %v4545_v58  ;;  %v2710_v3 = vpop.f32.mrf.mxu0  ;;  %3922 = vmatprep.subr.bf16.mxu0 %v4553_v59  ;;  %v4579_v59 = vld [vmem:[%s6071_s3 + $0x88] sm:$0xff]  }
 0x185   :  { %v2751_v0 = vpop.f32.mrf.mxu1  ;;  %2991 = vmatprep.subr.bf16.mxu1 %v4552_v33  ;;  %v2711_v7 = vadd.f32 %v2710_v3, %v5759_v32  ;;  %v4563_v32 = vld [vmem:[%s6071_s3 + $0x60] sm:$0xff]   ;;  %v2750_v35 = vadd.f32 %v2749_v1, %v2709_v30  ;;  %v4583_v3 = vld [vmem:[%s6073_s5 + $0x18] sm:$0xff]  }
 0x186   :  { %v2712_v5 = vpop.f32.mrf.mxu0  ;;  %v4581_v1 = vld [vmem:[%s6071_s3 + $0xc0] sm:$0xff]  }
 0x187   :  { %v2753_v41 = vpop.f32.mrf.mxu1  ;;  %3923 = vmatpush3.bf16.msra.mxu0 %v4554_v26  ;;  %v2752_v14 = vadd.f32 %v2751_v0, %v2711_v7  ;;  %v4611_v26 = vmov 0.0  }
 0x188   :  { %2992 = vmatpush2.bf16.msra.mxu1 %v4550_v2  ;;  %3924 = vmatprep.subr.bf16.mxu0 %v4558_v52  ;;  %v2713_v11 = vpop.f32.mrf.mxu0  ;;  %v4582_v2 = vld [vmem:[%s6073_s5 + $0x20] sm:$0xff]  }
 0x189   :  { %v2754_v10 = vpop.f32.mrf.mxu1  ;;  %3055 = vmatprep.subr.bf16.mxu1 %v4557_v4 }
 0x18b   :  { %v2790_v12 = vpop.f32.mrf.mxu1  ;;  %2994 = vmatmul.mubr.bf16.vlgmr.msra.gmra.mxu1 %v5300_v47  ;;  %3925 = vmatpush3.bf16.msra.mxu0 %v4559_v9 }
 0x18c   :  { %3056 = vmatpush1.bf16.msra.mxu1 %v4555_v8  ;;  %3926 = vmatprep.subr.bf16.mxu0 %v4563_v32  ;;  %v2791_v23 = vadd.f32 %v2790_v12, %v2750_v35 }
 0x18d   :  { %v2792_v19 = vpop.f32.mrf.mxu1  ;;  %3057 = vmatprep.subr.bf16.mxu1 %v4562_v60  ;;  %3075 = vmatprep.mubr.bf16.mxu1 %v4610_v62 }
 0x18e   :  { %v2793_v21 = vadd.f32 %v2792_v19, %v2752_v14  ;;  %v3084_v40 = vmax.f32 %v2791_v23, 0.0 }
 0x18f   :  { %v2794_v47 = vpop.f32.mrf.mxu1  ;;  %3927 = vmatpush3.bf16.msra.mxu0 %v4564_v16 }
 0x190   :  { %v3085_v22 = vmax.f32 %v2793_v21, 0.0  ;;  %3058 = vmatpush1.bf16.msra.mxu1 %v4560_v15  ;;  %3928 = vmatprep.subr.bf16.mxu0 %v4565_v20  ;;  %v3088_v45 = vpack.c.bf16 %v3084_v40, %v3084_v40 }
 0x191   :  { %v2795_v25 = vpop.f32.mrf.mxu1  ;;  %3343 = vmatprep.subr.bf16.mxu1 %v4610_v62 }
 0x192   :  { %v3089_v29 = vpack.c.bf16 %v3085_v22, %v3085_v22 }
 0x193   :  { %3885 = vmatmul.mubr.msk.bf16.vlgmr.msra.gmra.mxu1 %vm2506_vm0, %v5347_v63  ;;  %3929 = vmatpush3.bf16.msra.mxu0 %v4566_v24  ;;  %v4570_v63 = vld [vmem:[%s6071_s3 + $0x8] sm:$0xff]  }
 0x194   :  { %3335 = vmatprep.mubr.bf16.mxu0 %v3089_v29  ;;  %3930 = vmatprep.subr.bf16.mxu0 %v4567_v27 }
 0x195   :  { %3344 = vmatpush1.bf16.msra.mxu1 %v4573_v28 }
 0x196   :  { %3345 = vmatprep.subr.bf16.mxu1 %v4610_v62 }
 0x197   :  { %3931 = vmatpush3.bf16.msra.mxu0 %v4568_v31 }
 0x198   :  { %3932 = vmatprep.subr.bf16.mxu0 %v4569_v34 }
 0x199   :  { %3346 = vmatpush1.bf16.msra.mxu1 %v4574_v36 }
 0x19a   :  { %3347 = vmatprep.subr.bf16.mxu1 %v4610_v62 }
 0x19b   :  { %3933 = vmatpush3.bf16.msra.mxu0 %v4570_v63 }
 0x19c   :  { %3934 = vmatprep.subr.bf16.mxu0 %v4571_v37 }
 0x19d   :  { %3348 = vmatpush1.bf16.msra.mxu1 %v4575_v38 }
 0x19e   :  { %3349 = vmatprep.subr.bf16.mxu1 %v4610_v62 }
 0x19f   :  { %3935 = vmatpush3.bf16.msra.mxu0 %v4572_v39 }
 0x1a0   :  { %3948 = vmatprep.subr.bf16.mxu0 %v4611_v26 }
 0x1a1   :  { %3350 = vmatpush1.bf16.msra.mxu1 %v4576_v44 }
 0x1a2   :  { %3351 = vmatprep.subr.bf16.mxu1 %v4610_v62  ;;  %3336 = vmatmul.mubr.bf16.vlgmr.msra.gmra.mxu0 %v3088_v45 }
 0x1a3   :  { %3949 = vmatpush3.bf16.msra.mxu0 %v4582_v2  ;;  %3958 = vmatprep.mubr.msk.bf16.mxu0 %vm4612_vm2, %v4611_v26 }
 0x1a4   :  { %3950 = vmatprep.subr.bf16.mxu0 %v4611_v26 }
 0x1a5   :  { %3352 = vmatpush1.bf16.msra.mxu1 %v4577_v13  ;;  %v4585_v13 = vld [vmem:[%s6073_s5 + $0x8] sm:$0xff]  }
 0x1a6   :  { %3353 = vmatprep.subr.bf16.mxu1 %v4610_v62 }
 0x1a7   :  { %3951 = vmatpush3.bf16.msra.mxu0 %v4583_v3 }
 0x1a8   :  { %3952 = vmatprep.subr.bf16.mxu0 %v4611_v26 }
 0x1a9   :  { %3354 = vmatpush1.bf16.msra.mxu1 %v4578_v56  ;;  %v3913_v56 = vld [vmem:[%s6074_s6] ss:$0 sm:$0xff] }
 0x1aa   :  { %3355 = vmatprep.subr.bf16.mxu1 %v4610_v62 }
 0x1ad   :  { %3356 = vmatpush1.bf16.msra.mxu1 %v4579_v59 }
 0x1ae   :  { %3357 = vmatprep.subr.bf16.mxu1 %v4610_v62 }
 0x1b1   :  { %3358 = vmatpush1.bf16.msra.mxu1 %v4580_v49 }
 0x1b2   :  { %3373 = vmatprep.subr.bf16.mxu1 %v4610_v62  ;;  %v4584_v62 = vld [vmem:[%s6073_s5 + $0x10] sm:$0xff]  }
 0x1b3   :  { %3953 = vmatpush3.bf16.msra.mxu0 %v4584_v62 }
 0x1b4   :  { %3954 = vmatprep.subr.bf16.mxu0 %v4611_v26 }
 0x1b5   :  { %3374 = vmatpush2.bf16.msra.mxu1 %v4581_v1 }
 0x1b7   :  { %3955 = vmatpush3.bf16.msra.mxu0 %v4585_v13 }
 0x1b8   :  { %3956 = vmatprep.subr.bf16.mxu0 %v4611_v26 }
 0x1c2   :  { %v2872_v46 = vpop.f32.mrf.mxu0 }
 0x1c4   :  { %v2874_v50 = vpop.f32.mrf.mxu0 }
 0x1c6   :  { %v2876_v51 = vpop.f32.mrf.mxu0 }
 0x1c8   :  { %v2877_v18 = vpop.f32.mrf.mxu0 }
 0x1cb   :  { %v2831_v54 = vpop.f32.mrf.mxu1 }
 0x1cc   :  { %v2832_v55 = vadd.f32 %v2831_v54, %v435_v6 }
 0x1cd   :  { %v2833_v57 = vpop.f32.mrf.mxu1 }
 0x1ce   :  { %v2834_v58 = vadd.f32 %v2833_v57, %v439_v53  ;;  %v2873_v43 = vadd.f32 %v2872_v46, %v2832_v55  ;;  %v4586_v46 = vld [vmem:[%s6073_s5] sm:$0xff]   ;;  %s4613_s5 = smov [#allocation2]  }
 0x1cf   :  { %v2835_v33 = vpop.f32.mrf.mxu1  ;;  %3957 = vmatpush3.bf16.msra.mxu0 %v4586_v46  ;;  %s3484_s9 = sshll.u32 %s4613_s5, 4  ;;  %s3485_s9 = int_to_ptr.vmem [resolvable:$true] %s3484_s9 }
 0x1d0   :  { %v2875_v42 = vadd.f32 %v2874_v50, %v2834_v58  ;;  %s4587_s4 = scalar_lea.vmem %s3485_s9, 32  ;;  %p4592_p1 = scmp.lt.s32.totalorder %s3485_s9, %s3485_s9 }
 0x1d1   :  { %v2836_v61 = vpop.f32.mrf.mxu1  ;;  %p4588_p0 = scmp.ne.s32.totalorder %s3485_s9, %s4587_s4  ;;  %p4593_p2 = scmp.lt.s32.totalorder %s4587_s4, %s4587_s4 }
 0x1d3   :  { %p4594_p3 = por %p4593_p2, %p4592_p1 }
 0x1d5   :  { %p4595_p4 = pnand %p4594_p3, %p4588_p0 }
 0x202   :  { %v2954_v0 = vpop.f32.mrf.mxu0 }
 0x204   :  { %v2956_v4 = vpop.f32.mrf.mxu0 }
 0x206   :  { %v2958_v52 = vpop.f32.mrf.mxu0 }
 0x208   :  { %v2959_v41 = vpop.f32.mrf.mxu0 }
 0x20b   :  { %v2913_v5 = vpop.f32.mrf.mxu1 }
 0x20c   :  { %v2914_v7 = vadd.f32 %v2913_v5, %v2873_v43 }
 0x20d   :  { %v2915_v8 = vpop.f32.mrf.mxu1 }
 0x20e   :  { %v2916_v9 = vadd.f32 %v2915_v8, %v2875_v42  ;;  %v2955_v10 = vadd.f32 %v2954_v0, %v2914_v7 }
 0x20f   :  { %v2917_v60 = vpop.f32.mrf.mxu1 }
 0x210   :  { %v2957_v32 = vadd.f32 %v2956_v4, %v2916_v9 }
 0x211   :  { %v2918_v11 = vpop.f32.mrf.mxu1 }
 0x242   :  { %v3036_v12 = vpop.f32.mrf.mxu0 }
 0x244   :  { %v3038_v14 = vpop.f32.mrf.mxu0 }
 0x246   :  { %v3040_v15 = vpop.f32.mrf.mxu0 }
 0x248   :  { %v3041_v16 = vpop.f32.mrf.mxu0 }
 0x24b   :  { %v2995_v19 = vpop.f32.mrf.mxu1 }
 0x24c   :  { %v2996_v21 = vadd.f32 %v2995_v19, %v2955_v10 }
 0x24d   :  { %v2997_v20 = vpop.f32.mrf.mxu1 }
 0x24e   :  { %v2998_v22 = vadd.f32 %v2997_v20, %v2957_v32  ;;  %v3037_v25 = vadd.f32 %v3036_v12, %v2996_v21 }
 0x24f   :  { %v2999_v47 = vpop.f32.mrf.mxu1 }
 0x250   :  { %v3039_v28 = vadd.f32 %v3038_v14, %v2998_v22 }
 0x251   :  { %v3000_v24 = vpop.f32.mrf.mxu1 }
 0x253   :  { %v3077_v27 = vpop.f32.mrf.mxu1 }
 0x254   :  { %v3078_v29 = vadd.f32 %v3077_v27, %v3037_v25 }
 0x255   :  { %v3079_v30 = vpop.f32.mrf.mxu1 }
 0x256   :  { %v3080_v31 = vadd.f32 %v3079_v30, %v3039_v28  ;;  %v3086_v34 = vmax.f32 %v3078_v29, 0.0 }
 0x257   :  { %v3081_v36 = vpop.f32.mrf.mxu1 }
 0x258   :  { %v3087_v35 = vmax.f32 %v3080_v31, 0.0  ;;  %v3090_v37 = vpack.c.bf16 %v3086_v34, %v3086_v34 }
 0x259   :  { %v3082_v63 = vpop.f32.mrf.mxu1 }
 0x25a   :  { %v3091_v23 = vpack.c.bf16 %v3087_v35, %v3087_v35 }
 0x25c   :  { %3912 = vmatprep.mubr.msk.bf16.mxu1 %vm3299_vm1, %v3091_v23 }
 0x25d   :  { %3376 = vmatmul.mubr.bf16.vlgmr.msra.gmra.mxu1 %v3090_v37 }
 0x262   :  { %v3936_v38 = vpop.f32.mrf.mxu0 }
 0x264   :  { %v3937_v39 = vpop.f32.mrf.mxu0 }
 0x265   :  { %v3938_v40 = vadd.f32 %v3937_v39, %v3936_v38 }
 0x266   :  { %v3939_v44 = vpop.f32.mrf.mxu0 }
 0x267   :  { %v3338_v50 = vadd.f32 %v3938_v40, %v3886_v48 }
 0x268   :  { %v3940_v45 = vpop.f32.mrf.mxu0 }
 0x31d   :  { %v3377_v17 = vpop.f32.mrf.mxu1 }
 0x31e   :  { %v3378_v51 = vadd.f32 %v3377_v17, %v3338_v50 }
 0x31f   :  { %v3379_v6 = vpop.f32.mrf.mxu1 }
 0x320   :  { %v3383_v18 = vmax.f32 %v3378_v51, 0.0 }
 0x321   :  { %v3380_v53 = vpop.f32.mrf.mxu1 }
 0x322   :  { %v3384_v54 = vpack.c.bf16 %v3383_v18, %v3383_v18 }
 0x323   :  { %v3381_v55 = vpop.f32.mrf.mxu1 }
 0x324   :  { %3959 = vmatmul.mubr.msk.bf16.vlgmr.msra.gmra.mxu0 %vm3432_vm3, %v3384_v54 }
 0x3e4   :  { %v3470_v57 = vpop.f32.mrf.mxu0 }
 0x3e5   :  { %v3471_v58 = vadd.f32 %v3913_v56, %v3470_v57 }
 0x3e6   :  { %v3960_v43 = vpop.f32.mrf.mxu0 }
 0x3e7   :  { %3477 = vst.msk [vmem:[#allocation2] sm:$0x3] %vm3476_vm4, %v3471_v58 }
 0x3e8   :  { %v3473_v33 = vpop.f32.mrf.mxu0 }
 0x3e9   :  { %4598 = shalt.err (!%p4595_p4)
}
 0x3ea   :  { %3487 = dma.vmem_to_hbm [thread:$0]  %s3485_s9, 32, %s6075_s7, [#allocation3]   ;;  %v3961_v42 = vpop.f32.mrf.mxu0 }
 0x3eb   :  { %4607 = dma.done.wait [#allocation3], 32  }
 0x3ec   :  { %4608 = vsyncadd [#allocation3], 4294967264 }
 0x3ed   :  { %3491 = vsyncpa [#allocation3], 1 }

</bundles_post_ra>
